<compile_context>
chip_gen: v7x
topology: tpu7x:2x2x1
jax: 0.10.0
libtpu: 0.0.40
codegen_flags: <defaults>
</compile_context>

<pallas_src>
import functools

import jax
import jax.numpy as jnp
import numpy as np
from jax import lax
from jax.experimental import pallas as pl
from jax.experimental.pallas import tpu as pltpu


def _round_up(x: int, m: int) -> int:
    return (x + m - 1) // m * m


def _make_lstm_kernel(num_layers: int):
    L = num_layers

    def kernel(x_ref, *rest):
        # rest = [w_ih_0, w_hh_0, b_0, ..., w_ih_{L-1}, w_hh_{L-1}, b_{L-1},
        #         w_fc, b_fc, o_ref, xproj_scr, seq_scr]
        w_refs = rest[: 3 * L]
        w_fc_ref = rest[3 * L]
        b_fc_ref = rest[3 * L + 1]
        o_ref = rest[3 * L + 2]
        xproj_scr = rest[3 * L + 3]   # (T, Bt, 4Hp) f32
        seq_scr = rest[3 * L + 4]     # (T, Bt, Hp)  bf16

        T, Bt = x_ref.shape[0], x_ref.shape[1]
        H4 = xproj_scr.shape[2]
        Hp = H4 // 4

        h_last = None
        for l in range(L):  # static (unrolled) layer loop
            # Hoist loop-invariant weight loads out of the time loop.
            w_ih = w_refs[3 * l][...]       # (D_l, 4Hp) bf16
            w_hh = w_refs[3 * l + 1][...]   # (Hp, 4Hp)  bf16
            b = w_refs[3 * l + 2][...]      # (1, 4Hp)   f32

            inp_seq = x_ref[...] if l == 0 else seq_scr[...]
            D_l = inp_seq.shape[2]

            # One big MXU-friendly input projection for the whole sequence
            # (bias folded in); only the recurrent matmul stays serial.
            xproj = jnp.dot(inp_seq.reshape(T * Bt, D_l), w_ih,
                            preferred_element_type=jnp.float32)
            xproj_scr[...] = (xproj + b).reshape(T, Bt, H4)

            is_last = (l == L - 1)

            def step(t, carry, _is_last=is_last, _w_hh=w_hh):
                h_prev, c_prev = carry  # (Bt, Hp) f32 each
                gates = xproj_scr[t] + jnp.dot(
                    h_prev.astype(jnp.bfloat16), _w_hh,
                    preferred_element_type=jnp.float32)   # (Bt, 4Hp) f32
                # Lane-aligned gate slices (Hp is a multiple of 128).
                i_g = jax.nn.sigmoid(gates[:, 0 * Hp:1 * Hp])
                f_g = jax.nn.sigmoid(gates[:, 1 * Hp:2 * Hp])
                g_g = jnp.tanh(gates[:, 2 * Hp:3 * Hp])
                o_g = jax.nn.sigmoid(gates[:, 3 * Hp:4 * Hp])
                c_new = f_g * c_prev + i_g * g_g          # f32 cell state
                h_new = o_g * jnp.tanh(c_new)
                if not _is_last:
                    seq_scr[t] = h_new.astype(jnp.bfloat16)
                return (h_new, c_new)

            h0 = jnp.zeros((Bt, Hp), jnp.float32)   # matches torch.zeros init
            c0 = jnp.zeros((Bt, Hp), jnp.float32)
            unroll = True if T <= 16 else 4
            h_last, _ = lax.fori_loop(0, T, step, (h0, c0), unroll=unroll)

        # fc on the last timestep of the top layer; lane-dense (Op = 128k) store.
        o_ref[...] = (
            jnp.dot(h_last.astype(jnp.bfloat16), w_fc_ref[...],
                    preferred_element_type=jnp.float32)
            + b_fc_ref[...]
        ).astype(o_ref.dtype)

    return kernel


def _num_batch_tiles(Bp: int) -> int:
    """Split the padded batch across the 2 TensorCores on v7x; single tile elsewhere."""
    try:
        kind = jax.devices()[0].device_kind.lower()
    except Exception:  # pragma: no cover
        kind = ""
    if "v7" in kind and Bp % 32 == 0:
        return 2
    return 1


def _pad_gates(a, H: int, Hp: int):
    """Zero-pad the trailing 4H axis to 4Hp, per gate block [i,f,g,o]."""
    lead = a.shape[:-1]
    a4 = a.reshape(lead + (4, H))
    pad = [(0, 0)] * len(lead) + [(0, 0), (0, Hp - H)]
    return jnp.pad(a4, pad).reshape(lead + (4 * Hp,))


def lstm_model_forward(x, params, *, num_layers, hidden_dim, output_dim):
    """x: (B, T, D_in) float32.  Returns (B, output_dim) float32."""
    B, T, D_in = x.shape
    H = hidden_dim
    Hp = _round_up(H, 128)
    Dp = _round_up(D_in, 128)
    Op = _round_up(output_dim, 128)
    Bp = _round_up(B, 16)

    # Time-major, batch/feature padded, bf16 input.
    x_tm = jnp.transpose(x, (1, 0, 2))                                # (T, B, D_in)
    x_tm = jnp.pad(x_tm, ((0, 0), (0, Bp - B), (0, Dp - D_in)))
    x_tm = x_tm.astype(jnp.bfloat16)

    # Pad weights (exactly semantics-preserving: padded rows/cols are zero).
    flat_inputs = [x_tm]
    for l in range(num_layers):
        w_ih, w_hh, b = params["layers"][l]            # (d_l,4H), (H,4H), (1,4H)
        d_l, dp_l = (D_in, Dp) if l == 0 else (H, Hp)
        w_ih_p = _pad_gates(jnp.pad(w_ih, ((0, dp_l - d_l), (0, 0))), H, Hp)
        w_hh_p = _pad_gates(jnp.pad(w_hh, ((0, Hp - H), (0, 0))), H, Hp)
        b_p = _pad_gates(b, H, Hp)
        flat_inputs += [w_ih_p.astype(jnp.bfloat16),
                        w_hh_p.astype(jnp.bfloat16),
                        b_p.astype(jnp.float32)]
    w_fc_p = jnp.pad(params["w_fc"], ((0, Hp - H), (0, Op - output_dim)))
    b_fc_p = jnp.pad(params["b_fc"], ((0, 0), (0, Op - output_dim)))
    flat_inputs += [w_fc_p.astype(jnp.bfloat16), b_fc_p.astype(jnp.float32)]

    n_tiles = _num_batch_tiles(Bp)
    Bt = Bp // n_tiles

    def _replicated_spec(shape):
        zeros = (0,) * len(shape)
        return pl.BlockSpec(shape, lambda i, _z=zeros: _z)

    in_specs = [pl.BlockSpec((T, Bt, Dp), lambda i: (0, i, 0))]
    for arr in flat_inputs[1:]:
        in_specs.append(_replicated_spec(arr.shape))
    out_spec = pl.BlockSpec((Bt, Op), lambda i: (i, 0))

    kernel = _make_lstm_kernel(num_layers)

    # TODO(synk): for very large T, stream x in time chunks (grid axis over T)
    # instead of keeping the full sequence VMEM-resident.
    out = pl.pallas_call(
        kernel,
        out_shape=jax.ShapeDtypeStruct((Bp, Op), jnp.float32),
        grid_spec=pltpu.PrefetchScalarGridSpec(
            num_scalar_prefetch=0,
            grid=(n_tiles,),
            in_specs=in_specs,
            out_specs=out_spec,
            scratch_shapes=[
                pltpu.VMEM((T, Bt, 4 * Hp), jnp.float32),   # precomputed input projections
                pltpu.VMEM((T, Bt, Hp), jnp.bfloat16),      # layer output sequence
            ]),
        compiler_params=pltpu.CompilerParams(
            dimension_semantics=("parallel",),
            vmem_limit_bytes=48 << 20),
    )(*flat_inputs)
    return out[:B, :output_dim]


def init_params(key, input_dim, hidden_dim, num_layers, output_dim):
    """Deterministic init matching PyTorch parameter shapes (then transposed
    for kernel-friendly (D, 4H) / (H, out) layouts), float32, unpadded."""
    H = hidden_dim
    keys = jax.random.split(key, 4 * num_layers + 2)
    k_idx = 0
    layers = []
    for l in range(num_layers):
        d_l = input_dim if l == 0 else hidden_dim
        scale = 1.0 / np.sqrt(H)
        w_ih_t = jax.random.uniform(keys[k_idx], (4 * H, d_l), jnp.float32, -scale, scale); k_idx += 1
        w_hh_t = jax.random.uniform(keys[k_idx], (4 * H, H), jnp.float32, -scale, scale); k_idx += 1
        b_ih = jax.random.uniform(keys[k_idx], (4 * H,), jnp.float32, -scale, scale); k_idx += 1
        b_hh = jax.random.uniform(keys[k_idx], (4 * H,), jnp.float32, -scale, scale); k_idx += 1
        layers.append((
            jnp.transpose(w_ih_t),              # (d_l, 4H)
            jnp.transpose(w_hh_t),              # (H, 4H)
            (b_ih + b_hh).reshape(1, 4 * H),    # (1, 4H) = b_ih + b_hh
        ))
    scale = 1.0 / np.sqrt(H)
    w_fc_t = jax.random.uniform(keys[k_idx], (output_dim, H), jnp.float32, -scale, scale); k_idx += 1
    b_fc = jax.random.uniform(keys[k_idx], (output_dim,), jnp.float32, -scale, scale); k_idx += 1
    return {
        "layers": layers,
        "w_fc": jnp.transpose(w_fc_t),          # (H, output_dim)
        "b_fc": b_fc.reshape(1, output_dim),    # (1, output_dim)
    }


def reference_forward(x, params, *, num_layers, hidden_dim):
    """Pure-JAX reference of the stacked-LSTM + fc forward, mirroring the
    kernel's precision (bf16 matmul operands, f32 accumulation & cell state)."""
    B, T, _ = x.shape
    H = hidden_dim
    bf = jnp.bfloat16
    h = [jnp.zeros((B, H), jnp.float32) for _ in range(num_layers)]
    c = [jnp.zeros((B, H), jnp.float32) for _ in range(num_layers)]
    for t in range(T):
        inp = x[:, t, :]
        for l in range(num_layers):
            w_ih, w_hh, b = params["layers"][l]
            gates = (
                jnp.dot(inp.astype(bf), w_ih.astype(bf), preferred_element_type=jnp.float32)
                + jnp.dot(h[l].astype(bf), w_hh.astype(bf), preferred_element_type=jnp.float32)
                + b
            )
            i_g = jax.nn.sigmoid(gates[:, 0 * H:1 * H])
            f_g = jax.nn.sigmoid(gates[:, 1 * H:2 * H])
            g_g = jnp.tanh(gates[:, 2 * H:3 * H])
            o_g = jax.nn.sigmoid(gates[:, 3 * H:4 * H])
            c[l] = f_g * c[l] + i_g * g_g
            h[l] = o_g * jnp.tanh(c[l])
            inp = h[l]
    return (jnp.dot(h[-1].astype(bf), params["w_fc"].astype(bf),
                    preferred_element_type=jnp.float32)
            + params["b_fc"])


if __name__ == "__main__":
    B, T = 2, 8
    input_dim, hidden_dim, num_layers, output_dim = 16, 32, 2, 4

    key = jax.random.PRNGKey(0)
    k_x, k_p = jax.random.split(key)
    x = jax.random.normal(k_x, (B, T, input_dim), jnp.float32)
    params = init_params(k_p, input_dim, hidden_dim, num_layers, output_dim)

    fwd = jax.jit(functools.partial(
        lstm_model_forward,
        num_layers=num_layers, hidden_dim=hidden_dim, output_dim=output_dim))
    out = fwd(x, params)
    out = jax.block_until_ready(out)

    ref = reference_forward(x, params, num_layers=num_layers, hidden_dim=hidden_dim)
    np.testing.assert_allclose(np.asarray(out), np.asarray(ref), rtol=1e-2, atol=1e-2)

    print("KERNEL_OK")
</pallas_src>

<mosaic_0001>
module attributes {stable_mosaic.version = 11 : i64} {
  func.func @kernel(%arg0: i32, %arg1: memref<8x16x128xbf16, #tpu.memory_space<vmem>>, %arg2: memref<128x512xbf16, #tpu.memory_space<vmem>>, %arg3: memref<128x512xbf16, #tpu.memory_space<vmem>>, %arg4: memref<1x512xf32, #tpu.memory_space<vmem>>, %arg5: memref<128x512xbf16, #tpu.memory_space<vmem>>, %arg6: memref<128x512xbf16, #tpu.memory_space<vmem>>, %arg7: memref<1x512xf32, #tpu.memory_space<vmem>>, %arg8: memref<128x128xbf16, #tpu.memory_space<vmem>>, %arg9: memref<1x128xf32, #tpu.memory_space<vmem>>, %arg10: memref<16x128xf32, #tpu.memory_space<vmem>>, %arg11: memref<8x16x512xf32, #tpu.memory_space<vmem>>, %arg12: memref<8x16x128xbf16, #tpu.memory_space<vmem>>) attributes {dimension_semantics = [#tpu.dimension_semantics<parallel>], iteration_bounds = array<i64: 1>, scalar_prefetch = 0 : i64, scratch_operands = 2 : i64, tpu.core_type = #tpu.core_type<tc>, window_params = [{transform_indices = @transform_0, window_bounds = array<i64: 8, 16, 128>}, {pipeline_mode = #tpu.pipeline_mode<synchronous>, transform_indices = @transform_1, window_bounds = array<i64: 128, 512>}, {pipeline_mode = #tpu.pipeline_mode<synchronous>, transform_indices = @transform_2, window_bounds = array<i64: 128, 512>}, {pipeline_mode = #tpu.pipeline_mode<synchronous>, transform_indices = @transform_3, window_bounds = array<i64: 1, 512>}, {pipeline_mode = #tpu.pipeline_mode<synchronous>, transform_indices = @transform_4, window_bounds = array<i64: 128, 512>}, {pipeline_mode = #tpu.pipeline_mode<synchronous>, transform_indices = @transform_5, window_bounds = array<i64: 128, 512>}, {pipeline_mode = #tpu.pipeline_mode<synchronous>, transform_indices = @transform_6, window_bounds = array<i64: 1, 512>}, {pipeline_mode = #tpu.pipeline_mode<synchronous>, transform_indices = @transform_7, window_bounds = array<i64: 128, 128>}, {pipeline_mode = #tpu.pipeline_mode<synchronous>, transform_indices = @transform_8, window_bounds = array<i64: 1, 128>}, {transform_indices = @transform_9, window_bounds = array<i64: 16, 128>}]} {
    %c0 = arith.constant 0 : index
    %c0_0 = arith.constant 0 : index
    %0 = vector.load %arg2[%c0, %c0_0] : memref<128x512xbf16, #tpu.memory_space<vmem>>, vector<128x512xbf16>
    %c0_1 = arith.constant 0 : index
    %c0_2 = arith.constant 0 : index
    %1 = vector.load %arg3[%c0_1, %c0_2] : memref<128x512xbf16, #tpu.memory_space<vmem>>, vector<128x512xbf16>
    %c0_3 = arith.constant 0 : index
    %c0_4 = arith.constant 0 : index
    %2 = vector.load %arg4[%c0_3, %c0_4] : memref<1x512xf32, #tpu.memory_space<vmem>>, vector<1x512xf32>
    %c0_5 = arith.constant 0 : index
    %c0_6 = arith.constant 0 : index
    %c0_7 = arith.constant 0 : index
    %3 = vector.load %arg1[%c0_5, %c0_6, %c0_7] : memref<8x16x128xbf16, #tpu.memory_space<vmem>>, vector<8x16x128xbf16>
    %4 = vector.shape_cast %3 : vector<8x16x128xbf16> to vector<128x128xbf16>
    %cst = arith.constant dense<0.000000e+00> : vector<128x512xf32>
    %5 = tpu.matmul %4, %0, %cst {dimension_numbers = #tpu.dot_dimension_numbers<[1], [0], [0], [1], [0, 0, 1, 1], [], []>} : vector<128x128xbf16>, vector<128x512xbf16>, vector<128x512xf32> -> vector<128x512xf32>
    %6 = vector.broadcast %2 : vector<1x512xf32> to vector<128x512xf32>
    %7 = arith.addf %5, %6 : vector<128x512xf32>
    %8 = vector.shape_cast %7 : vector<128x512xf32> to vector<8x16x512xf32>
    %c0_8 = arith.constant 0 : index
    %c0_9 = arith.constant 0 : index
    %c0_10 = arith.constant 0 : index
    %9 = vector.load %arg11[%c0_8, %c0_9, %c0_10] : memref<8x16x512xf32, #tpu.memory_space<vmem>>, vector<8x16x512xf32>
    tpu.vector_store %arg11[%c0_8, %c0_9, %c0_10], %8 {strides = array<i32>} : memref<8x16x512xf32, #tpu.memory_space<vmem>>, vector<8x16x512xf32>,
    %cst_11 = arith.constant 0.000000e+00 : f32
    %10 = vector.broadcast %cst_11 : f32 to vector<16x128xf32>
    %cst_12 = arith.constant 0.000000e+00 : f32
    %11 = vector.broadcast %cst_12 : f32 to vector<16x128xf32>
    %c0_i32 = arith.constant 0 : i32
    %12 = arith.index_cast %c0_i32 : i32 to index
    %c0_13 = arith.constant 0 : index
    %c0_14 = arith.constant 0 : index
    %13 = vector.load %arg11[%12, %c0_13, %c0_14] : memref<8x16x512xf32, #tpu.memory_space<vmem>>, vector<1x16x512xf32>
    %14 = vector.shape_cast %13 : vector<1x16x512xf32> to vector<16x512xf32>
    %15 = arith.truncf %10 : vector<16x128xf32> to vector<16x128xbf16>
    %cst_15 = arith.constant dense<0.000000e+00> : vector<16x512xf32>
    %16 = tpu.matmul %15, %1, %cst_15 {dimension_numbers = #tpu.dot_dimension_numbers<[1], [0], [0], [1], [0, 0, 1, 1], [], []>} : vector<16x128xbf16>, vector<128x512xbf16>, vector<16x512xf32> -> vector<16x512xf32>
    %17 = arith.addf %14, %16 : vector<16x512xf32>
    %18 = vector.extract_strided_slice %17 {offsets = [0, 0], sizes = [16, 128], strides = [1, 1]} : vector<16x512xf32> to vector<16x128xf32>
    %19 = arith.negf %18 : vector<16x128xf32>
    %20 = math.exp %19 : vector<16x128xf32>
    %cst_16 = arith.constant 1.000000e+00 : f32
    %21 = vector.broadcast %cst_16 : f32 to vector<16x128xf32>
    %22 = arith.addf %21, %20 : vector<16x128xf32>
    %23 = arith.divf %21, %22 : vector<16x128xf32>
    %24 = vector.extract_strided_slice %17 {offsets = [0, 128], sizes = [16, 128], strides = [1, 1]} : vector<16x512xf32> to vector<16x128xf32>
    %25 = arith.negf %24 : vector<16x128xf32>
    %26 = math.exp %25 : vector<16x128xf32>
    %cst_17 = arith.constant 1.000000e+00 : f32
    %27 = vector.broadcast %cst_17 : f32 to vector<16x128xf32>
    %28 = arith.addf %27, %26 : vector<16x128xf32>
    %29 = arith.divf %27, %28 : vector<16x128xf32>
    %30 = vector.extract_strided_slice %17 {offsets = [0, 256], sizes = [16, 128], strides = [1, 1]} : vector<16x512xf32> to vector<16x128xf32>
    %31 = math.tanh %30 : vector<16x128xf32>
    %32 = vector.extract_strided_slice %17 {offsets = [0, 384], sizes = [16, 128], strides = [1, 1]} : vector<16x512xf32> to vector<16x128xf32>
    %33 = arith.negf %32 : vector<16x128xf32>
    %34 = math.exp %33 : vector<16x128xf32>
    %cst_18 = arith.constant 1.000000e+00 : f32
    %35 = vector.broadcast %cst_18 : f32 to vector<16x128xf32>
    %36 = arith.addf %35, %34 : vector<16x128xf32>
    %37 = arith.divf %35, %36 : vector<16x128xf32>
    %38 = arith.mulf %29, %11 : vector<16x128xf32>
    %39 = arith.mulf %23, %31 : vector<16x128xf32>
    %40 = arith.addf %38, %39 : vector<16x128xf32>
    %41 = math.tanh %40 : vector<16x128xf32>
    %42 = arith.mulf %37, %41 : vector<16x128xf32>
    %43 = arith.truncf %42 : vector<16x128xf32> to vector<16x128xbf16>
    %44 = arith.index_cast %c0_i32 : i32 to index
    %c0_19 = arith.constant 0 : index
    %c0_20 = arith.constant 0 : index
    %45 = vector.load %arg12[%44, %c0_19, %c0_20] : memref<8x16x128xbf16, #tpu.memory_space<vmem>>, vector<1x16x128xbf16>
    %46 = vector.shape_cast %45 : vector<1x16x128xbf16> to vector<16x128xbf16>
    %47 = vector.shape_cast %43 : vector<16x128xbf16> to vector<1x16x128xbf16>
    tpu.vector_store %arg12[%44, %c0_19, %c0_20], %47 {strides = array<i32>} : memref<8x16x128xbf16, #tpu.memory_space<vmem>>, vector<1x16x128xbf16>,
    %c1_i32 = arith.constant 1 : i32
    %48 = arith.index_cast %c1_i32 : i32 to index
    %c0_21 = arith.constant 0 : index
    %c0_22 = arith.constant 0 : index
    %49 = vector.load %arg11[%48, %c0_21, %c0_22] : memref<8x16x512xf32, #tpu.memory_space<vmem>>, vector<1x16x512xf32>
    %50 = vector.shape_cast %49 : vector<1x16x512xf32> to vector<16x512xf32>
    %51 = arith.truncf %42 : vector<16x128xf32> to vector<16x128xbf16>
    %cst_23 = arith.constant dense<0.000000e+00> : vector<16x512xf32>
    %52 = tpu.matmul %51, %1, %cst_23 {dimension_numbers = #tpu.dot_dimension_numbers<[1], [0], [0], [1], [0, 0, 1, 1], [], []>} : vector<16x128xbf16>, vector<128x512xbf16>, vector<16x512xf32> -> vector<16x512xf32>
    %53 = arith.addf %50, %52 : vector<16x512xf32>
    %54 = vector.extract_strided_slice %53 {offsets = [0, 0], sizes = [16, 128], strides = [1, 1]} : vector<16x512xf32> to vector<16x128xf32>
    %55 = arith.negf %54 : vector<16x128xf32>
    %56 = math.exp %55 : vector<16x128xf32>
    %cst_24 = arith.constant 1.000000e+00 : f32
    %57 = vector.broadcast %cst_24 : f32 to vector<16x128xf32>
    %58 = arith.addf %57, %56 : vector<16x128xf32>
    %59 = arith.divf %57, %58 : vector<16x128xf32>
    %60 = vector.extract_strided_slice %53 {offsets = [0, 128], sizes = [16, 128], strides = [1, 1]} : vector<16x512xf32> to vector<16x128xf32>
    %61 = arith.negf %60 : vector<16x128xf32>
    %62 = math.exp %61 : vector<16x128xf32>
    %cst_25 = arith.constant 1.000000e+00 : f32
    %63 = vector.broadcast %cst_25 : f32 to vector<16x128xf32>
    %64 = arith.addf %63, %62 : vector<16x128xf32>
    %65 = arith.divf %63, %64 : vector<16x128xf32>
    %66 = vector.extract_strided_slice %53 {offsets = [0, 256], sizes = [16, 128], strides = [1, 1]} : vector<16x512xf32> to vector<16x128xf32>
    %67 = math.tanh %66 : vector<16x128xf32>
    %68 = vector.extract_strided_slice %53 {offsets = [0, 384], sizes = [16, 128], strides = [1, 1]} : vector<16x512xf32> to vector<16x128xf32>
    %69 = arith.negf %68 : vector<16x128xf32>
    %70 = math.exp %69 : vector<16x128xf32>
    %cst_26 = arith.constant 1.000000e+00 : f32
    %71 = vector.broadcast %cst_26 : f32 to vector<16x128xf32>
    %72 = arith.addf %71, %70 : vector<16x128xf32>
    %73 = arith.divf %71, %72 : vector<16x128xf32>
    %74 = arith.mulf %65, %40 : vector<16x128xf32>
    %75 = arith.mulf %59, %67 : vector<16x128xf32>
    %76 = arith.addf %74, %75 : vector<16x128xf32>
    %77 = math.tanh %76 : vector<16x128xf32>
    %78 = arith.mulf %73, %77 : vector<16x128xf32>
    %79 = arith.truncf %78 : vector<16x128xf32> to vector<16x128xbf16>
    %80 = arith.index_cast %c1_i32 : i32 to index
    %c0_27 = arith.constant 0 : index
    %c0_28 = arith.constant 0 : index
    %81 = vector.load %arg12[%80, %c0_27, %c0_28] : memref<8x16x128xbf16, #tpu.memory_space<vmem>>, vector<1x16x128xbf16>
    %82 = vector.shape_cast %81 : vector<1x16x128xbf16> to vector<16x128xbf16>
    %83 = vector.shape_cast %79 : vector<16x128xbf16> to vector<1x16x128xbf16>
    tpu.vector_store %arg12[%80, %c0_27, %c0_28], %83 {strides = array<i32>} : memref<8x16x128xbf16, #tpu.memory_space<vmem>>, vector<1x16x128xbf16>,
    %c2_i32 = arith.constant 2 : i32
    %84 = arith.index_cast %c2_i32 : i32 to index
    %c0_29 = arith.constant 0 : index
    %c0_30 = arith.constant 0 : index
    %85 = vector.load %arg11[%84, %c0_29, %c0_30] : memref<8x16x512xf32, #tpu.memory_space<vmem>>, vector<1x16x512xf32>
    %86 = vector.shape_cast %85 : vector<1x16x512xf32> to vector<16x512xf32>
    %87 = arith.truncf %78 : vector<16x128xf32> to vector<16x128xbf16>
    %cst_31 = arith.constant dense<0.000000e+00> : vector<16x512xf32>
    %88 = tpu.matmul %87, %1, %cst_31 {dimension_numbers = #tpu.dot_dimension_numbers<[1], [0], [0], [1], [0, 0, 1, 1], [], []>} : vector<16x128xbf16>, vector<128x512xbf16>, vector<16x512xf32> -> vector<16x512xf32>
    %89 = arith.addf %86, %88 : vector<16x512xf32>
    %90 = vector.extract_strided_slice %89 {offsets = [0, 0], sizes = [16, 128], strides = [1, 1]} : vector<16x512xf32> to vector<16x128xf32>
    %91 = arith.negf %90 : vector<16x128xf32>
    %92 = math.exp %91 : vector<16x128xf32>
    %cst_32 = arith.constant 1.000000e+00 : f32
    %93 = vector.broadcast %cst_32 : f32 to vector<16x128xf32>
    %94 = arith.addf %93, %92 : vector<16x128xf32>
    %95 = arith.divf %93, %94 : vector<16x128xf32>
    %96 = vector.extract_strided_slice %89 {offsets = [0, 128], sizes = [16, 128], strides = [1, 1]} : vector<16x512xf32> to vector<16x128xf32>
    %97 = arith.negf %96 : vector<16x128xf32>
    %98 = math.exp %97 : vector<16x128xf32>
    %cst_33 = arith.constant 1.000000e+00 : f32
    %99 = vector.broadcast %cst_33 : f32 to vector<16x128xf32>
    %100 = arith.addf %99, %98 : vector<16x128xf32>
    %101 = arith.divf %99, %100 : vector<16x128xf32>
    %102 = vector.extract_strided_slice %89 {offsets = [0, 256], sizes = [16, 128], strides = [1, 1]} : vector<16x512xf32> to vector<16x128xf32>
    %103 = math.tanh %102 : vector<16x128xf32>
    %104 = vector.extract_strided_slice %89 {offsets = [0, 384], sizes = [16, 128], strides = [1, 1]} : vector<16x512xf32> to vector<16x128xf32>
    %105 = arith.negf %104 : vector<16x128xf32>
    %106 = math.exp %105 : vector<16x128xf32>
    %cst_34 = arith.constant 1.000000e+00 : f32
    %107 = vector.broadcast %cst_34 : f32 to vector<16x128xf32>
    %108 = arith.addf %107, %106 : vector<16x128xf32>
    %109 = arith.divf %107, %108 : vector<16x128xf32>
    %110 = arith.mulf %101, %76 : vector<16x128xf32>
    %111 = arith.mulf %95, %103 : vector<16x128xf32>
    %112 = arith.addf %110, %111 : vector<16x128xf32>
    %113 = math.tanh %112 : vector<16x128xf32>
    %114 = arith.mulf %109, %113 : vector<16x128xf32>
    %115 = arith.truncf %114 : vector<16x128xf32> to vector<16x128xbf16>
    %116 = arith.index_cast %c2_i32 : i32 to index
    %c0_35 = arith.constant 0 : index
    %c0_36 = arith.constant 0 : index
    %117 = vector.load %arg12[%116, %c0_35, %c0_36] : memref<8x16x128xbf16, #tpu.memory_space<vmem>>, vector<1x16x128xbf16>
    %118 = vector.shape_cast %117 : vector<1x16x128xbf16> to vector<16x128xbf16>
    %119 = vector.shape_cast %115 : vector<16x128xbf16> to vector<1x16x128xbf16>
    tpu.vector_store %arg12[%116, %c0_35, %c0_36], %119 {strides = array<i32>} : memref<8x16x128xbf16, #tpu.memory_space<vmem>>, vector<1x16x128xbf16>,
    %c3_i32 = arith.constant 3 : i32
    %120 = arith.index_cast %c3_i32 : i32 to index
    %c0_37 = arith.constant 0 : index
    %c0_38 = arith.constant 0 : index
    %121 = vector.load %arg11[%120, %c0_37, %c0_38] : memref<8x16x512xf32, #tpu.memory_space<vmem>>, vector<1x16x512xf32>
    %122 = vector.shape_cast %121 : vector<1x16x512xf32> to vector<16x512xf32>
    %123 = arith.truncf %114 : vector<16x128xf32> to vector<16x128xbf16>
    %cst_39 = arith.constant dense<0.000000e+00> : vector<16x512xf32>
    %124 = tpu.matmul %123, %1, %cst_39 {dimension_numbers = #tpu.dot_dimension_numbers<[1], [0], [0], [1], [0, 0, 1, 1], [], []>} : vector<16x128xbf16>, vector<128x512xbf16>, vector<16x512xf32> -> vector<16x512xf32>
    %125 = arith.addf %122, %124 : vector<16x512xf32>
    %126 = vector.extract_strided_slice %125 {offsets = [0, 0], sizes = [16, 128], strides = [1, 1]} : vector<16x512xf32> to vector<16x128xf32>
    %127 = arith.negf %126 : vector<16x128xf32>
    %128 = math.exp %127 : vector<16x128xf32>
    %cst_40 = arith.constant 1.000000e+00 : f32
    %129 = vector.broadcast %cst_40 : f32 to vector<16x128xf32>
    %130 = arith.addf %129, %128 : vector<16x128xf32>
    %131 = arith.divf %129, %130 : vector<16x128xf32>
    %132 = vector.extract_strided_slice %125 {offsets = [0, 128], sizes = [16, 128], strides = [1, 1]} : vector<16x512xf32> to vector<16x128xf32>
    %133 = arith.negf %132 : vector<16x128xf32>
    %134 = math.exp %133 : vector<16x128xf32>
    %cst_41 = arith.constant 1.000000e+00 : f32
    %135 = vector.broadcast %cst_41 : f32 to vector<16x128xf32>
    %136 = arith.addf %135, %134 : vector<16x128xf32>
    %137 = arith.divf %135, %136 : vector<16x128xf32>
    %138 = vector.extract_strided_slice %125 {offsets = [0, 256], sizes = [16, 128], strides = [1, 1]} : vector<16x512xf32> to vector<16x128xf32>
    %139 = math.tanh %138 : vector<16x128xf32>
    %140 = vector.extract_strided_slice %125 {offsets = [0, 384], sizes = [16, 128], strides = [1, 1]} : vector<16x512xf32> to vector<16x128xf32>
    %141 = arith.negf %140 : vector<16x128xf32>
    %142 = math.exp %141 : vector<16x128xf32>
    %cst_42 = arith.constant 1.000000e+00 : f32
    %143 = vector.broadcast %cst_42 : f32 to vector<16x128xf32>
    %144 = arith.addf %143, %142 : vector<16x128xf32>
    %145 = arith.divf %143, %144 : vector<16x128xf32>
    %146 = arith.mulf %137, %112 : vector<16x128xf32>
    %147 = arith.mulf %131, %139 : vector<16x128xf32>
    %148 = arith.addf %146, %147 : vector<16x128xf32>
    %149 = math.tanh %148 : vector<16x128xf32>
    %150 = arith.mulf %145, %149 : vector<16x128xf32>
    %151 = arith.truncf %150 : vector<16x128xf32> to vector<16x128xbf16>
    %152 = arith.index_cast %c3_i32 : i32 to index
    %c0_43 = arith.constant 0 : index
    %c0_44 = arith.constant 0 : index
    %153 = vector.load %arg12[%152, %c0_43, %c0_44] : memref<8x16x128xbf16, #tpu.memory_space<vmem>>, vector<1x16x128xbf16>
    %154 = vector.shape_cast %153 : vector<1x16x128xbf16> to vector<16x128xbf16>
    %155 = vector.shape_cast %151 : vector<16x128xbf16> to vector<1x16x128xbf16>
    tpu.vector_store %arg12[%152, %c0_43, %c0_44], %155 {strides = array<i32>} : memref<8x16x128xbf16, #tpu.memory_space<vmem>>, vector<1x16x128xbf16>,
    %c4_i32 = arith.constant 4 : i32
    %156 = arith.index_cast %c4_i32 : i32 to index
    %c0_45 = arith.constant 0 : index
    %c0_46 = arith.constant 0 : index
    %157 = vector.load %arg11[%156, %c0_45, %c0_46] : memref<8x16x512xf32, #tpu.memory_space<vmem>>, vector<1x16x512xf32>
    %158 = vector.shape_cast %157 : vector<1x16x512xf32> to vector<16x512xf32>
    %159 = arith.truncf %150 : vector<16x128xf32> to vector<16x128xbf16>
    %cst_47 = arith.constant dense<0.000000e+00> : vector<16x512xf32>
    %160 = tpu.matmul %159, %1, %cst_47 {dimension_numbers = #tpu.dot_dimension_numbers<[1], [0], [0], [1], [0, 0, 1, 1], [], []>} : vector<16x128xbf16>, vector<128x512xbf16>, vector<16x512xf32> -> vector<16x512xf32>
    %161 = arith.addf %158, %160 : vector<16x512xf32>
    %162 = vector.extract_strided_slice %161 {offsets = [0, 0], sizes = [16, 128], strides = [1, 1]} : vector<16x512xf32> to vector<16x128xf32>
    %163 = arith.negf %162 : vector<16x128xf32>
    %164 = math.exp %163 : vector<16x128xf32>
    %cst_48 = arith.constant 1.000000e+00 : f32
    %165 = vector.broadcast %cst_48 : f32 to vector<16x128xf32>
    %166 = arith.addf %165, %164 : vector<16x128xf32>
    %167 = arith.divf %165, %166 : vector<16x128xf32>
    %168 = vector.extract_strided_slice %161 {offsets = [0, 128], sizes = [16, 128], strides = [1, 1]} : vector<16x512xf32> to vector<16x128xf32>
    %169 = arith.negf %168 : vector<16x128xf32>
    %170 = math.exp %169 : vector<16x128xf32>
    %cst_49 = arith.constant 1.000000e+00 : f32
    %171 = vector.broadcast %cst_49 : f32 to vector<16x128xf32>
    %172 = arith.addf %171, %170 : vector<16x128xf32>
    %173 = arith.divf %171, %172 : vector<16x128xf32>
    %174 = vector.extract_strided_slice %161 {offsets = [0, 256], sizes = [16, 128], strides = [1, 1]} : vector<16x512xf32> to vector<16x128xf32>
    %175 = math.tanh %174 : vector<16x128xf32>
    %176 = vector.extract_strided_slice %161 {offsets = [0, 384], sizes = [16, 128], strides = [1, 1]} : vector<16x512xf32> to vector<16x128xf32>
    %177 = arith.negf %176 : vector<16x128xf32>
    %178 = math.exp %177 : vector<16x128xf32>
    %cst_50 = arith.constant 1.000000e+00 : f32
    %179 = vector.broadcast %cst_50 : f32 to vector<16x128xf32>
    %180 = arith.addf %179, %178 : vector<16x128xf32>
    %181 = arith.divf %179, %180 : vector<16x128xf32>
    %182 = arith.mulf %173, %148 : vector<16x128xf32>
    %183 = arith.mulf %167, %175 : vector<16x128xf32>
    %184 = arith.addf %182, %183 : vector<16x128xf32>
    %185 = math.tanh %184 : vector<16x128xf32>
    %186 = arith.mulf %181, %185 : vector<16x128xf32>
    %187 = arith.truncf %186 : vector<16x128xf32> to vector<16x128xbf16>
    %188 = arith.index_cast %c4_i32 : i32 to index
    %c0_51 = arith.constant 0 : index
    %c0_52 = arith.constant 0 : index
    %189 = vector.load %arg12[%188, %c0_51, %c0_52] : memref<8x16x128xbf16, #tpu.memory_space<vmem>>, vector<1x16x128xbf16>
    %190 = vector.shape_cast %189 : vector<1x16x128xbf16> to vector<16x128xbf16>
    %191 = vector.shape_cast %187 : vector<16x128xbf16> to vector<1x16x128xbf16>
    tpu.vector_store %arg12[%188, %c0_51, %c0_52], %191 {strides = array<i32>} : memref<8x16x128xbf16, #tpu.memory_space<vmem>>, vector<1x16x128xbf16>,
    %c5_i32 = arith.constant 5 : i32
    %192 = arith.index_cast %c5_i32 : i32 to index
    %c0_53 = arith.constant 0 : index
    %c0_54 = arith.constant 0 : index
    %193 = vector.load %arg11[%192, %c0_53, %c0_54] : memref<8x16x512xf32, #tpu.memory_space<vmem>>, vector<1x16x512xf32>
    %194 = vector.shape_cast %193 : vector<1x16x512xf32> to vector<16x512xf32>
    %195 = arith.truncf %186 : vector<16x128xf32> to vector<16x128xbf16>
    %cst_55 = arith.constant dense<0.000000e+00> : vector<16x512xf32>
    %196 = tpu.matmul %195, %1, %cst_55 {dimension_numbers = #tpu.dot_dimension_numbers<[1], [0], [0], [1], [0, 0, 1, 1], [], []>} : vector<16x128xbf16>, vector<128x512xbf16>, vector<16x512xf32> -> vector<16x512xf32>
    %197 = arith.addf %194, %196 : vector<16x512xf32>
    %198 = vector.extract_strided_slice %197 {offsets = [0, 0], sizes = [16, 128], strides = [1, 1]} : vector<16x512xf32> to vector<16x128xf32>
    %199 = arith.negf %198 : vector<16x128xf32>
    %200 = math.exp %199 : vector<16x128xf32>
    %cst_56 = arith.constant 1.000000e+00 : f32
    %201 = vector.broadcast %cst_56 : f32 to vector<16x128xf32>
    %202 = arith.addf %201, %200 : vector<16x128xf32>
    %203 = arith.divf %201, %202 : vector<16x128xf32>
    %204 = vector.extract_strided_slice %197 {offsets = [0, 128], sizes = [16, 128], strides = [1, 1]} : vector<16x512xf32> to vector<16x128xf32>
    %205 = arith.negf %204 : vector<16x128xf32>
    %206 = math.exp %205 : vector<16x128xf32>
    %cst_57 = arith.constant 1.000000e+00 : f32
    %207 = vector.broadcast %cst_57 : f32 to vector<16x128xf32>
    %208 = arith.addf %207, %206 : vector<16x128xf32>
    %209 = arith.divf %207, %208 : vector<16x128xf32>
    %210 = vector.extract_strided_slice %197 {offsets = [0, 256], sizes = [16, 128], strides = [1, 1]} : vector<16x512xf32> to vector<16x128xf32>
    %211 = math.tanh %210 : vector<16x128xf32>
    %212 = vector.extract_strided_slice %197 {offsets = [0, 384], sizes = [16, 128], strides = [1, 1]} : vector<16x512xf32> to vector<16x128xf32>
    %213 = arith.negf %212 : vector<16x128xf32>
    %214 = math.exp %213 : vector<16x128xf32>
    %cst_58 = arith.constant 1.000000e+00 : f32
    %215 = vector.broadcast %cst_58 : f32 to vector<16x128xf32>
    %216 = arith.addf %215, %214 : vector<16x128xf32>
    %217 = arith.divf %215, %216 : vector<16x128xf32>
    %218 = arith.mulf %209, %184 : vector<16x128xf32>
    %219 = arith.mulf %203, %211 : vector<16x128xf32>
    %220 = arith.addf %218, %219 : vector<16x128xf32>
    %221 = math.tanh %220 : vector<16x128xf32>
    %222 = arith.mulf %217, %221 : vector<16x128xf32>
    %223 = arith.truncf %222 : vector<16x128xf32> to vector<16x128xbf16>
    %224 = arith.index_cast %c5_i32 : i32 to index
    %c0_59 = arith.constant 0 : index
    %c0_60 = arith.constant 0 : index
    %225 = vector.load %arg12[%224, %c0_59, %c0_60] : memref<8x16x128xbf16, #tpu.memory_space<vmem>>, vector<1x16x128xbf16>
    %226 = vector.shape_cast %225 : vector<1x16x128xbf16> to vector<16x128xbf16>
    %227 = vector.shape_cast %223 : vector<16x128xbf16> to vector<1x16x128xbf16>
    tpu.vector_store %arg12[%224, %c0_59, %c0_60], %227 {strides = array<i32>} : memref<8x16x128xbf16, #tpu.memory_space<vmem>>, vector<1x16x128xbf16>,
    %c6_i32 = arith.constant 6 : i32
    %228 = arith.index_cast %c6_i32 : i32 to index
    %c0_61 = arith.constant 0 : index
    %c0_62 = arith.constant 0 : index
    %229 = vector.load %arg11[%228, %c0_61, %c0_62] : memref<8x16x512xf32, #tpu.memory_space<vmem>>, vector<1x16x512xf32>
    %230 = vector.shape_cast %229 : vector<1x16x512xf32> to vector<16x512xf32>
    %231 = arith.truncf %222 : vector<16x128xf32> to vector<16x128xbf16>
    %cst_63 = arith.constant dense<0.000000e+00> : vector<16x512xf32>
    %232 = tpu.matmul %231, %1, %cst_63 {dimension_numbers = #tpu.dot_dimension_numbers<[1], [0], [0], [1], [0, 0, 1, 1], [], []>} : vector<16x128xbf16>, vector<128x512xbf16>, vector<16x512xf32> -> vector<16x512xf32>
    %233 = arith.addf %230, %232 : vector<16x512xf32>
    %234 = vector.extract_strided_slice %233 {offsets = [0, 0], sizes = [16, 128], strides = [1, 1]} : vector<16x512xf32> to vector<16x128xf32>
    %235 = arith.negf %234 : vector<16x128xf32>
    %236 = math.exp %235 : vector<16x128xf32>
    %cst_64 = arith.constant 1.000000e+00 : f32
    %237 = vector.broadcast %cst_64 : f32 to vector<16x128xf32>
    %238 = arith.addf %237, %236 : vector<16x128xf32>
    %239 = arith.divf %237, %238 : vector<16x128xf32>
    %240 = vector.extract_strided_slice %233 {offsets = [0, 128], sizes = [16, 128], strides = [1, 1]} : vector<16x512xf32> to vector<16x128xf32>
    %241 = arith.negf %240 : vector<16x128xf32>
    %242 = math.exp %241 : vector<16x128xf32>
    %cst_65 = arith.constant 1.000000e+00 : f32
    %243 = vector.broadcast %cst_65 : f32 to vector<16x128xf32>
    %244 = arith.addf %243, %242 : vector<16x128xf32>
    %245 = arith.divf %243, %244 : vector<16x128xf32>
    %246 = vector.extract_strided_slice %233 {offsets = [0, 256], sizes = [16, 128], strides = [1, 1]} : vector<16x512xf32> to vector<16x128xf32>
    %247 = math.tanh %246 : vector<16x128xf32>
    %248 = vector.extract_strided_slice %233 {offsets = [0, 384], sizes = [16, 128], strides = [1, 1]} : vector<16x512xf32> to vector<16x128xf32>
    %249 = arith.negf %248 : vector<16x128xf32>
    %250 = math.exp %249 : vector<16x128xf32>
    %cst_66 = arith.constant 1.000000e+00 : f32
    %251 = vector.broadcast %cst_66 : f32 to vector<16x128xf32>
    %252 = arith.addf %251, %250 : vector<16x128xf32>
    %253 = arith.divf %251, %252 : vector<16x128xf32>
    %254 = arith.mulf %245, %220 : vector<16x128xf32>
    %255 = arith.mulf %239, %247 : vector<16x128xf32>
    %256 = arith.addf %254, %255 : vector<16x128xf32>
    %257 = math.tanh %256 : vector<16x128xf32>
    %258 = arith.mulf %253, %257 : vector<16x128xf32>
    %259 = arith.truncf %258 : vector<16x128xf32> to vector<16x128xbf16>
    %260 = arith.index_cast %c6_i32 : i32 to index
    %c0_67 = arith.constant 0 : index
    %c0_68 = arith.constant 0 : index
    %261 = vector.load %arg12[%260, %c0_67, %c0_68] : memref<8x16x128xbf16, #tpu.memory_space<vmem>>, vector<1x16x128xbf16>
    %262 = vector.shape_cast %261 : vector<1x16x128xbf16> to vector<16x128xbf16>
    %263 = vector.shape_cast %259 : vector<16x128xbf16> to vector<1x16x128xbf16>
    tpu.vector_store %arg12[%260, %c0_67, %c0_68], %263 {strides = array<i32>} : memref<8x16x128xbf16, #tpu.memory_space<vmem>>, vector<1x16x128xbf16>,
    %c7_i32 = arith.constant 7 : i32
    %264 = arith.index_cast %c7_i32 : i32 to index
    %c0_69 = arith.constant 0 : index
    %c0_70 = arith.constant 0 : index
    %265 = vector.load %arg11[%264, %c0_69, %c0_70] : memref<8x16x512xf32, #tpu.memory_space<vmem>>, vector<1x16x512xf32>
    %266 = vector.shape_cast %265 : vector<1x16x512xf32> to vector<16x512xf32>
    %267 = arith.truncf %258 : vector<16x128xf32> to vector<16x128xbf16>
    %cst_71 = arith.constant dense<0.000000e+00> : vector<16x512xf32>
    %268 = tpu.matmul %267, %1, %cst_71 {dimension_numbers = #tpu.dot_dimension_numbers<[1], [0], [0], [1], [0, 0, 1, 1], [], []>} : vector<16x128xbf16>, vector<128x512xbf16>, vector<16x512xf32> -> vector<16x512xf32>
    %269 = arith.addf %266, %268 : vector<16x512xf32>
    %270 = vector.extract_strided_slice %269 {offsets = [0, 0], sizes = [16, 128], strides = [1, 1]} : vector<16x512xf32> to vector<16x128xf32>
    %271 = arith.negf %270 : vector<16x128xf32>
    %272 = math.exp %271 : vector<16x128xf32>
    %cst_72 = arith.constant 1.000000e+00 : f32
    %273 = vector.broadcast %cst_72 : f32 to vector<16x128xf32>
    %274 = arith.addf %273, %272 : vector<16x128xf32>
    %275 = arith.divf %273, %274 : vector<16x128xf32>
    %276 = vector.extract_strided_slice %269 {offsets = [0, 128], sizes = [16, 128], strides = [1, 1]} : vector<16x512xf32> to vector<16x128xf32>
    %277 = arith.negf %276 : vector<16x128xf32>
    %278 = math.exp %277 : vector<16x128xf32>
    %cst_73 = arith.constant 1.000000e+00 : f32
    %279 = vector.broadcast %cst_73 : f32 to vector<16x128xf32>
    %280 = arith.addf %279, %278 : vector<16x128xf32>
    %281 = arith.divf %279, %280 : vector<16x128xf32>
    %282 = vector.extract_strided_slice %269 {offsets = [0, 256], sizes = [16, 128], strides = [1, 1]} : vector<16x512xf32> to vector<16x128xf32>
    %283 = math.tanh %282 : vector<16x128xf32>
    %284 = vector.extract_strided_slice %269 {offsets = [0, 384], sizes = [16, 128], strides = [1, 1]} : vector<16x512xf32> to vector<16x128xf32>
    %285 = arith.negf %284 : vector<16x128xf32>
    %286 = math.exp %285 : vector<16x128xf32>
    %cst_74 = arith.constant 1.000000e+00 : f32
    %287 = vector.broadcast %cst_74 : f32 to vector<16x128xf32>
    %288 = arith.addf %287, %286 : vector<16x128xf32>
    %289 = arith.divf %287, %288 : vector<16x128xf32>
    %290 = arith.mulf %281, %256 : vector<16x128xf32>
    %291 = arith.mulf %275, %283 : vector<16x128xf32>
    %292 = arith.addf %290, %291 : vector<16x128xf32>
    %293 = math.tanh %292 : vector<16x128xf32>
    %294 = arith.mulf %289, %293 : vector<16x128xf32>
    %295 = arith.truncf %294 : vector<16x128xf32> to vector<16x128xbf16>
    %296 = arith.index_cast %c7_i32 : i32 to index
    %c0_75 = arith.constant 0 : index
    %c0_76 = arith.constant 0 : index
    %297 = vector.load %arg12[%296, %c0_75, %c0_76] : memref<8x16x128xbf16, #tpu.memory_space<vmem>>, vector<1x16x128xbf16>
    %298 = vector.shape_cast %297 : vector<1x16x128xbf16> to vector<16x128xbf16>
    %299 = vector.shape_cast %295 : vector<16x128xbf16> to vector<1x16x128xbf16>
    tpu.vector_store %arg12[%296, %c0_75, %c0_76], %299 {strides = array<i32>} : memref<8x16x128xbf16, #tpu.memory_space<vmem>>, vector<1x16x128xbf16>,
    %c8_i32 = arith.constant 8 : i32
    %c0_77 = arith.constant 0 : index
    %c0_78 = arith.constant 0 : index
    %300 = vector.load %arg5[%c0_77, %c0_78] : memref<128x512xbf16, #tpu.memory_space<vmem>>, vector<128x512xbf16>
    %c0_79 = arith.constant 0 : index
    %c0_80 = arith.constant 0 : index
    %301 = vector.load %arg6[%c0_79, %c0_80] : memref<128x512xbf16, #tpu.memory_space<vmem>>, vector<128x512xbf16>
    %c0_81 = arith.constant 0 : index
    %c0_82 = arith.constant 0 : index
    %302 = vector.load %arg7[%c0_81, %c0_82] : memref<1x512xf32, #tpu.memory_space<vmem>>, vector<1x512xf32>
    %c0_83 = arith.constant 0 : index
    %c0_84 = arith.constant 0 : index
    %c0_85 = arith.constant 0 : index
    %303 = vector.load %arg12[%c0_83, %c0_84, %c0_85] : memref<8x16x128xbf16, #tpu.memory_space<vmem>>, vector<8x16x128xbf16>
    %304 = vector.shape_cast %303 : vector<8x16x128xbf16> to vector<128x128xbf16>
    %cst_86 = arith.constant dense<0.000000e+00> : vector<128x512xf32>
    %305 = tpu.matmul %304, %300, %cst_86 {dimension_numbers = #tpu.dot_dimension_numbers<[1], [0], [0], [1], [0, 0, 1, 1], [], []>} : vector<128x128xbf16>, vector<128x512xbf16>, vector<128x512xf32> -> vector<128x512xf32>
    %306 = vector.broadcast %302 : vector<1x512xf32> to vector<128x512xf32>
    %307 = arith.addf %305, %306 : vector<128x512xf32>
    %308 = vector.shape_cast %307 : vector<128x512xf32> to vector<8x16x512xf32>
    %c0_87 = arith.constant 0 : index
    %c0_88 = arith.constant 0 : index
    %c0_89 = arith.constant 0 : index
    %309 = vector.load %arg11[%c0_87, %c0_88, %c0_89] : memref<8x16x512xf32, #tpu.memory_space<vmem>>, vector<8x16x512xf32>
    tpu.vector_store %arg11[%c0_87, %c0_88, %c0_89], %308 {strides = array<i32>} : memref<8x16x512xf32, #tpu.memory_space<vmem>>, vector<8x16x512xf32>,
    %cst_90 = arith.constant 0.000000e+00 : f32
    %310 = vector.broadcast %cst_90 : f32 to vector<16x128xf32>
    %cst_91 = arith.constant 0.000000e+00 : f32
    %311 = vector.broadcast %cst_91 : f32 to vector<16x128xf32>
    %c0_i32_92 = arith.constant 0 : i32
    %312 = arith.index_cast %c0_i32_92 : i32 to index
    %c0_93 = arith.constant 0 : index
    %c0_94 = arith.constant 0 : index
    %313 = vector.load %arg11[%312, %c0_93, %c0_94] : memref<8x16x512xf32, #tpu.memory_space<vmem>>, vector<1x16x512xf32>
    %314 = vector.shape_cast %313 : vector<1x16x512xf32> to vector<16x512xf32>
    %315 = arith.truncf %310 : vector<16x128xf32> to vector<16x128xbf16>
    %cst_95 = arith.constant dense<0.000000e+00> : vector<16x512xf32>
    %316 = tpu.matmul %315, %301, %cst_95 {dimension_numbers = #tpu.dot_dimension_numbers<[1], [0], [0], [1], [0, 0, 1, 1], [], []>} : vector<16x128xbf16>, vector<128x512xbf16>, vector<16x512xf32> -> vector<16x512xf32>
    %317 = arith.addf %314, %316 : vector<16x512xf32>
    %318 = vector.extract_strided_slice %317 {offsets = [0, 0], sizes = [16, 128], strides = [1, 1]} : vector<16x512xf32> to vector<16x128xf32>
    %319 = arith.negf %318 : vector<16x128xf32>
    %320 = math.exp %319 : vector<16x128xf32>
    %cst_96 = arith.constant 1.000000e+00 : f32
    %321 = vector.broadcast %cst_96 : f32 to vector<16x128xf32>
    %322 = arith.addf %321, %320 : vector<16x128xf32>
    %323 = arith.divf %321, %322 : vector<16x128xf32>
    %324 = vector.extract_strided_slice %317 {offsets = [0, 128], sizes = [16, 128], strides = [1, 1]} : vector<16x512xf32> to vector<16x128xf32>
    %325 = arith.negf %324 : vector<16x128xf32>
    %326 = math.exp %325 : vector<16x128xf32>
    %cst_97 = arith.constant 1.000000e+00 : f32
    %327 = vector.broadcast %cst_97 : f32 to vector<16x128xf32>
    %328 = arith.addf %327, %326 : vector<16x128xf32>
    %329 = arith.divf %327, %328 : vector<16x128xf32>
    %330 = vector.extract_strided_slice %317 {offsets = [0, 256], sizes = [16, 128], strides = [1, 1]} : vector<16x512xf32> to vector<16x128xf32>
    %331 = math.tanh %330 : vector<16x128xf32>
    %332 = vector.extract_strided_slice %317 {offsets = [0, 384], sizes = [16, 128], strides = [1, 1]} : vector<16x512xf32> to vector<16x128xf32>
    %333 = arith.negf %332 : vector<16x128xf32>
    %334 = math.exp %333 : vector<16x128xf32>
    %cst_98 = arith.constant 1.000000e+00 : f32
    %335 = vector.broadcast %cst_98 : f32 to vector<16x128xf32>
    %336 = arith.addf %335, %334 : vector<16x128xf32>
    %337 = arith.divf %335, %336 : vector<16x128xf32>
    %338 = arith.mulf %329, %311 : vector<16x128xf32>
    %339 = arith.mulf %323, %331 : vector<16x128xf32>
    %340 = arith.addf %338, %339 : vector<16x128xf32>
    %341 = math.tanh %340 : vector<16x128xf32>
    %342 = arith.mulf %337, %341 : vector<16x128xf32>
    %c1_i32_99 = arith.constant 1 : i32
    %343 = arith.index_cast %c1_i32_99 : i32 to index
    %c0_100 = arith.constant 0 : index
    %c0_101 = arith.constant 0 : index
    %344 = vector.load %arg11[%343, %c0_100, %c0_101] : memref<8x16x512xf32, #tpu.memory_space<vmem>>, vector<1x16x512xf32>
    %345 = vector.shape_cast %344 : vector<1x16x512xf32> to vector<16x512xf32>
    %346 = arith.truncf %342 : vector<16x128xf32> to vector<16x128xbf16>
    %cst_102 = arith.constant dense<0.000000e+00> : vector<16x512xf32>
    %347 = tpu.matmul %346, %301, %cst_102 {dimension_numbers = #tpu.dot_dimension_numbers<[1], [0], [0], [1], [0, 0, 1, 1], [], []>} : vector<16x128xbf16>, vector<128x512xbf16>, vector<16x512xf32> -> vector<16x512xf32>
    %348 = arith.addf %345, %347 : vector<16x512xf32>
    %349 = vector.extract_strided_slice %348 {offsets = [0, 0], sizes = [16, 128], strides = [1, 1]} : vector<16x512xf32> to vector<16x128xf32>
    %350 = arith.negf %349 : vector<16x128xf32>
    %351 = math.exp %350 : vector<16x128xf32>
    %cst_103 = arith.constant 1.000000e+00 : f32
    %352 = vector.broadcast %cst_103 : f32 to vector<16x128xf32>
    %353 = arith.addf %352, %351 : vector<16x128xf32>
    %354 = arith.divf %352, %353 : vector<16x128xf32>
    %355 = vector.extract_strided_slice %348 {offsets = [0, 128], sizes = [16, 128], strides = [1, 1]} : vector<16x512xf32> to vector<16x128xf32>
    %356 = arith.negf %355 : vector<16x128xf32>
    %357 = math.exp %356 : vector<16x128xf32>
    %cst_104 = arith.constant 1.000000e+00 : f32
    %358 = vector.broadcast %cst_104 : f32 to vector<16x128xf32>
    %359 = arith.addf %358, %357 : vector<16x128xf32>
    %360 = arith.divf %358, %359 : vector<16x128xf32>
    %361 = vector.extract_strided_slice %348 {offsets = [0, 256], sizes = [16, 128], strides = [1, 1]} : vector<16x512xf32> to vector<16x128xf32>
    %362 = math.tanh %361 : vector<16x128xf32>
    %363 = vector.extract_strided_slice %348 {offsets = [0, 384], sizes = [16, 128], strides = [1, 1]} : vector<16x512xf32> to vector<16x128xf32>
    %364 = arith.negf %363 : vector<16x128xf32>
    %365 = math.exp %364 : vector<16x128xf32>
    %cst_105 = arith.constant 1.000000e+00 : f32
    %366 = vector.broadcast %cst_105 : f32 to vector<16x128xf32>
    %367 = arith.addf %366, %365 : vector<16x128xf32>
    %368 = arith.divf %366, %367 : vector<16x128xf32>
    %369 = arith.mulf %360, %340 : vector<16x128xf32>
    %370 = arith.mulf %354, %362 : vector<16x128xf32>
    %371 = arith.addf %369, %370 : vector<16x128xf32>
    %372 = math.tanh %371 : vector<16x128xf32>
    %373 = arith.mulf %368, %372 : vector<16x128xf32>
    %c2_i32_106 = arith.constant 2 : i32
    %374 = arith.index_cast %c2_i32_106 : i32 to index
    %c0_107 = arith.constant 0 : index
    %c0_108 = arith.constant 0 : index
    %375 = vector.load %arg11[%374, %c0_107, %c0_108] : memref<8x16x512xf32, #tpu.memory_space<vmem>>, vector<1x16x512xf32>
    %376 = vector.shape_cast %375 : vector<1x16x512xf32> to vector<16x512xf32>
    %377 = arith.truncf %373 : vector<16x128xf32> to vector<16x128xbf16>
    %cst_109 = arith.constant dense<0.000000e+00> : vector<16x512xf32>
    %378 = tpu.matmul %377, %301, %cst_109 {dimension_numbers = #tpu.dot_dimension_numbers<[1], [0], [0], [1], [0, 0, 1, 1], [], []>} : vector<16x128xbf16>, vector<128x512xbf16>, vector<16x512xf32> -> vector<16x512xf32>
    %379 = arith.addf %376, %378 : vector<16x512xf32>
    %380 = vector.extract_strided_slice %379 {offsets = [0, 0], sizes = [16, 128], strides = [1, 1]} : vector<16x512xf32> to vector<16x128xf32>
    %381 = arith.negf %380 : vector<16x128xf32>
    %382 = math.exp %381 : vector<16x128xf32>
    %cst_110 = arith.constant 1.000000e+00 : f32
    %383 = vector.broadcast %cst_110 : f32 to vector<16x128xf32>
    %384 = arith.addf %383, %382 : vector<16x128xf32>
    %385 = arith.divf %383, %384 : vector<16x128xf32>
    %386 = vector.extract_strided_slice %379 {offsets = [0, 128], sizes = [16, 128], strides = [1, 1]} : vector<16x512xf32> to vector<16x128xf32>
    %387 = arith.negf %386 : vector<16x128xf32>
    %388 = math.exp %387 : vector<16x128xf32>
    %cst_111 = arith.constant 1.000000e+00 : f32
    %389 = vector.broadcast %cst_111 : f32 to vector<16x128xf32>
    %390 = arith.addf %389, %388 : vector<16x128xf32>
    %391 = arith.divf %389, %390 : vector<16x128xf32>
    %392 = vector.extract_strided_slice %379 {offsets = [0, 256], sizes = [16, 128], strides = [1, 1]} : vector<16x512xf32> to vector<16x128xf32>
    %393 = math.tanh %392 : vector<16x128xf32>
    %394 = vector.extract_strided_slice %379 {offsets = [0, 384], sizes = [16, 128], strides = [1, 1]} : vector<16x512xf32> to vector<16x128xf32>
    %395 = arith.negf %394 : vector<16x128xf32>
    %396 = math.exp %395 : vector<16x128xf32>
    %cst_112 = arith.constant 1.000000e+00 : f32
    %397 = vector.broadcast %cst_112 : f32 to vector<16x128xf32>
    %398 = arith.addf %397, %396 : vector<16x128xf32>
    %399 = arith.divf %397, %398 : vector<16x128xf32>
    %400 = arith.mulf %391, %371 : vector<16x128xf32>
    %401 = arith.mulf %385, %393 : vector<16x128xf32>
    %402 = arith.addf %400, %401 : vector<16x128xf32>
    %403 = math.tanh %402 : vector<16x128xf32>
    %404 = arith.mulf %399, %403 : vector<16x128xf32>
    %c3_i32_113 = arith.constant 3 : i32
    %405 = arith.index_cast %c3_i32_113 : i32 to index
    %c0_114 = arith.constant 0 : index
    %c0_115 = arith.constant 0 : index
    %406 = vector.load %arg11[%405, %c0_114, %c0_115] : memref<8x16x512xf32, #tpu.memory_space<vmem>>, vector<1x16x512xf32>
    %407 = vector.shape_cast %406 : vector<1x16x512xf32> to vector<16x512xf32>
    %408 = arith.truncf %404 : vector<16x128xf32> to vector<16x128xbf16>
    %cst_116 = arith.constant dense<0.000000e+00> : vector<16x512xf32>
    %409 = tpu.matmul %408, %301, %cst_116 {dimension_numbers = #tpu.dot_dimension_numbers<[1], [0], [0], [1], [0, 0, 1, 1], [], []>} : vector<16x128xbf16>, vector<128x512xbf16>, vector<16x512xf32> -> vector<16x512xf32>
    %410 = arith.addf %407, %409 : vector<16x512xf32>
    %411 = vector.extract_strided_slice %410 {offsets = [0, 0], sizes = [16, 128], strides = [1, 1]} : vector<16x512xf32> to vector<16x128xf32>
    %412 = arith.negf %411 : vector<16x128xf32>
    %413 = math.exp %412 : vector<16x128xf32>
    %cst_117 = arith.constant 1.000000e+00 : f32
    %414 = vector.broadcast %cst_117 : f32 to vector<16x128xf32>
    %415 = arith.addf %414, %413 : vector<16x128xf32>
    %416 = arith.divf %414, %415 : vector<16x128xf32>
    %417 = vector.extract_strided_slice %410 {offsets = [0, 128], sizes = [16, 128], strides = [1, 1]} : vector<16x512xf32> to vector<16x128xf32>
    %418 = arith.negf %417 : vector<16x128xf32>
    %419 = math.exp %418 : vector<16x128xf32>
    %cst_118 = arith.constant 1.000000e+00 : f32
    %420 = vector.broadcast %cst_118 : f32 to vector<16x128xf32>
    %421 = arith.addf %420, %419 : vector<16x128xf32>
    %422 = arith.divf %420, %421 : vector<16x128xf32>
    %423 = vector.extract_strided_slice %410 {offsets = [0, 256], sizes = [16, 128], strides = [1, 1]} : vector<16x512xf32> to vector<16x128xf32>
    %424 = math.tanh %423 : vector<16x128xf32>
    %425 = vector.extract_strided_slice %410 {offsets = [0, 384], sizes = [16, 128], strides = [1, 1]} : vector<16x512xf32> to vector<16x128xf32>
    %426 = arith.negf %425 : vector<16x128xf32>
    %427 = math.exp %426 : vector<16x128xf32>
    %cst_119 = arith.constant 1.000000e+00 : f32
    %428 = vector.broadcast %cst_119 : f32 to vector<16x128xf32>
    %429 = arith.addf %428, %427 : vector<16x128xf32>
    %430 = arith.divf %428, %429 : vector<16x128xf32>
    %431 = arith.mulf %422, %402 : vector<16x128xf32>
    %432 = arith.mulf %416, %424 : vector<16x128xf32>
    %433 = arith.addf %431, %432 : vector<16x128xf32>
    %434 = math.tanh %433 : vector<16x128xf32>
    %435 = arith.mulf %430, %434 : vector<16x128xf32>
    %c4_i32_120 = arith.constant 4 : i32
    %436 = arith.index_cast %c4_i32_120 : i32 to index
    %c0_121 = arith.constant 0 : index
    %c0_122 = arith.constant 0 : index
    %437 = vector.load %arg11[%436, %c0_121, %c0_122] : memref<8x16x512xf32, #tpu.memory_space<vmem>>, vector<1x16x512xf32>
    %438 = vector.shape_cast %437 : vector<1x16x512xf32> to vector<16x512xf32>
    %439 = arith.truncf %435 : vector<16x128xf32> to vector<16x128xbf16>
    %cst_123 = arith.constant dense<0.000000e+00> : vector<16x512xf32>
    %440 = tpu.matmul %439, %301, %cst_123 {dimension_numbers = #tpu.dot_dimension_numbers<[1], [0], [0], [1], [0, 0, 1, 1], [], []>} : vector<16x128xbf16>, vector<128x512xbf16>, vector<16x512xf32> -> vector<16x512xf32>
    %441 = arith.addf %438, %440 : vector<16x512xf32>
    %442 = vector.extract_strided_slice %441 {offsets = [0, 0], sizes = [16, 128], strides = [1, 1]} : vector<16x512xf32> to vector<16x128xf32>
    %443 = arith.negf %442 : vector<16x128xf32>
    %444 = math.exp %443 : vector<16x128xf32>
    %cst_124 = arith.constant 1.000000e+00 : f32
    %445 = vector.broadcast %cst_124 : f32 to vector<16x128xf32>
    %446 = arith.addf %445, %444 : vector<16x128xf32>
    %447 = arith.divf %445, %446 : vector<16x128xf32>
    %448 = vector.extract_strided_slice %441 {offsets = [0, 128], sizes = [16, 128], strides = [1, 1]} : vector<16x512xf32> to vector<16x128xf32>
    %449 = arith.negf %448 : vector<16x128xf32>
    %450 = math.exp %449 : vector<16x128xf32>
    %cst_125 = arith.constant 1.000000e+00 : f32
    %451 = vector.broadcast %cst_125 : f32 to vector<16x128xf32>
    %452 = arith.addf %451, %450 : vector<16x128xf32>
    %453 = arith.divf %451, %452 : vector<16x128xf32>
    %454 = vector.extract_strided_slice %441 {offsets = [0, 256], sizes = [16, 128], strides = [1, 1]} : vector<16x512xf32> to vector<16x128xf32>
    %455 = math.tanh %454 : vector<16x128xf32>
    %456 = vector.extract_strided_slice %441 {offsets = [0, 384], sizes = [16, 128], strides = [1, 1]} : vector<16x512xf32> to vector<16x128xf32>
    %457 = arith.negf %456 : vector<16x128xf32>
    %458 = math.exp %457 : vector<16x128xf32>
    %cst_126 = arith.constant 1.000000e+00 : f32
    %459 = vector.broadcast %cst_126 : f32 to vector<16x128xf32>
    %460 = arith.addf %459, %458 : vector<16x128xf32>
    %461 = arith.divf %459, %460 : vector<16x128xf32>
    %462 = arith.mulf %453, %433 : vector<16x128xf32>
    %463 = arith.mulf %447, %455 : vector<16x128xf32>
    %464 = arith.addf %462, %463 : vector<16x128xf32>
    %465 = math.tanh %464 : vector<16x128xf32>
    %466 = arith.mulf %461, %465 : vector<16x128xf32>
    %c5_i32_127 = arith.constant 5 : i32
    %467 = arith.index_cast %c5_i32_127 : i32 to index
    %c0_128 = arith.constant 0 : index
    %c0_129 = arith.constant 0 : index
    %468 = vector.load %arg11[%467, %c0_128, %c0_129] : memref<8x16x512xf32, #tpu.memory_space<vmem>>, vector<1x16x512xf32>
    %469 = vector.shape_cast %468 : vector<1x16x512xf32> to vector<16x512xf32>
    %470 = arith.truncf %466 : vector<16x128xf32> to vector<16x128xbf16>
    %cst_130 = arith.constant dense<0.000000e+00> : vector<16x512xf32>
    %471 = tpu.matmul %470, %301, %cst_130 {dimension_numbers = #tpu.dot_dimension_numbers<[1], [0], [0], [1], [0, 0, 1, 1], [], []>} : vector<16x128xbf16>, vector<128x512xbf16>, vector<16x512xf32> -> vector<16x512xf32>
    %472 = arith.addf %469, %471 : vector<16x512xf32>
    %473 = vector.extract_strided_slice %472 {offsets = [0, 0], sizes = [16, 128], strides = [1, 1]} : vector<16x512xf32> to vector<16x128xf32>
    %474 = arith.negf %473 : vector<16x128xf32>
    %475 = math.exp %474 : vector<16x128xf32>
    %cst_131 = arith.constant 1.000000e+00 : f32
    %476 = vector.broadcast %cst_131 : f32 to vector<16x128xf32>
    %477 = arith.addf %476, %475 : vector<16x128xf32>
    %478 = arith.divf %476, %477 : vector<16x128xf32>
    %479 = vector.extract_strided_slice %472 {offsets = [0, 128], sizes = [16, 128], strides = [1, 1]} : vector<16x512xf32> to vector<16x128xf32>
    %480 = arith.negf %479 : vector<16x128xf32>
    %481 = math.exp %480 : vector<16x128xf32>
    %cst_132 = arith.constant 1.000000e+00 : f32
    %482 = vector.broadcast %cst_132 : f32 to vector<16x128xf32>
    %483 = arith.addf %482, %481 : vector<16x128xf32>
    %484 = arith.divf %482, %483 : vector<16x128xf32>
    %485 = vector.extract_strided_slice %472 {offsets = [0, 256], sizes = [16, 128], strides = [1, 1]} : vector<16x512xf32> to vector<16x128xf32>
    %486 = math.tanh %485 : vector<16x128xf32>
    %487 = vector.extract_strided_slice %472 {offsets = [0, 384], sizes = [16, 128], strides = [1, 1]} : vector<16x512xf32> to vector<16x128xf32>
    %488 = arith.negf %487 : vector<16x128xf32>
    %489 = math.exp %488 : vector<16x128xf32>
    %cst_133 = arith.constant 1.000000e+00 : f32
    %490 = vector.broadcast %cst_133 : f32 to vector<16x128xf32>
    %491 = arith.addf %490, %489 : vector<16x128xf32>
    %492 = arith.divf %490, %491 : vector<16x128xf32>
    %493 = arith.mulf %484, %464 : vector<16x128xf32>
    %494 = arith.mulf %478, %486 : vector<16x128xf32>
    %495 = arith.addf %493, %494 : vector<16x128xf32>
    %496 = math.tanh %495 : vector<16x128xf32>
    %497 = arith.mulf %492, %496 : vector<16x128xf32>
    %c6_i32_134 = arith.constant 6 : i32
    %498 = arith.index_cast %c6_i32_134 : i32 to index
    %c0_135 = arith.constant 0 : index
    %c0_136 = arith.constant 0 : index
    %499 = vector.load %arg11[%498, %c0_135, %c0_136] : memref<8x16x512xf32, #tpu.memory_space<vmem>>, vector<1x16x512xf32>
    %500 = vector.shape_cast %499 : vector<1x16x512xf32> to vector<16x512xf32>
    %501 = arith.truncf %497 : vector<16x128xf32> to vector<16x128xbf16>
    %cst_137 = arith.constant dense<0.000000e+00> : vector<16x512xf32>
    %502 = tpu.matmul %501, %301, %cst_137 {dimension_numbers = #tpu.dot_dimension_numbers<[1], [0], [0], [1], [0, 0, 1, 1], [], []>} : vector<16x128xbf16>, vector<128x512xbf16>, vector<16x512xf32> -> vector<16x512xf32>
    %503 = arith.addf %500, %502 : vector<16x512xf32>
    %504 = vector.extract_strided_slice %503 {offsets = [0, 0], sizes = [16, 128], strides = [1, 1]} : vector<16x512xf32> to vector<16x128xf32>
    %505 = arith.negf %504 : vector<16x128xf32>
    %506 = math.exp %505 : vector<16x128xf32>
    %cst_138 = arith.constant 1.000000e+00 : f32
    %507 = vector.broadcast %cst_138 : f32 to vector<16x128xf32>
    %508 = arith.addf %507, %506 : vector<16x128xf32>
    %509 = arith.divf %507, %508 : vector<16x128xf32>
    %510 = vector.extract_strided_slice %503 {offsets = [0, 128], sizes = [16, 128], strides = [1, 1]} : vector<16x512xf32> to vector<16x128xf32>
    %511 = arith.negf %510 : vector<16x128xf32>
    %512 = math.exp %511 : vector<16x128xf32>
    %cst_139 = arith.constant 1.000000e+00 : f32
    %513 = vector.broadcast %cst_139 : f32 to vector<16x128xf32>
    %514 = arith.addf %513, %512 : vector<16x128xf32>
    %515 = arith.divf %513, %514 : vector<16x128xf32>
    %516 = vector.extract_strided_slice %503 {offsets = [0, 256], sizes = [16, 128], strides = [1, 1]} : vector<16x512xf32> to vector<16x128xf32>
    %517 = math.tanh %516 : vector<16x128xf32>
    %518 = vector.extract_strided_slice %503 {offsets = [0, 384], sizes = [16, 128], strides = [1, 1]} : vector<16x512xf32> to vector<16x128xf32>
    %519 = arith.negf %518 : vector<16x128xf32>
    %520 = math.exp %519 : vector<16x128xf32>
    %cst_140 = arith.constant 1.000000e+00 : f32
    %521 = vector.broadcast %cst_140 : f32 to vector<16x128xf32>
    %522 = arith.addf %521, %520 : vector<16x128xf32>
    %523 = arith.divf %521, %522 : vector<16x128xf32>
    %524 = arith.mulf %515, %495 : vector<16x128xf32>
    %525 = arith.mulf %509, %517 : vector<16x128xf32>
    %526 = arith.addf %524, %525 : vector<16x128xf32>
    %527 = math.tanh %526 : vector<16x128xf32>
    %528 = arith.mulf %523, %527 : vector<16x128xf32>
    %c7_i32_141 = arith.constant 7 : i32
    %529 = arith.index_cast %c7_i32_141 : i32 to index
    %c0_142 = arith.constant 0 : index
    %c0_143 = arith.constant 0 : index
    %530 = vector.load %arg11[%529, %c0_142, %c0_143] : memref<8x16x512xf32, #tpu.memory_space<vmem>>, vector<1x16x512xf32>
    %531 = vector.shape_cast %530 : vector<1x16x512xf32> to vector<16x512xf32>
    %532 = arith.truncf %528 : vector<16x128xf32> to vector<16x128xbf16>
    %cst_144 = arith.constant dense<0.000000e+00> : vector<16x512xf32>
    %533 = tpu.matmul %532, %301, %cst_144 {dimension_numbers = #tpu.dot_dimension_numbers<[1], [0], [0], [1], [0, 0, 1, 1], [], []>} : vector<16x128xbf16>, vector<128x512xbf16>, vector<16x512xf32> -> vector<16x512xf32>
    %534 = arith.addf %531, %533 : vector<16x512xf32>
    %535 = vector.extract_strided_slice %534 {offsets = [0, 0], sizes = [16, 128], strides = [1, 1]} : vector<16x512xf32> to vector<16x128xf32>
    %536 = arith.negf %535 : vector<16x128xf32>
    %537 = math.exp %536 : vector<16x128xf32>
    %cst_145 = arith.constant 1.000000e+00 : f32
    %538 = vector.broadcast %cst_145 : f32 to vector<16x128xf32>
    %539 = arith.addf %538, %537 : vector<16x128xf32>
    %540 = arith.divf %538, %539 : vector<16x128xf32>
    %541 = vector.extract_strided_slice %534 {offsets = [0, 128], sizes = [16, 128], strides = [1, 1]} : vector<16x512xf32> to vector<16x128xf32>
    %542 = arith.negf %541 : vector<16x128xf32>
    %543 = math.exp %542 : vector<16x128xf32>
    %cst_146 = arith.constant 1.000000e+00 : f32
    %544 = vector.broadcast %cst_146 : f32 to vector<16x128xf32>
    %545 = arith.addf %544, %543 : vector<16x128xf32>
    %546 = arith.divf %544, %545 : vector<16x128xf32>
    %547 = vector.extract_strided_slice %534 {offsets = [0, 256], sizes = [16, 128], strides = [1, 1]} : vector<16x512xf32> to vector<16x128xf32>
    %548 = math.tanh %547 : vector<16x128xf32>
    %549 = vector.extract_strided_slice %534 {offsets = [0, 384], sizes = [16, 128], strides = [1, 1]} : vector<16x512xf32> to vector<16x128xf32>
    %550 = arith.negf %549 : vector<16x128xf32>
    %551 = math.exp %550 : vector<16x128xf32>
    %cst_147 = arith.constant 1.000000e+00 : f32
    %552 = vector.broadcast %cst_147 : f32 to vector<16x128xf32>
    %553 = arith.addf %552, %551 : vector<16x128xf32>
    %554 = arith.divf %552, %553 : vector<16x128xf32>
    %555 = arith.mulf %546, %526 : vector<16x128xf32>
    %556 = arith.mulf %540, %548 : vector<16x128xf32>
    %557 = arith.addf %555, %556 : vector<16x128xf32>
    %558 = math.tanh %557 : vector<16x128xf32>
    %559 = arith.mulf %554, %558 : vector<16x128xf32>
    %c8_i32_148 = arith.constant 8 : i32
    %560 = arith.truncf %559 : vector<16x128xf32> to vector<16x128xbf16>
    %c0_149 = arith.constant 0 : index
    %c0_150 = arith.constant 0 : index
    %561 = vector.load %arg8[%c0_149, %c0_150] : memref<128x128xbf16, #tpu.memory_space<vmem>>, vector<128x128xbf16>
    %cst_151 = arith.constant dense<0.000000e+00> : vector<16x128xf32>
    %562 = tpu.matmul %560, %561, %cst_151 {dimension_numbers = #tpu.dot_dimension_numbers<[1], [0], [0], [1], [0, 0, 1, 1], [], []>} : vector<16x128xbf16>, vector<128x128xbf16>, vector<16x128xf32> -> vector<16x128xf32>
    %c0_152 = arith.constant 0 : index
    %c0_153 = arith.constant 0 : index
    %563 = vector.load %arg9[%c0_152, %c0_153] : memref<1x128xf32, #tpu.memory_space<vmem>>, vector<1x128xf32>
    %564 = vector.broadcast %563 : vector<1x128xf32> to vector<16x128xf32>
    %565 = arith.addf %562, %564 : vector<16x128xf32>
    %c0_154 = arith.constant 0 : index
    %c0_155 = arith.constant 0 : index
    %566 = vector.load %arg10[%c0_154, %c0_155] : memref<16x128xf32, #tpu.memory_space<vmem>>, vector<16x128xf32>
    tpu.vector_store %arg10[%c0_154, %c0_155], %565 {strides = array<i32>} : memref<16x128xf32, #tpu.memory_space<vmem>>, vector<16x128xf32>,
    return
  }
  func.func @transform_0(%arg0: i32) -> (i32, i32, i32) {
    %c0_i32 = arith.constant 0 : i32
    %c0_i32_0 = arith.constant 0 : i32
    %c0_i32_1 = arith.constant 0 : i32
    return %c0_i32, %arg0, %c0_i32_0 : i32, i32, i32
  }
  func.func @transform_1(%arg0: i32) -> (i32, i32) {
    %c0_i32 = arith.constant 0 : i32
    %c0_i32_0 = arith.constant 0 : i32
    %c0_i32_1 = arith.constant 0 : i32
    return %c0_i32, %c0_i32_0 : i32, i32
  }
  func.func @transform_2(%arg0: i32) -> (i32, i32) {
    %c0_i32 = arith.constant 0 : i32
    %c0_i32_0 = arith.constant 0 : i32
    %c0_i32_1 = arith.constant 0 : i32
    return %c0_i32, %c0_i32_0 : i32, i32
  }
  func.func @transform_3(%arg0: i32) -> (i32, i32) {
    %c0_i32 = arith.constant 0 : i32
    %c0_i32_0 = arith.constant 0 : i32
    %c0_i32_1 = arith.constant 0 : i32
    return %c0_i32, %c0_i32_0 : i32, i32
  }
  func.func @transform_4(%arg0: i32) -> (i32, i32) {
    %c0_i32 = arith.constant 0 : i32
    %c0_i32_0 = arith.constant 0 : i32
    %c0_i32_1 = arith.constant 0 : i32
    return %c0_i32, %c0_i32_0 : i32, i32
  }
  func.func @transform_5(%arg0: i32) -> (i32, i32) {
    %c0_i32 = arith.constant 0 : i32
    %c0_i32_0 = arith.constant 0 : i32
    %c0_i32_1 = arith.constant 0 : i32
    return %c0_i32, %c0_i32_0 : i32, i32
  }
  func.func @transform_6(%arg0: i32) -> (i32, i32) {
    %c0_i32 = arith.constant 0 : i32
    %c0_i32_0 = arith.constant 0 : i32
    %c0_i32_1 = arith.constant 0 : i32
    return %c0_i32, %c0_i32_0 : i32, i32
  }
  func.func @transform_7(%arg0: i32) -> (i32, i32) {
    %c0_i32 = arith.constant 0 : i32
    %c0_i32_0 = arith.constant 0 : i32
    %c0_i32_1 = arith.constant 0 : i32
    return %c0_i32, %c0_i32_0 : i32, i32
  }
  func.func @transform_8(%arg0: i32) -> (i32, i32) {
    %c0_i32 = arith.constant 0 : i32
    %c0_i32_0 = arith.constant 0 : i32
    %c0_i32_1 = arith.constant 0 : i32
    return %c0_i32, %c0_i32_0 : i32, i32
  }
  func.func @transform_9(%arg0: i32) -> (i32, i32) {
    %c0_i32 = arith.constant 0 : i32
    %c0_i32_0 = arith.constant 0 : i32
    return %arg0, %c0_i32 : i32, i32
  }
}

</mosaic_0001>

<bundles_post_ra>
// kernel: lstm_model_forward.1
= control target key start
LH: loop header
LB: loop body
LE: loop exit
PB: predicated region body
PF: predicated region fallthrough
CT: control target
= control target key end

     0   :  { %v5366_v1 = vmov 0   ;;  %vm5368_vm0 = vmmov 0   ;;  %s7214_s1 = inlined_call_operand.vmem [shape: bf16[128,512], index: 1, kind: input, shape index: {}]   ;;  %s7215_s0 = inlined_call_operand.vmem [shape: bf16[8,16,128], index: 0, kind: input, shape index: {}]   ;;  %s7216_s2 = inlined_call_operand.vmem [shape: bf16[128,512], index: 2, kind: input, shape index: {}]   ;;  %s7217_s3 = inlined_call_operand.vmem [shape: f32[1,512], index: 3, kind: input, shape index: {}]   ;;  %s7218_s4 = inlined_call_operand.vmem [shape: bf16[128,512], index: 4, kind: input, shape index: {}]   ;;  %s7219_s5 = inlined_call_operand.vmem [shape: bf16[128,512], index: 5, kind: input, shape index: {}]   ;;  %s7220_s6 = inlined_call_operand.vmem [shape: f32[1,512], index: 6, kind: input, shape index: {}]   ;;  %s7221_s7 = inlined_call_operand.vmem [shape: bf16[128,128], index: 7, kind: input, shape index: {}]   ;;  %s7222_s8 = inlined_call_operand.vmem [shape: f32[1,128], index: 8, kind: input, shape index: {}]   ;;  %s7223_s9 = inlined_call_operand.vmem [shape: f32[16,128], index: 9, kind: output, shape index: {}]  }
   0x1   :  { %v4582_v0 = vld [vmem:[%s7214_s1 + $0x4] ss:$16 sps:$4 sm:$0xff]   ;;  %375 = vmatprep.mubr.bf16.mxu0 %v5366_v1  ;;  %488 = vmatprep.mubr.bf16.mxu1 %v5366_v1  ;;  %v4584_v2 = vld [vmem:[%s7214_s1 + $0xc] ss:$16 sps:$4 sm:$0xff]   ;;  %v4586_v3 = vld [vmem:[%s7214_s1] ss:$16 sps:$4 sm:$0xff]  }
   0x2   :  { %343 = vmatprep.subr.bf16.mxu0 %v4582_v0  ;;  %v4587_v4 = vld [vmem:[%s7214_s1 + $0x8] ss:$16 sps:$4 sm:$0xff]   ;;  %456 = vmatprep.subr.bf16.mxu1 %v4584_v2  ;;  %v4588_v5 = vld [vmem:[%s7214_s1 + $0x24] ss:$16 sps:$4 sm:$0xff]   ;;  %v4590_v6 = vld [vmem:[%s7214_s1 + $0x2c] ss:$16 sps:$4 sm:$0xff]  }
   0x3   :  { %344 = vmatpush1.bf16.msra.mxu0 %v4586_v3  ;;  %457 = vmatpush1.bf16.msra.mxu1 %v4587_v4  ;;  %v4592_v7 = vld [vmem:[%s7214_s1 + $0x20] ss:$16 sps:$4 sm:$0xff]   ;;  %v4593_v8 = vld [vmem:[%s7214_s1 + $0x28] ss:$16 sps:$4 sm:$0xff]   ;;  %v4594_v9 = vld [vmem:[%s7214_s1 + $0x44] ss:$16 sps:$4 sm:$0xff]  }
   0x4   :  { %345 = vmatprep.subr.bf16.mxu0 %v4588_v5  ;;  %458 = vmatprep.subr.bf16.mxu1 %v4590_v6  ;;  %v4596_v10 = vld [vmem:[%s7214_s1 + $0x4c] ss:$16 sps:$4 sm:$0xff]   ;;  %v4598_v11 = vld [vmem:[%s7214_s1 + $0x40] ss:$16 sps:$4 sm:$0xff]   ;;  %v4599_v12 = vld [vmem:[%s7214_s1 + $0x48] ss:$16 sps:$4 sm:$0xff]  }
   0x5   :  { %v4600_v13 = vld [vmem:[%s7214_s1 + $0x64] ss:$16 sps:$4 sm:$0xff]   ;;  %v4602_v14 = vld [vmem:[%s7214_s1 + $0x6c] ss:$16 sps:$4 sm:$0xff]   ;;  %v4604_v15 = vld [vmem:[%s7214_s1 + $0x60] ss:$16 sps:$4 sm:$0xff]  }
   0x6   :  { %v4605_v16 = vld [vmem:[%s7214_s1 + $0x68] ss:$16 sps:$4 sm:$0xff]   ;;  %v4606_v17 = vld [vmem:[%s7214_s1 + $0x84] ss:$16 sps:$4 sm:$0xff]   ;;  %v4608_v18 = vld [vmem:[%s7214_s1 + $0x8c] ss:$16 sps:$4 sm:$0xff]  }
   0x7   :  { %346 = vmatpush1.bf16.msra.mxu0 %v4592_v7  ;;  %459 = vmatpush1.bf16.msra.mxu1 %v4593_v8  ;;  %v4610_v19 = vld [vmem:[%s7214_s1 + $0x80] ss:$16 sps:$4 sm:$0xff]   ;;  %v4611_v20 = vld [vmem:[%s7214_s1 + $0x88] ss:$16 sps:$4 sm:$0xff]   ;;  %v4612_v21 = vld [vmem:[%s7214_s1 + $0xa4] ss:$16 sps:$4 sm:$0xff]  }
   0x8   :  { %347 = vmatprep.subr.bf16.mxu0 %v4594_v9  ;;  %460 = vmatprep.subr.bf16.mxu1 %v4596_v10  ;;  %v4614_v22 = vld [vmem:[%s7214_s1 + $0xac] ss:$16 sps:$4 sm:$0xff]   ;;  %v4616_v23 = vld [vmem:[%s7214_s1 + $0xa0] ss:$16 sps:$4 sm:$0xff]   ;;  %v4617_v24 = vld [vmem:[%s7214_s1 + $0xa8] ss:$16 sps:$4 sm:$0xff]   ;;  %v115_v10 = vlaneseq }
   0x9   :  { %v4618_v25 = vld [vmem:[%s7214_s1 + $0xc4] ss:$16 sps:$4 sm:$0xff]   ;;  %v4620_v26 = vld [vmem:[%s7214_s1 + $0xcc] ss:$16 sps:$4 sm:$0xff]   ;;  %v4622_v27 = vld [vmem:[%s7214_s1 + $0xc0] ss:$16 sps:$4 sm:$0xff]  }
   0xa   :  { %v4623_v28 = vld [vmem:[%s7214_s1 + $0xc8] ss:$16 sps:$4 sm:$0xff]   ;;  %v4624_v29 = vld [vmem:[%s7214_s1 + $0xe4] ss:$16 sps:$4 sm:$0xff]   ;;  %v4626_v30 = vld [vmem:[%s7214_s1 + $0xec] ss:$16 sps:$4 sm:$0xff]  }
   0xb   :  { %348 = vmatpush1.bf16.msra.mxu0 %v4598_v11  ;;  %461 = vmatpush1.bf16.msra.mxu1 %v4599_v12  ;;  %v4628_v31 = vld [vmem:[%s7214_s1 + $0xe0] ss:$16 sps:$4 sm:$0xff]   ;;  %v4629_v32 = vld [vmem:[%s7214_s1 + $0xe8] ss:$16 sps:$4 sm:$0xff]   ;;  %v5520_v33 = vld [vmem:[%s7216_s2 + $0x4] ss:$16 sps:$4 sm:$0xff]  }
   0xc   :  { %349 = vmatprep.subr.bf16.mxu0 %v4600_v13  ;;  %462 = vmatprep.subr.bf16.mxu1 %v4602_v14  ;;  %v5525_v34 = vld [vmem:[%s7216_s2 + $0xc] ss:$16 sps:$4 sm:$0xff]   ;;  %v4630_v35 = vld [vmem:[%s7215_s0] sm:$0xff]   ;;  %v5545_v38 = vld [vmem:[%s7216_s2 + $0x8] ss:$16 sps:$4 sm:$0xff]   ;;  %v5787_v11 = vshrl.u32 %v115_v10, 7 }
   0xd   :  { %v5533_v36 = vld [vmem:[%s7216_s2] ss:$16 sps:$4 sm:$0xff]   ;;  %v5539_v37 = vld [vmem:[%s7216_s2 + $0x24] ss:$16 sps:$4 sm:$0xff]   ;;  %v5550_v39 = vld [vmem:[%s7216_s2 + $0x2c] ss:$16 sps:$4 sm:$0xff]  }
   0xe   :  { %v5557_v40 = vld [vmem:[%s7216_s2 + $0x20] ss:$16 sps:$4 sm:$0xff]   ;;  %v5564_v41 = vld [vmem:[%s7216_s2 + $0x44] ss:$16 sps:$4 sm:$0xff]   ;;  %v5570_v42 = vld [vmem:[%s7216_s2 + $0x28] ss:$16 sps:$4 sm:$0xff]  }
   0xf   :  { %350 = vmatpush1.bf16.msra.mxu0 %v4604_v15  ;;  %463 = vmatpush1.bf16.msra.mxu1 %v4605_v16  ;;  %v4634_v43 = vld [vmem:[%s7215_s0 + $0x8] sm:$0xff]   ;;  %v5580_v44 = vld [vmem:[%s7216_s2 + $0x40] ss:$16 sps:$4 sm:$0xff]   ;;  %v5585_v45 = vld [vmem:[%s7216_s2 + $0x64] ss:$16 sps:$4 sm:$0xff]   ;;  %v117_v12 = vsub.s32 0, %v5787_v11 }
  0x10   :  { %351 = vmatprep.subr.bf16.mxu0 %v4606_v17  ;;  %464 = vmatprep.subr.bf16.mxu1 %v4608_v18  ;;  %v5591_v46 = vld [vmem:[%s7216_s2 + $0x4c] ss:$16 sps:$4 sm:$0xff]   ;;  %v5597_v47 = vld [vmem:[%s7216_s2 + $0x48] ss:$16 sps:$4 sm:$0xff]   ;;  %v5610_v49 = vld [vmem:[%s7216_s2 + $0x60] ss:$16 sps:$4 sm:$0xff]  }
  0x11   :  { %v5602_v48 = vld [vmem:[%s7216_s2 + $0x6c] ss:$16 sps:$4 sm:$0xff]   ;;  %v5616_v50 = vld [vmem:[%s7216_s2 + $0x84] ss:$16 sps:$4 sm:$0xff]   ;;  %v5623_v51 = vld [vmem:[%s7216_s2 + $0x68] ss:$16 sps:$4 sm:$0xff]  }
  0x12   :  { %v4640_v52 = vld [vmem:[%s7215_s0 + $0x10] sm:$0xff]   ;;  %v5638_v54 = vld [vmem:[%s7216_s2 + $0x8c] ss:$16 sps:$4 sm:$0xff]   ;;  %v5650_v56 = vld [vmem:[%s7216_s2 + $0x88] ss:$16 sps:$4 sm:$0xff]   ;;  %v121_v14 = vsub.s32 1, %v5787_v11 }
  0x13   :  { %352 = vmatpush1.bf16.msra.mxu0 %v4610_v19  ;;  %465 = vmatpush1.bf16.msra.mxu1 %v4611_v20  ;;  %v5632_v53 = vld [vmem:[%s7216_s2 + $0x80] ss:$16 sps:$4 sm:$0xff]   ;;  %v5644_v55 = vld [vmem:[%s7216_s2 + $0xa4] ss:$16 sps:$4 sm:$0xff]   ;;  %v5655_v57 = vld [vmem:[%s7216_s2 + $0xac] ss:$16 sps:$4 sm:$0xff]  }
  0x14   :  { %353 = vmatprep.subr.bf16.mxu0 %v4612_v21  ;;  %466 = vmatprep.subr.bf16.mxu1 %v4614_v22  ;;  %v5663_v58 = vld [vmem:[%s7216_s2 + $0xa0] ss:$16 sps:$4 sm:$0xff]   ;;  %v5670_v59 = vld [vmem:[%s7216_s2 + $0xc4] ss:$16 sps:$4 sm:$0xff]   ;;  %v5676_v60 = vld [vmem:[%s7216_s2 + $0xa8] ss:$16 sps:$4 sm:$0xff]  }
  0x15   :  { %v4647_v61 = vld [vmem:[%s7215_s0 + $0x18] sm:$0xff]   ;;  %v5686_v62 = vld [vmem:[%s7216_s2 + $0xc0] ss:$16 sps:$4 sm:$0xff]   ;;  %v5698_v0 = vld [vmem:[%s7216_s2 + $0xe4] ss:$16 sps:$4 sm:$0xff]   ;;  %v7225_v19 = vsub.s32 3, %v5787_v11 }
  0x16   :  { %v5691_v63 = vld [vmem:[%s7216_s2 + $0xcc] ss:$16 sps:$4 sm:$0xff]   ;;  %v5703_v2 = vld [vmem:[%s7216_s2 + $0xc8] ss:$16 sps:$4 sm:$0xff]   ;;  %v5717_v4 = vld [vmem:[%s7216_s2 + $0xe0] ss:$16 sps:$4 sm:$0xff]  }
  0x17   :  { %354 = vmatpush1.bf16.msra.mxu0 %v4616_v23  ;;  %467 = vmatpush1.bf16.msra.mxu1 %v4617_v24  ;;  %v5708_v3 = vld [vmem:[%s7216_s2 + $0xec] ss:$16 sps:$4 sm:$0xff]   ;;  %v5724_v5 = vld [vmem:[%s7216_s2 + $0xe8] ss:$16 sps:$4 sm:$0xff]   ;;  %v4654_v6 = vld [vmem:[%s7215_s0 + $0x20] sm:$0xff]  }
  0x18   :  { %355 = vmatprep.subr.bf16.mxu0 %v4618_v25  ;;  %468 = vmatprep.subr.bf16.mxu1 %v4620_v26  ;;  %v4661_v7 = vld [vmem:[%s7215_s0 + $0x28] sm:$0xff]   ;;  %v4668_v8 = vld [vmem:[%s7215_s0 + $0x30] sm:$0xff]   ;;  %v4676_v9 = vld [vmem:[%s7215_s0 + $0x38] sm:$0xff]  }
  0x19   :  { %v97_v13 = vld [vmem:[%s7217_s3] sm:$0xf] }
  0x1a   :  { %v5796_v15 = vrot.slane %v97_v13, %v117_v12  ;;  %v5800_v16 = vrot.slane %v97_v13, %v121_v14 }
  0x1b   :  { %356 = vmatpush1.bf16.msra.mxu0 %v4622_v27  ;;  %469 = vmatpush1.bf16.msra.mxu1 %v4623_v28  ;;  %v7224_v27 = vsub.s32 2, %v5787_v11 }
  0x1c   :  { %357 = vmatprep.subr.bf16.mxu0 %v4624_v29  ;;  %470 = vmatprep.subr.bf16.mxu1 %v4626_v30 }
  0x1f   :  { %358 = vmatpush1.bf16.msra.mxu0 %v4628_v31  ;;  %471 = vmatpush1.bf16.msra.mxu1 %v4629_v32  ;;  %v5809_v32 = vrot.slane %v97_v13, %v7225_v19 }
  0x20   :  { %801 = vmatprep.subr.bf16.mxu0 %v5520_v33  ;;  %844 = vmatprep.subr.bf16.mxu1 %v5525_v34 }
  0x22   :  { %376 = vmatmul.mubr.bf16.vlgmr.msra.gmra.mrb[0].mxu0 %v4630_v35  ;;  %489 = vmatmul.mubr.bf16.vlgmr.msra.gmra.mrb[0].mxu1 %v4630_v35 }
  0x23   :  { %802 = vmatpush1.bf16.msra.mxu0 %v5533_v36  ;;  %385 = vmatprep.mubr.bf16.mxu0 %v5366_v1 }
  0x24   :  { %498 = vmatprep.mubr.bf16.mxu1 %v5366_v1  ;;  %803 = vmatprep.subr.bf16.mxu0 %v5539_v37 }
  0x25   :  { %845 = vmatpush1.bf16.msra.mxu1 %v5545_v38 }
  0x26   :  { %846 = vmatprep.subr.bf16.mxu1 %v5550_v39 }
  0x27   :  { %804 = vmatpush1.bf16.msra.mxu0 %v5557_v40 }
  0x28   :  { %805 = vmatprep.subr.bf16.mxu0 %v5564_v41 }
  0x29   :  { %847 = vmatpush1.bf16.msra.mxu1 %v5570_v42 }
  0x2a   :  { %386 = vmatmul.mubr.bf16.gmra.mrb[4].mxu0 %v4634_v43  ;;  %499 = vmatmul.mubr.bf16.gmra.mrb[4].mxu1 %v4634_v43 }
  0x2b   :  { %395 = vmatprep.mubr.bf16.mxu0 %v5366_v1  ;;  %508 = vmatprep.mubr.bf16.mxu1 %v5366_v1 }
  0x2c   :  { %806 = vmatpush1.bf16.msra.mxu0 %v5580_v44  ;;  %848 = vmatprep.subr.bf16.mxu1 %v5591_v46 }
  0x2d   :  { %807 = vmatprep.subr.bf16.mxu0 %v5585_v45  ;;  %849 = vmatpush1.bf16.msra.mxu1 %v5597_v47 }
  0x2e   :  { %850 = vmatprep.subr.bf16.mxu1 %v5602_v48 }
  0x30   :  { %808 = vmatpush1.bf16.msra.mxu0 %v5610_v49 }
  0x31   :  { %809 = vmatprep.subr.bf16.mxu0 %v5616_v50  ;;  %851 = vmatpush1.bf16.msra.mxu1 %v5623_v51 }
  0x32   :  { %396 = vmatmul.mubr.bf16.gmra.mrb[8].mxu0 %v4640_v52  ;;  %509 = vmatmul.mubr.bf16.gmra.mrb[8].mxu1 %v4640_v52 }
  0x33   :  { %405 = vmatprep.mubr.bf16.mxu0 %v5366_v1  ;;  %518 = vmatprep.mubr.bf16.mxu1 %v5366_v1 }
  0x34   :  { %810 = vmatpush1.bf16.msra.mxu0 %v5632_v53  ;;  %852 = vmatprep.subr.bf16.mxu1 %v5638_v54 }
  0x35   :  { %811 = vmatprep.subr.bf16.mxu0 %v5644_v55  ;;  %853 = vmatpush1.bf16.msra.mxu1 %v5650_v56 }
  0x36   :  { %854 = vmatprep.subr.bf16.mxu1 %v5655_v57 }
  0x38   :  { %812 = vmatpush1.bf16.msra.mxu0 %v5663_v58 }
  0x39   :  { %813 = vmatprep.subr.bf16.mxu0 %v5670_v59  ;;  %855 = vmatpush1.bf16.msra.mxu1 %v5676_v60 }
  0x3a   :  { %406 = vmatmul.mubr.bf16.gmra.mrb[12].mxu0 %v4647_v61  ;;  %519 = vmatmul.mubr.bf16.gmra.mrb[12].mxu1 %v4647_v61  ;;  %v5814_v61 = vrot.slane %v97_v13, %v7224_v27 }
  0x3b   :  { %415 = vmatprep.mubr.bf16.mxu0 %v5366_v1  ;;  %528 = vmatprep.mubr.bf16.mxu1 %v5366_v1 }
  0x3c   :  { %814 = vmatpush1.bf16.msra.mxu0 %v5686_v62  ;;  %856 = vmatprep.subr.bf16.mxu1 %v5691_v63 }
  0x3d   :  { %815 = vmatprep.subr.bf16.mxu0 %v5698_v0  ;;  %857 = vmatpush1.bf16.msra.mxu1 %v5703_v2 }
  0x3e   :  { %858 = vmatprep.subr.bf16.mxu1 %v5708_v3 }
  0x40   :  { %816 = vmatpush1.bf16.msra.mxu0 %v5717_v4 }
  0x41   :  { %859 = vmatpush1.bf16.msra.mxu1 %v5724_v5  ;;  %954 = vmatprep.subr.bf16.mxu0 %v5520_v33 }
  0x42   :  { %416 = vmatmul.mubr.bf16.gmra.mrb[16].mxu0 %v4654_v6  ;;  %529 = vmatmul.mubr.bf16.gmra.mrb[16].mxu1 %v4654_v6 }
  0x43   :  { %425 = vmatprep.mubr.bf16.mxu0 %v5366_v1  ;;  %538 = vmatprep.mubr.bf16.mxu1 %v5366_v1 }
  0x44   :  { %997 = vmatprep.subr.bf16.mxu1 %v5525_v34 }
  0x4a   :  { %426 = vmatmul.mubr.bf16.gmra.mrb[20].mxu0 %v4661_v7  ;;  %539 = vmatmul.mubr.bf16.gmra.mrb[20].mxu1 %v4661_v7 }
  0x4b   :  { %435 = vmatprep.mubr.bf16.mxu0 %v5366_v1  ;;  %548 = vmatprep.mubr.bf16.mxu1 %v5366_v1 }
  0x52   :  { %436 = vmatmul.mubr.bf16.gmra.mrb[24].mxu0 %v4668_v8  ;;  %549 = vmatmul.mubr.bf16.gmra.mrb[24].mxu1 %v4668_v8 }
  0x53   :  { %445 = vmatprep.mubr.bf16.mxu0 %v5366_v1  ;;  %558 = vmatprep.mubr.bf16.mxu1 %v5366_v1 }
  0x5a   :  { %446 = vmatmul.mubr.bf16.gmra.mrb[28].mxu0 %v4676_v9  ;;  %559 = vmatmul.mubr.bf16.gmra.mrb[28].mxu1 %v4676_v9 }
  0x5b   :  { %833 = vmatprep.mubr.bf16.mxu0 %v5366_v1  ;;  %876 = vmatprep.mubr.bf16.mxu1 %v5366_v1 }
  0x62   :  { %834 = vmatmul.mubr.bf16.vlgmr.msra.gmra.mrb[0].mxu0 %v5366_v1  ;;  %877 = vmatmul.mubr.bf16.vlgmr.msra.gmra.mrb[0].mxu1 %v5366_v1 }
  0x63   :  { %955 = vmatpush1.bf16.msra.mxu0 %v5533_v36  ;;  %998 = vmatpush1.bf16.msra.mxu1 %v5545_v38 }
  0x64   :  { %956 = vmatprep.subr.bf16.mxu0 %v5539_v37  ;;  %999 = vmatprep.subr.bf16.mxu1 %v5550_v39 }
  0x65   :  { %986 = vmatprep.mubr.bf16.mxu0 %v5366_v1  ;;  %1029 = vmatprep.mubr.bf16.mxu1 %v5366_v1 }
  0x67   :  { %957 = vmatpush1.bf16.msra.mxu0 %v5557_v40  ;;  %1000 = vmatpush1.bf16.msra.mxu1 %v5570_v42 }
  0x68   :  { %958 = vmatprep.subr.bf16.mxu0 %v5564_v41  ;;  %1001 = vmatprep.subr.bf16.mxu1 %v5591_v46 }
  0x6b   :  { %959 = vmatpush1.bf16.msra.mxu0 %v5580_v44  ;;  %1002 = vmatpush1.bf16.msra.mxu1 %v5597_v47 }
  0x6c   :  { %960 = vmatprep.subr.bf16.mxu0 %v5585_v45  ;;  %1003 = vmatprep.subr.bf16.mxu1 %v5602_v48 }
  0x6f   :  { %961 = vmatpush1.bf16.msra.mxu0 %v5610_v49  ;;  %1004 = vmatpush1.bf16.msra.mxu1 %v5623_v51 }
  0x70   :  { %962 = vmatprep.subr.bf16.mxu0 %v5616_v50  ;;  %1005 = vmatprep.subr.bf16.mxu1 %v5638_v54 }
  0x73   :  { %963 = vmatpush1.bf16.msra.mxu0 %v5632_v53  ;;  %1006 = vmatpush1.bf16.msra.mxu1 %v5650_v56 }
  0x74   :  { %964 = vmatprep.subr.bf16.mxu0 %v5644_v55  ;;  %1007 = vmatprep.subr.bf16.mxu1 %v5655_v57 }
  0x77   :  { %965 = vmatpush1.bf16.msra.mxu0 %v5663_v58  ;;  %1008 = vmatpush1.bf16.msra.mxu1 %v5676_v60 }
  0x78   :  { %966 = vmatprep.subr.bf16.mxu0 %v5670_v59  ;;  %1009 = vmatprep.subr.bf16.mxu1 %v5691_v63 }
  0x7b   :  { %967 = vmatpush1.bf16.msra.mxu0 %v5686_v62  ;;  %1010 = vmatpush1.bf16.msra.mxu1 %v5703_v2 }
  0x7c   :  { %968 = vmatprep.subr.bf16.mxu0 %v5698_v0  ;;  %1011 = vmatprep.subr.bf16.mxu1 %v5708_v3 }
  0x7f   :  { %969 = vmatpush1.bf16.msra.mxu0 %v5717_v4  ;;  %1012 = vmatpush1.bf16.msra.mxu1 %v5724_v5 }
  0x80   :  { %1108 = vmatprep.subr.bf16.mxu0 %v5520_v33  ;;  %1151 = vmatprep.subr.bf16.mxu1 %v5525_v34 }
 0x135   :  { %v835_v17 = vpop.f32.mrb[0].mxu0  ;;  %v878_v18 = vpop.f32.mrb[0].mxu1 }
 0x136   :  { %v4323_v20 = vadd.f32 %v835_v17, %v5796_v15  ;;  %v837_v21 = vpop.f32.mrb[1].mxu0  ;;  %v880_v22 = vpop.f32.mrb[1].mxu1  ;;  %v4355_v7 = vadd.f32 %v878_v18, %v5814_v61 }
 0x137   :  { %v4324_v23 = vadd.f32 %v837_v21, %v5800_v16  ;;  %v839_v24 = vpop.f32.mrb[2].mxu0  ;;  %v882_v25 = vpop.f32.mrb[2].mxu1  ;;  %v4356_v6 = vadd.f32 %v880_v22, %v5809_v32 }
 0x138   :  { %v4125_v26 = vmul.f32 -1.442695, %v4323_v20  ;;  %v4325_v28 = vadd.f32 %v839_v24, %v5796_v15  ;;  %v841_v29 = vpop.f32.mrb[3].mxu0  ;;  %v884_v30 = vpop.f32.mrb[3].mxu1  ;;  %v4357_v10 = vadd.f32 %v882_v25, %v5814_v61 }
 0x139   :  { %v4127_v31 = vmul.f32 -1.442695, %v4324_v23  ;;  %v4326_v35 = vadd.f32 %v841_v29, %v5800_v16  ;;  %v4129_v8 = vmul.f32 -1.442695, %v4356_v6  ;;  %v4358_v9 = vadd.f32 %v884_v30, %v5809_v32 }
 0x13a   :  { %4790 = vpow2.f32 %v4125_v26  ;;  %v4126_v43 = vmul.f32 -1.442695, %v4325_v28 }
 0x13b   :  { %4792 = vpow2.f32 %v4127_v31  ;;  %v4128_v52 = vmul.f32 -1.442695, %v4326_v35  ;;  %v4130_v23 = vmul.f32 -1.442695, %v4358_v9 }
 0x13c   :  { %4794 = vpow2.f32 %v4126_v43 }
 0x13d   :  { %4796 = vpow2.f32 %v4128_v52 }
 0x13e   :  { %4798 = vtanh.f32 %v4355_v7 }
 0x13f   :  { %4800 = vpow2.f32 %v4129_v8 }
 0x140   :  { %4802 = vtanh.f32 %v4357_v10 }
 0x144   :  { %v4791_v17 = vpop.eup %4790 }
 0x145   :  { %v4793_v20 = vpop.eup %4792  ;;  %v901_v21 = vadd.f32 1.0, %v4791_v17 }
 0x146   :  { %v913_v24 = vadd.f32 1.0, %v4793_v20  ;;  %v4795_v13 = vpop.eup %4794 }
 0x147   :  { %4804 = vrcp.f32 %v901_v21  ;;  %v902_v22 = vadd.f32 1.0, %v4795_v13  ;;  %v4797_v26 = vpop.eup %4796 }
 0x148   :  { %4806 = vrcp.f32 %v913_v24  ;;  %v914_v18 = vadd.f32 1.0, %v4797_v26  ;;  %v4799_v28 = vpop.eup %4798 }
 0x149   :  { %4808 = vpow2.f32 %v4130_v23  ;;  %v4801_v29 = vpop.eup %4800 }
 0x14a   :  { %4810 = vrcp.f32 %v902_v22  ;;  %v4803_v25 = vpop.eup %4802  ;;  %v927_v7 = vadd.f32 1.0, %v4801_v29 }
 0x14b   :  { %4812 = vrcp.f32 %v914_v18 }
 0x14c   :  { %4814 = vrcp.f32 %v927_v7 }
 0x151   :  { %v4805_v30 = vpop.eup %4804 }
 0x152   :  { %v4807_v31 = vpop.eup %4806  ;;  %v935_v35 = vmul.f32 %v4805_v30, %v4799_v28 }
 0x153   :  { %v4809_v43 = vpop.eup %4808  ;;  %v933_v52 = vmul.f32 0.0, %v4807_v31 }
 0x154   :  { %v4811_v6 = vpop.eup %4810  ;;  %v928_v17 = vadd.f32 1.0, %v4809_v43 }
 0x155   :  { %v5820_v8 = vadd.f32 %v935_v35, %v933_v52  ;;  %v936_v9 = vmul.f32 %v4811_v6, %v4803_v25  ;;  %v4813_v10 = vpop.eup %4812 }
 0x156   :  { %v934_v20 = vmul.f32 0.0, %v4813_v10  ;;  %v4815_v23 = vpop.eup %4814 }
 0x157   :  { %4816 = vtanh.f32 %v5820_v8 }
 0x158   :  { %v5823_v21 = vadd.f32 %v936_v9, %v934_v20  ;;  %4818 = vrcp.f32 %v928_v17 }
 0x15a   :  { %4820 = vtanh.f32 %v5823_v21 }
 0x161   :  { %v4817_v24 = vpop.eup %4816 }
 0x162   :  { %v4819_v13 = vpop.eup %4818  ;;  %v941_v26 = vmul.f32 %v4817_v24, %v4815_v23 }
 0x164   :  { %v4821_v22 = vpop.eup %4820 }
 0x165   :  { %v942_v18 = vmul.f32 %v4821_v22, %v4819_v13 }
 0x167   :  { %v5826_v28 = vpack.c.bf16 %v942_v18, %v941_v26 }
 0x169   :  { %987 = vmatmul.mubr.bf16.vlgmr.msra.gmra.mrb[4].mxu0 %v5826_v28  ;;  %1030 = vmatmul.mubr.bf16.vlgmr.msra.gmra.mrb[4].mxu1 %v5826_v28 }
 0x16a   :  { %1109 = vmatpush1.bf16.msra.mxu0 %v5533_v36  ;;  %1152 = vmatpush1.bf16.msra.mxu1 %v5545_v38 }
 0x16b   :  { %1110 = vmatprep.subr.bf16.mxu0 %v5539_v37  ;;  %1153 = vmatprep.subr.bf16.mxu1 %v5550_v39 }
 0x16c   :  { %1140 = vmatprep.mubr.bf16.mxu0 %v5366_v1  ;;  %1183 = vmatprep.mubr.bf16.mxu1 %v5366_v1 }
 0x16e   :  { %1111 = vmatpush1.bf16.msra.mxu0 %v5557_v40  ;;  %1154 = vmatpush1.bf16.msra.mxu1 %v5570_v42 }
 0x16f   :  { %1112 = vmatprep.subr.bf16.mxu0 %v5564_v41  ;;  %1155 = vmatprep.subr.bf16.mxu1 %v5591_v46 }
 0x172   :  { %1113 = vmatpush1.bf16.msra.mxu0 %v5580_v44  ;;  %1156 = vmatpush1.bf16.msra.mxu1 %v5597_v47 }
 0x173   :  { %1114 = vmatprep.subr.bf16.mxu0 %v5585_v45  ;;  %1157 = vmatprep.subr.bf16.mxu1 %v5602_v48 }
 0x176   :  { %1115 = vmatpush1.bf16.msra.mxu0 %v5610_v49  ;;  %1158 = vmatpush1.bf16.msra.mxu1 %v5623_v51 }
 0x177   :  { %1116 = vmatprep.subr.bf16.mxu0 %v5616_v50  ;;  %1159 = vmatprep.subr.bf16.mxu1 %v5638_v54 }
 0x17a   :  { %1117 = vmatpush1.bf16.msra.mxu0 %v5632_v53  ;;  %1160 = vmatpush1.bf16.msra.mxu1 %v5650_v56 }
 0x17b   :  { %1118 = vmatprep.subr.bf16.mxu0 %v5644_v55  ;;  %1161 = vmatprep.subr.bf16.mxu1 %v5655_v57 }
 0x17e   :  { %1119 = vmatpush1.bf16.msra.mxu0 %v5663_v58  ;;  %1162 = vmatpush1.bf16.msra.mxu1 %v5676_v60 }
 0x17f   :  { %1120 = vmatprep.subr.bf16.mxu0 %v5670_v59  ;;  %1163 = vmatprep.subr.bf16.mxu1 %v5691_v63 }
 0x182   :  { %1121 = vmatpush1.bf16.msra.mxu0 %v5686_v62  ;;  %1164 = vmatpush1.bf16.msra.mxu1 %v5703_v2 }
 0x183   :  { %1122 = vmatprep.subr.bf16.mxu0 %v5698_v0  ;;  %1165 = vmatprep.subr.bf16.mxu1 %v5708_v3 }
 0x186   :  { %1123 = vmatpush1.bf16.msra.mxu0 %v5717_v4  ;;  %1166 = vmatpush1.bf16.msra.mxu1 %v5724_v5 }
 0x187   :  { %1262 = vmatprep.subr.bf16.mxu0 %v5520_v33  ;;  %1305 = vmatprep.subr.bf16.mxu1 %v5525_v34 }
 0x23c   :  { %v988_v29 = vpop.f32.mrb[4].mxu0  ;;  %v1031_v25 = vpop.f32.mrb[4].mxu1 }
 0x23d   :  { %v4327_v30 = vadd.f32 %v988_v29, %v5796_v15  ;;  %v990_v31 = vpop.f32.mrb[5].mxu0  ;;  %v1033_v35 = vpop.f32.mrb[5].mxu1  ;;  %v4359_v26 = vadd.f32 %v1031_v25, %v5814_v61 }
 0x23e   :  { %v4328_v43 = vadd.f32 %v990_v31, %v5800_v16  ;;  %v992_v52 = vpop.f32.mrb[6].mxu0  ;;  %v1035_v6 = vpop.f32.mrb[6].mxu1  ;;  %v4360_v22 = vadd.f32 %v1033_v35, %v5809_v32 }
 0x23f   :  { %v4131_v7 = vmul.f32 -1.442695, %v4327_v30  ;;  %v4329_v9 = vadd.f32 %v992_v52, %v5796_v15  ;;  %v994_v10 = vpop.f32.mrb[7].mxu0  ;;  %v1037_v17 = vpop.f32.mrb[7].mxu1  ;;  %v4361_v30 = vadd.f32 %v1035_v6, %v5814_v61 }
 0x240   :  { %v4133_v20 = vmul.f32 -1.442695, %v4328_v43  ;;  %v4330_v23 = vadd.f32 %v994_v10, %v5800_v16  ;;  %v4135_v18 = vmul.f32 -1.442695, %v4360_v22  ;;  %v4362_v29 = vadd.f32 %v1037_v17, %v5809_v32 }
 0x241   :  { %4822 = vpow2.f32 %v4131_v7  ;;  %v4132_v24 = vmul.f32 -1.442695, %v4329_v9 }
 0x242   :  { %4824 = vpow2.f32 %v4133_v20  ;;  %v4134_v13 = vmul.f32 -1.442695, %v4330_v23  ;;  %v4136_v7 = vmul.f32 -1.442695, %v4362_v29 }
 0x243   :  { %4826 = vpow2.f32 %v4132_v24 }
 0x244   :  { %4828 = vpow2.f32 %v4134_v13 }
 0x245   :  { %4830 = vtanh.f32 %v4359_v26 }
 0x246   :  { %4832 = vpow2.f32 %v4135_v18 }
 0x247   :  { %4834 = vtanh.f32 %v4361_v30 }
 0x24b   :  { %v4823_v31 = vpop.eup %4822 }
 0x24c   :  { %v4825_v43 = vpop.eup %4824  ;;  %v1054_v52 = vadd.f32 1.0, %v4823_v31 }
 0x24d   :  { %v1066_v9 = vadd.f32 1.0, %v4825_v43  ;;  %v4827_v10 = vpop.eup %4826 }
 0x24e   :  { %4836 = vrcp.f32 %v1054_v52  ;;  %v1055_v35 = vadd.f32 1.0, %v4827_v10  ;;  %v4829_v20 = vpop.eup %4828 }
 0x24f   :  { %4838 = vrcp.f32 %v1066_v9  ;;  %v1067_v25 = vadd.f32 1.0, %v4829_v20  ;;  %v4831_v17 = vpop.eup %4830 }
 0x250   :  { %4840 = vpow2.f32 %v4136_v7  ;;  %v4833_v23 = vpop.eup %4832 }
 0x251   :  { %4842 = vrcp.f32 %v1055_v35  ;;  %v4835_v6 = vpop.eup %4834  ;;  %v1080_v30 = vadd.f32 1.0, %v4833_v23 }
 0x252   :  { %4844 = vrcp.f32 %v1067_v25 }
 0x253   :  { %4846 = vrcp.f32 %v1080_v30 }
 0x258   :  { %v4837_v24 = vpop.eup %4836 }
 0x259   :  { %v4839_v13 = vpop.eup %4838  ;;  %v1088_v22 = vmul.f32 %v4837_v24, %v4831_v17 }
 0x25a   :  { %v4841_v26 = vpop.eup %4840  ;;  %v1086_v18 = vmul.f32 %v4839_v13, %v5820_v8 }
 0x25b   :  { %v4843_v29 = vpop.eup %4842  ;;  %v1081_v9 = vadd.f32 1.0, %v4841_v26 }
 0x25c   :  { %v5873_v31 = vadd.f32 %v1088_v22, %v1086_v18  ;;  %v1089_v43 = vmul.f32 %v4843_v29, %v4835_v6  ;;  %v4845_v52 = vpop.eup %4844 }
 0x25d   :  { %v1087_v7 = vmul.f32 %v4845_v52, %v5823_v21  ;;  %v4847_v35 = vpop.eup %4846 }
 0x25e   :  { %4848 = vtanh.f32 %v5873_v31 }
 0x25f   :  { %v5877_v10 = vadd.f32 %v1089_v43, %v1087_v7  ;;  %4850 = vrcp.f32 %v1081_v9 }
 0x261   :  { %4852 = vtanh.f32 %v5877_v10 }
 0x268   :  { %v4849_v20 = vpop.eup %4848 }
 0x269   :  { %v4851_v8 = vpop.eup %4850  ;;  %v1094_v17 = vmul.f32 %v4849_v20, %v4847_v35 }
 0x26b   :  { %v4853_v25 = vpop.eup %4852 }
 0x26c   :  { %v1095_v23 = vmul.f32 %v4853_v25, %v4851_v8 }
 0x26e   :  { %v5880_v24 = vpack.c.bf16 %v1095_v23, %v1094_v17 }
 0x270   :  { %1141 = vmatmul.mubr.bf16.vlgmr.msra.gmra.mrb[8].mxu0 %v5880_v24  ;;  %1184 = vmatmul.mubr.bf16.vlgmr.msra.gmra.mrb[8].mxu1 %v5880_v24 }
 0x271   :  { %1263 = vmatpush1.bf16.msra.mxu0 %v5533_v36  ;;  %1306 = vmatpush1.bf16.msra.mxu1 %v5545_v38 }
 0x272   :  { %1264 = vmatprep.subr.bf16.mxu0 %v5539_v37  ;;  %1307 = vmatprep.subr.bf16.mxu1 %v5550_v39 }
 0x273   :  { %1294 = vmatprep.mubr.bf16.mxu0 %v5366_v1  ;;  %1337 = vmatprep.mubr.bf16.mxu1 %v5366_v1 }
 0x275   :  { %1265 = vmatpush1.bf16.msra.mxu0 %v5557_v40  ;;  %1308 = vmatpush1.bf16.msra.mxu1 %v5570_v42 }
 0x276   :  { %1266 = vmatprep.subr.bf16.mxu0 %v5564_v41  ;;  %1309 = vmatprep.subr.bf16.mxu1 %v5591_v46 }
 0x279   :  { %1267 = vmatpush1.bf16.msra.mxu0 %v5580_v44  ;;  %1310 = vmatpush1.bf16.msra.mxu1 %v5597_v47 }
 0x27a   :  { %1268 = vmatprep.subr.bf16.mxu0 %v5585_v45  ;;  %1311 = vmatprep.subr.bf16.mxu1 %v5602_v48 }
 0x27d   :  { %1269 = vmatpush1.bf16.msra.mxu0 %v5610_v49  ;;  %1312 = vmatpush1.bf16.msra.mxu1 %v5623_v51 }
 0x27e   :  { %1270 = vmatprep.subr.bf16.mxu0 %v5616_v50  ;;  %1313 = vmatprep.subr.bf16.mxu1 %v5638_v54 }
 0x281   :  { %1271 = vmatpush1.bf16.msra.mxu0 %v5632_v53  ;;  %1314 = vmatpush1.bf16.msra.mxu1 %v5650_v56 }
 0x282   :  { %1272 = vmatprep.subr.bf16.mxu0 %v5644_v55  ;;  %1315 = vmatprep.subr.bf16.mxu1 %v5655_v57 }
 0x285   :  { %1273 = vmatpush1.bf16.msra.mxu0 %v5663_v58  ;;  %1316 = vmatpush1.bf16.msra.mxu1 %v5676_v60 }
 0x286   :  { %1274 = vmatprep.subr.bf16.mxu0 %v5670_v59  ;;  %1317 = vmatprep.subr.bf16.mxu1 %v5691_v63 }
 0x289   :  { %1275 = vmatpush1.bf16.msra.mxu0 %v5686_v62  ;;  %1318 = vmatpush1.bf16.msra.mxu1 %v5703_v2 }
 0x28a   :  { %1276 = vmatprep.subr.bf16.mxu0 %v5698_v0  ;;  %1319 = vmatprep.subr.bf16.mxu1 %v5708_v3 }
 0x28d   :  { %1277 = vmatpush1.bf16.msra.mxu0 %v5717_v4  ;;  %1320 = vmatpush1.bf16.msra.mxu1 %v5724_v5 }
 0x28e   :  { %1416 = vmatprep.subr.bf16.mxu0 %v5520_v33  ;;  %1459 = vmatprep.subr.bf16.mxu1 %v5525_v34 }
 0x343   :  { %v1142_v21 = vpop.f32.mrb[8].mxu0  ;;  %v1185_v6 = vpop.f32.mrb[8].mxu1 }
 0x344   :  { %v4331_v13 = vadd.f32 %v1142_v21, %v5796_v15  ;;  %v1144_v22 = vpop.f32.mrb[9].mxu0  ;;  %v1187_v26 = vpop.f32.mrb[9].mxu1  ;;  %v4363_v23 = vadd.f32 %v1185_v6, %v5814_v61 }
 0x345   :  { %v4332_v18 = vadd.f32 %v1144_v22, %v5800_v16  ;;  %v1146_v29 = vpop.f32.mrb[10].mxu0  ;;  %v1189_v30 = vpop.f32.mrb[10].mxu1  ;;  %v4364_v17 = vadd.f32 %v1187_v26, %v5809_v32 }
 0x346   :  { %v4137_v43 = vmul.f32 -1.442695, %v4331_v13  ;;  %v4333_v52 = vadd.f32 %v1146_v29, %v5796_v15  ;;  %v1148_v9 = vpop.f32.mrb[11].mxu0  ;;  %v1191_v7 = vpop.f32.mrb[11].mxu1  ;;  %v4365_v22 = vadd.f32 %v1189_v30, %v5814_v61 }
 0x347   :  { %v4139_v35 = vmul.f32 -1.442695, %v4332_v18  ;;  %v4334_v20 = vadd.f32 %v1148_v9, %v5800_v16  ;;  %v4141_v21 = vmul.f32 -1.442695, %v4364_v17  ;;  %v4366_v13 = vadd.f32 %v1191_v7, %v5809_v32 }
 0x348   :  { %4854 = vpow2.f32 %v4137_v43  ;;  %v4138_v8 = vmul.f32 -1.442695, %v4333_v52 }
 0x349   :  { %4856 = vpow2.f32 %v4139_v35  ;;  %v4140_v25 = vmul.f32 -1.442695, %v4334_v20  ;;  %v4142_v43 = vmul.f32 -1.442695, %v4366_v13 }
 0x34a   :  { %4858 = vpow2.f32 %v4138_v8 }
 0x34b   :  { %4860 = vpow2.f32 %v4140_v25 }
 0x34c   :  { %4862 = vtanh.f32 %v4363_v23 }
 0x34d   :  { %4864 = vpow2.f32 %v4141_v21 }
 0x34e   :  { %4866 = vtanh.f32 %v4365_v22 }
 0x352   :  { %v4855_v29 = vpop.eup %4854 }
 0x353   :  { %v4857_v18 = vpop.eup %4856  ;;  %v1208_v27 = vadd.f32 1.0, %v4855_v29 }
 0x354   :  { %v1220_v52 = vadd.f32 1.0, %v4857_v18  ;;  %v4859_v9 = vpop.eup %4858 }
 0x355   :  { %4868 = vrcp.f32 %v1208_v27  ;;  %v1209_v26 = vadd.f32 1.0, %v4859_v9  ;;  %v4861_v35 = vpop.eup %4860 }
 0x356   :  { %4870 = vrcp.f32 %v1220_v52  ;;  %v1221_v6 = vadd.f32 1.0, %v4861_v35  ;;  %v4863_v7 = vpop.eup %4862 }
 0x357   :  { %4872 = vpow2.f32 %v4142_v43  ;;  %v4865_v20 = vpop.eup %4864 }
 0x358   :  { %4874 = vrcp.f32 %v1209_v26  ;;  %v4867_v30 = vpop.eup %4866  ;;  %v1234_v22 = vadd.f32 1.0, %v4865_v20 }
 0x359   :  { %4876 = vrcp.f32 %v1221_v6 }
 0x35a   :  { %4878 = vrcp.f32 %v1234_v22 }
 0x35f   :  { %v4869_v8 = vpop.eup %4868 }
 0x360   :  { %v4871_v25 = vpop.eup %4870  ;;  %v1242_v17 = vmul.f32 %v4869_v8, %v4863_v7 }
 0x361   :  { %v4873_v23 = vpop.eup %4872  ;;  %v1240_v21 = vmul.f32 %v4871_v25, %v5873_v31 }
 0x362   :  { %v4875_v13 = vpop.eup %4874  ;;  %v1235_v52 = vadd.f32 1.0, %v4873_v23 }
 0x363   :  { %v5927_v29 = vadd.f32 %v1242_v17, %v1240_v21  ;;  %v1243_v27 = vmul.f32 %v4875_v13, %v4867_v30  ;;  %v4877_v18 = vpop.eup %4876 }
 0x364   :  { %v1241_v43 = vmul.f32 %v4877_v18, %v5877_v10  ;;  %v4879_v26 = vpop.eup %4878 }
 0x365   :  { %4880 = vtanh.f32 %v5927_v29 }
 0x366   :  { %v5931_v9 = vadd.f32 %v1243_v27, %v1241_v43  ;;  %4882 = vrcp.f32 %v1235_v52 }
 0x368   :  { %4884 = vtanh.f32 %v5931_v9 }
 0x36f   :  { %v4881_v35 = vpop.eup %4880 }
 0x370   :  { %v4883_v31 = vpop.eup %4882  ;;  %v1248_v7 = vmul.f32 %v4881_v35, %v4879_v26 }
 0x372   :  { %v4885_v6 = vpop.eup %4884 }
 0x373   :  { %v1249_v20 = vmul.f32 %v4885_v6, %v4883_v31 }
 0x375   :  { %v5934_v8 = vpack.c.bf16 %v1249_v20, %v1248_v7 }
 0x377   :  { %1295 = vmatmul.mubr.bf16.vlgmr.msra.gmra.mrb[12].mxu0 %v5934_v8  ;;  %1338 = vmatmul.mubr.bf16.vlgmr.msra.gmra.mrb[12].mxu1 %v5934_v8 }
 0x378   :  { %1417 = vmatpush1.bf16.msra.mxu0 %v5533_v36  ;;  %1460 = vmatpush1.bf16.msra.mxu1 %v5545_v38 }
 0x379   :  { %1418 = vmatprep.subr.bf16.mxu0 %v5539_v37  ;;  %1461 = vmatprep.subr.bf16.mxu1 %v5550_v39 }
 0x37a   :  { %1448 = vmatprep.mubr.bf16.mxu0 %v5366_v1  ;;  %1491 = vmatprep.mubr.bf16.mxu1 %v5366_v1 }
 0x37c   :  { %1419 = vmatpush1.bf16.msra.mxu0 %v5557_v40  ;;  %1462 = vmatpush1.bf16.msra.mxu1 %v5570_v42 }
 0x37d   :  { %1420 = vmatprep.subr.bf16.mxu0 %v5564_v41  ;;  %1463 = vmatprep.subr.bf16.mxu1 %v5591_v46 }
 0x380   :  { %1421 = vmatpush1.bf16.msra.mxu0 %v5580_v44  ;;  %1464 = vmatpush1.bf16.msra.mxu1 %v5597_v47 }
 0x381   :  { %1422 = vmatprep.subr.bf16.mxu0 %v5585_v45  ;;  %1465 = vmatprep.subr.bf16.mxu1 %v5602_v48 }
 0x384   :  { %1423 = vmatpush1.bf16.msra.mxu0 %v5610_v49  ;;  %1466 = vmatpush1.bf16.msra.mxu1 %v5623_v51 }
 0x385   :  { %1424 = vmatprep.subr.bf16.mxu0 %v5616_v50  ;;  %1467 = vmatprep.subr.bf16.mxu1 %v5638_v54 }
 0x388   :  { %1425 = vmatpush1.bf16.msra.mxu0 %v5632_v53  ;;  %1468 = vmatpush1.bf16.msra.mxu1 %v5650_v56 }
 0x389   :  { %1426 = vmatprep.subr.bf16.mxu0 %v5644_v55  ;;  %1469 = vmatprep.subr.bf16.mxu1 %v5655_v57 }
 0x38c   :  { %1427 = vmatpush1.bf16.msra.mxu0 %v5663_v58  ;;  %1470 = vmatpush1.bf16.msra.mxu1 %v5676_v60 }
 0x38d   :  { %1428 = vmatprep.subr.bf16.mxu0 %v5670_v59  ;;  %1471 = vmatprep.subr.bf16.mxu1 %v5691_v63 }
 0x390   :  { %1429 = vmatpush1.bf16.msra.mxu0 %v5686_v62  ;;  %1472 = vmatpush1.bf16.msra.mxu1 %v5703_v2 }
 0x391   :  { %1430 = vmatprep.subr.bf16.mxu0 %v5698_v0  ;;  %1473 = vmatprep.subr.bf16.mxu1 %v5708_v3 }
 0x394   :  { %1431 = vmatpush1.bf16.msra.mxu0 %v5717_v4  ;;  %1474 = vmatpush1.bf16.msra.mxu1 %v5724_v5 }
 0x395   :  { %1570 = vmatprep.subr.bf16.mxu0 %v5520_v33  ;;  %1613 = vmatprep.subr.bf16.mxu1 %v5525_v34 }
 0x44a   :  { %v1296_v36 = vpop.f32.mrb[12].mxu0  ;;  %v1339_v37 = vpop.f32.mrb[12].mxu1 }
 0x44b   :  { %v4335_v38 = vadd.f32 %v1296_v36, %v5796_v15  ;;  %v1298_v39 = vpop.f32.mrb[13].mxu0  ;;  %v1341_v40 = vpop.f32.mrb[13].mxu1  ;;  %v4367_v53 = vadd.f32 %v1339_v37, %v5814_v61 }
 0x44c   :  { %v4336_v41 = vadd.f32 %v1298_v39, %v5800_v16  ;;  %v1300_v42 = vpop.f32.mrb[14].mxu0  ;;  %v1343_v44 = vpop.f32.mrb[14].mxu1  ;;  %v4368_v51 = vadd.f32 %v1341_v40, %v5809_v32 }
 0x44d   :  { %v4143_v45 = vmul.f32 -1.442695, %v4335_v38  ;;  %v4337_v46 = vadd.f32 %v1300_v42, %v5796_v15  ;;  %v1302_v47 = vpop.f32.mrb[15].mxu0  ;;  %v1345_v48 = vpop.f32.mrb[15].mxu1  ;;  %v4369_v10 = vadd.f32 %v1343_v44, %v5814_v61 }
 0x44e   :  { %v4145_v49 = vmul.f32 -1.442695, %v4336_v41  ;;  %v4338_v33 = vadd.f32 %v1302_v47, %v5800_v16  ;;  %v4147_v54 = vmul.f32 -1.442695, %v4368_v51  ;;  %v4370_v55 = vadd.f32 %v1345_v48, %v5809_v32  ;;  %v6013_v51 = vld [vmem:[%s7216_s2 + $0x2c] ss:$16 sps:$4 sm:$0xff]  }
 0x44f   :  { %4886 = vpow2.f32 %v4143_v45  ;;  %v4144_v34 = vmul.f32 -1.442695, %v4337_v46 }
 0x450   :  { %4888 = vpow2.f32 %v4145_v49  ;;  %v4146_v50 = vmul.f32 -1.442695, %v4338_v33  ;;  %v4148_v23 = vmul.f32 -1.442695, %v4370_v55  ;;  %v6033_v55 = vld [vmem:[%s7216_s2 + $0x44] ss:$16 sps:$4 sm:$0xff]  }
 0x451   :  { %4890 = vpow2.f32 %v4144_v34  ;;  %v6001_v34 = vld [vmem:[%s7216_s2 + $0x8] ss:$16 sps:$4 sm:$0xff]  }
 0x452   :  { %4892 = vpow2.f32 %v4146_v50  ;;  %v6007_v50 = vld [vmem:[%s7216_s2 + $0x24] ss:$16 sps:$4 sm:$0xff]  }
 0x453   :  { %4894 = vtanh.f32 %v4367_v53  ;;  %v6021_v53 = vld [vmem:[%s7216_s2 + $0x20] ss:$16 sps:$4 sm:$0xff]  }
 0x454   :  { %4896 = vpow2.f32 %v4147_v54  ;;  %v6027_v54 = vld [vmem:[%s7216_s2 + $0x28] ss:$16 sps:$4 sm:$0xff]  }
 0x455   :  { %4898 = vtanh.f32 %v4369_v10  ;;  %v6039_v10 = vld [vmem:[%s7216_s2 + $0x4c] ss:$16 sps:$4 sm:$0xff]  }
 0x459   :  { %v4887_v30 = vpop.eup %4886 }
 0x45a   :  { %v4889_v25 = vpop.eup %4888  ;;  %v1362_v17 = vadd.f32 1.0, %v4887_v30  ;;  %v6045_v30 = vld [vmem:[%s7216_s2 + $0x40] ss:$16 sps:$4 sm:$0xff]  }
 0x45b   :  { %v1374_v21 = vadd.f32 1.0, %v4889_v25  ;;  %v4891_v13 = vpop.eup %4890  ;;  %v6051_v25 = vld [vmem:[%s7216_s2 + $0x48] ss:$16 sps:$4 sm:$0xff]  }
 0x45c   :  { %4900 = vrcp.f32 %v1362_v17  ;;  %v1363_v22 = vadd.f32 1.0, %v4891_v13  ;;  %v4893_v27 = vpop.eup %4892  ;;  %v6057_v17 = vld [vmem:[%s7216_s2 + $0x64] ss:$16 sps:$4 sm:$0xff]   ;;  %v6075_v13 = vld [vmem:[%s7216_s2 + $0x68] ss:$16 sps:$4 sm:$0xff]  }
 0x45d   :  { %4902 = vrcp.f32 %v1374_v21  ;;  %v1375_v18 = vadd.f32 1.0, %v4893_v27  ;;  %v4895_v52 = vpop.eup %4894  ;;  %v6069_v21 = vld [vmem:[%s7216_s2 + $0x60] ss:$16 sps:$4 sm:$0xff]   ;;  %v6087_v27 = vld [vmem:[%s7216_s2 + $0x8c] ss:$16 sps:$4 sm:$0xff]  }
 0x45e   :  { %4904 = vpow2.f32 %v4148_v23  ;;  %v4897_v43 = vpop.eup %4896  ;;  %v6063_v23 = vld [vmem:[%s7216_s2 + $0x6c] ss:$16 sps:$4 sm:$0xff]  }
 0x45f   :  { %4906 = vrcp.f32 %v1363_v22  ;;  %v4899_v26 = vpop.eup %4898  ;;  %v1388_v37 = vadd.f32 1.0, %v4897_v43  ;;  %v6081_v22 = vld [vmem:[%s7216_s2 + $0x84] ss:$16 sps:$4 sm:$0xff]  }
 0x460   :  { %4908 = vrcp.f32 %v1375_v18  ;;  %v6093_v18 = vld [vmem:[%s7216_s2 + $0x80] ss:$16 sps:$4 sm:$0xff]  }
 0x461   :  { %4910 = vrcp.f32 %v1388_v37 }
 0x466   :  { %v4901_v35 = vpop.eup %4900 }
 0x467   :  { %v4903_v31 = vpop.eup %4902  ;;  %v1396_v6 = vmul.f32 %v4901_v35, %v4895_v52  ;;  %v6100_v52 = vld [vmem:[%s7216_s2 + $0xa4] ss:$16 sps:$4 sm:$0xff]  }
 0x468   :  { %v4905_v7 = vpop.eup %4904  ;;  %v1394_v20 = vmul.f32 %v4903_v31, %v5927_v29 }
 0x469   :  { %v4907_v36 = vpop.eup %4906  ;;  %v1389_v41 = vadd.f32 1.0, %v4905_v7 }
 0x46a   :  { %v5981_v38 = vadd.f32 %v1396_v6, %v1394_v20  ;;  %v1397_v39 = vmul.f32 %v4907_v36, %v4899_v26  ;;  %v4909_v40 = vpop.eup %4908 }
 0x46b   :  { %v1395_v42 = vmul.f32 %v4909_v40, %v5931_v9  ;;  %v4911_v45 = vpop.eup %4910  ;;  %v5995_v9 = vld [vmem:[%s7216_s2] ss:$16 sps:$4 sm:$0xff]  }
 0x46c   :  { %4912 = vtanh.f32 %v5981_v38 }
 0x46d   :  { %v5985_v44 = vadd.f32 %v1397_v39, %v1395_v42  ;;  %4914 = vrcp.f32 %v1389_v41 }
 0x46f   :  { %4916 = vtanh.f32 %v5985_v44 }
 0x476   :  { %v4913_v46 = vpop.eup %4912 }
 0x477   :  { %v4915_v29 = vpop.eup %4914  ;;  %v1402_v48 = vmul.f32 %v4913_v46, %v4911_v45 }
 0x479   :  { %v4917_v47 = vpop.eup %4916 }
 0x47a   :  { %v1403_v49 = vmul.f32 %v4917_v47, %v4915_v29 }
 0x47c   :  { %v5988_v33 = vpack.c.bf16 %v1403_v49, %v1402_v48 }
 0x47e   :  { %1449 = vmatmul.mubr.bf16.vlgmr.msra.gmra.mrb[16].mxu0 %v5988_v33  ;;  %1492 = vmatmul.mubr.bf16.vlgmr.msra.gmra.mrb[16].mxu1 %v5988_v33 }
 0x47f   :  { %1571 = vmatpush1.bf16.msra.mxu0 %v5995_v9  ;;  %1614 = vmatpush1.bf16.msra.mxu1 %v6001_v34 }
 0x480   :  { %1572 = vmatprep.subr.bf16.mxu0 %v6007_v50  ;;  %1615 = vmatprep.subr.bf16.mxu1 %v6013_v51 }
 0x481   :  { %1602 = vmatprep.mubr.bf16.mxu0 %v5366_v1  ;;  %1645 = vmatprep.mubr.bf16.mxu1 %v5366_v1 }
 0x483   :  { %1573 = vmatpush1.bf16.msra.mxu0 %v6021_v53  ;;  %1616 = vmatpush1.bf16.msra.mxu1 %v6027_v54 }
 0x484   :  { %1574 = vmatprep.subr.bf16.mxu0 %v6033_v55  ;;  %1617 = vmatprep.subr.bf16.mxu1 %v6039_v10 }
 0x487   :  { %1575 = vmatpush1.bf16.msra.mxu0 %v6045_v30  ;;  %1618 = vmatpush1.bf16.msra.mxu1 %v6051_v25 }
 0x488   :  { %1576 = vmatprep.subr.bf16.mxu0 %v6057_v17  ;;  %1619 = vmatprep.subr.bf16.mxu1 %v6063_v23 }
 0x48b   :  { %1577 = vmatpush1.bf16.msra.mxu0 %v6069_v21  ;;  %1620 = vmatpush1.bf16.msra.mxu1 %v6075_v13 }
 0x48c   :  { %1578 = vmatprep.subr.bf16.mxu0 %v6081_v22  ;;  %1621 = vmatprep.subr.bf16.mxu1 %v6087_v27 }
 0x48f   :  { %1579 = vmatpush1.bf16.msra.mxu0 %v6093_v18  ;;  %1622 = vmatpush1.bf16.msra.mxu1 %v5650_v56  ;;  %v6117_v56 = vld [vmem:[%s7216_s2 + $0x4] ss:$16 sps:$4 sm:$0xff]  }
 0x490   :  { %1580 = vmatprep.subr.bf16.mxu0 %v6100_v52  ;;  %1623 = vmatprep.subr.bf16.mxu1 %v5655_v57  ;;  %v6123_v57 = vld [vmem:[%s7216_s2 + $0xc] ss:$16 sps:$4 sm:$0xff]  }
 0x493   :  { %1581 = vmatpush1.bf16.msra.mxu0 %v5663_v58  ;;  %1624 = vmatpush1.bf16.msra.mxu1 %v5676_v60 }
 0x494   :  { %1582 = vmatprep.subr.bf16.mxu0 %v5670_v59  ;;  %1625 = vmatprep.subr.bf16.mxu1 %v5691_v63 }
 0x497   :  { %1583 = vmatpush1.bf16.msra.mxu0 %v5686_v62  ;;  %1626 = vmatpush1.bf16.msra.mxu1 %v5703_v2 }
 0x498   :  { %1584 = vmatprep.subr.bf16.mxu0 %v5698_v0  ;;  %1627 = vmatprep.subr.bf16.mxu1 %v5708_v3 }
 0x49b   :  { %1585 = vmatpush1.bf16.msra.mxu0 %v5717_v4  ;;  %1628 = vmatpush1.bf16.msra.mxu1 %v5724_v5 }
 0x49c   :  { %1724 = vmatprep.subr.bf16.mxu0 %v6117_v56  ;;  %1767 = vmatprep.subr.bf16.mxu1 %v6123_v57 }
 0x551   :  { %v1450_v58 = vpop.f32.mrb[16].mxu0  ;;  %v1493_v59 = vpop.f32.mrb[16].mxu1 }
 0x552   :  { %v4339_v60 = vadd.f32 %v1450_v58, %v5796_v15  ;;  %v1452_v62 = vpop.f32.mrb[17].mxu0  ;;  %v1495_v63 = vpop.f32.mrb[17].mxu1  ;;  %v4371_v36 = vadd.f32 %v1493_v59, %v5814_v61 }
 0x553   :  { %v4340_v0 = vadd.f32 %v1452_v62, %v5800_v16  ;;  %v1454_v2 = vpop.f32.mrb[18].mxu0  ;;  %v1497_v3 = vpop.f32.mrb[18].mxu1  ;;  %v4372_v20 = vadd.f32 %v1495_v63, %v5809_v32 }
 0x554   :  { %v4149_v4 = vmul.f32 -1.442695, %v4339_v60  ;;  %v4341_v5 = vadd.f32 %v1454_v2, %v5796_v15  ;;  %v1456_v43 = vpop.f32.mrb[19].mxu0  ;;  %v1499_v26 = vpop.f32.mrb[19].mxu1  ;;  %v4373_v40 = vadd.f32 %v1497_v3, %v5814_v61 }
 0x555   :  { %v4151_v35 = vmul.f32 -1.442695, %v4340_v0  ;;  %v4342_v31 = vadd.f32 %v1456_v43, %v5800_v16  ;;  %v4153_v37 = vmul.f32 -1.442695, %v4372_v20  ;;  %v4374_v39 = vadd.f32 %v1499_v26, %v5809_v32 }
 0x556   :  { %4918 = vpow2.f32 %v4149_v4  ;;  %v4150_v6 = vmul.f32 -1.442695, %v4341_v5 }
 0x557   :  { %4920 = vpow2.f32 %v4151_v35  ;;  %v4152_v7 = vmul.f32 -1.442695, %v4342_v31  ;;  %v4154_v46 = vmul.f32 -1.442695, %v4374_v39 }
 0x558   :  { %4922 = vpow2.f32 %v4150_v6 }
 0x559   :  { %4924 = vpow2.f32 %v4152_v7 }
 0x55a   :  { %4926 = vtanh.f32 %v4371_v36 }
 0x55b   :  { %4928 = vpow2.f32 %v4153_v37 }
 0x55c   :  { %4930 = vtanh.f32 %v4373_v40 }
 0x560   :  { %v4919_v41 = vpop.eup %4918 }
 0x561   :  { %v4921_v42 = vpop.eup %4920  ;;  %v1516_v45 = vadd.f32 1.0, %v4919_v41 }
 0x562   :  { %v1528_v29 = vadd.f32 1.0, %v4921_v42  ;;  %v4923_v47 = vpop.eup %4922 }
 0x563   :  { %4932 = vrcp.f32 %v1516_v45  ;;  %v1517_v48 = vadd.f32 1.0, %v4923_v47  ;;  %v4925_v49 = vpop.eup %4924  ;;  %v6175_v45 = vld [vmem:[%s7216_s2 + $0xac] ss:$16 sps:$4 sm:$0xff]   ;;  %v6193_v47 = vld [vmem:[%s7216_s2 + $0xc4] ss:$16 sps:$4 sm:$0xff]  }
 0x564   :  { %4934 = vrcp.f32 %v1528_v29  ;;  %v1529_v58 = vadd.f32 1.0, %v4925_v49  ;;  %v4927_v59 = vpop.eup %4926  ;;  %v6187_v29 = vld [vmem:[%s7216_s2 + $0xa8] ss:$16 sps:$4 sm:$0xff]   ;;  %v6205_v49 = vld [vmem:[%s7216_s2 + $0xc0] ss:$16 sps:$4 sm:$0xff]  }
 0x565   :  { %4936 = vpow2.f32 %v4154_v46  ;;  %v4929_v60 = vpop.eup %4928  ;;  %v6181_v46 = vld [vmem:[%s7216_s2 + $0xa0] ss:$16 sps:$4 sm:$0xff]  }
 0x566   :  { %4938 = vrcp.f32 %v1517_v48  ;;  %v4931_v62 = vpop.eup %4930  ;;  %v1542_v43 = vadd.f32 1.0, %v4929_v60  ;;  %v6199_v48 = vld [vmem:[%s7216_s2 + $0xcc] ss:$16 sps:$4 sm:$0xff]  }
 0x567   :  { %4940 = vrcp.f32 %v1529_v58  ;;  %v6211_v58 = vld [vmem:[%s7216_s2 + $0xc8] ss:$16 sps:$4 sm:$0xff]   ;;  %v6223_v60 = vld [vmem:[%s7216_s2 + $0xec] ss:$16 sps:$4 sm:$0xff]  }
 0x568   :  { %4942 = vrcp.f32 %v1542_v43 }
 0x56d   :  { %v4933_v63 = vpop.eup %4932 }
 0x56e   :  { %v4935_v0 = vpop.eup %4934  ;;  %v1550_v2 = vmul.f32 %v4933_v63, %v4927_v59  ;;  %v6217_v59 = vld [vmem:[%s7216_s2 + $0xe4] ss:$16 sps:$4 sm:$0xff]   ;;  %v6235_v63 = vld [vmem:[%s7216_s2 + $0xe8] ss:$16 sps:$4 sm:$0xff]  }
 0x56f   :  { %v4937_v3 = vpop.eup %4936  ;;  %v1548_v4 = vmul.f32 %v4935_v0, %v5981_v38 }
 0x570   :  { %v4939_v5 = vpop.eup %4938  ;;  %v1543_v6 = vadd.f32 1.0, %v4937_v3 }
 0x571   :  { %v6135_v26 = vadd.f32 %v1550_v2, %v1548_v4  ;;  %v1551_v35 = vmul.f32 %v4939_v5, %v4931_v62  ;;  %v4941_v31 = vpop.eup %4940  ;;  %v6229_v62 = vld [vmem:[%s7216_s2 + $0xe0] ss:$16 sps:$4 sm:$0xff]  }
 0x572   :  { %v1549_v7 = vmul.f32 %v4941_v31, %v5985_v44  ;;  %v4943_v36 = vpop.eup %4942  ;;  %v6168_v44 = vld [vmem:[%s7216_s2 + $0x88] ss:$16 sps:$4 sm:$0xff]  }
 0x573   :  { %4944 = vtanh.f32 %v6135_v26 }
 0x574   :  { %v6139_v20 = vadd.f32 %v1551_v35, %v1549_v7  ;;  %4946 = vrcp.f32 %v1543_v6 }
 0x576   :  { %4948 = vtanh.f32 %v6139_v20 }
 0x57d   :  { %v4945_v37 = vpop.eup %4944 }
 0x57e   :  { %v4947_v38 = vpop.eup %4946  ;;  %v1556_v40 = vmul.f32 %v4945_v37, %v4943_v36 }
 0x580   :  { %v4949_v39 = vpop.eup %4948 }
 0x581   :  { %v1557_v41 = vmul.f32 %v4949_v39, %v4947_v38 }
 0x583   :  { %v6142_v42 = vpack.c.bf16 %v1557_v41, %v1556_v40 }
 0x585   :  { %1603 = vmatmul.mubr.bf16.vlgmr.msra.gmra.mrb[20].mxu0 %v6142_v42  ;;  %1646 = vmatmul.mubr.bf16.vlgmr.msra.gmra.mrb[20].mxu1 %v6142_v42 }
 0x586   :  { %1725 = vmatpush1.bf16.msra.mxu0 %v5995_v9  ;;  %1768 = vmatpush1.bf16.msra.mxu1 %v6001_v34 }
 0x587   :  { %1726 = vmatprep.subr.bf16.mxu0 %v6007_v50  ;;  %1769 = vmatprep.subr.bf16.mxu1 %v6013_v51 }
 0x588   :  { %1756 = vmatprep.mubr.bf16.mxu0 %v5366_v1  ;;  %1799 = vmatprep.mubr.bf16.mxu1 %v5366_v1 }
 0x58a   :  { %1727 = vmatpush1.bf16.msra.mxu0 %v6021_v53  ;;  %1770 = vmatpush1.bf16.msra.mxu1 %v6027_v54 }
 0x58b   :  { %1728 = vmatprep.subr.bf16.mxu0 %v6033_v55  ;;  %1771 = vmatprep.subr.bf16.mxu1 %v6039_v10 }
 0x58e   :  { %1729 = vmatpush1.bf16.msra.mxu0 %v6045_v30  ;;  %1772 = vmatpush1.bf16.msra.mxu1 %v6051_v25 }
 0x58f   :  { %1730 = vmatprep.subr.bf16.mxu0 %v6057_v17  ;;  %1773 = vmatprep.subr.bf16.mxu1 %v6063_v23 }
 0x592   :  { %1731 = vmatpush1.bf16.msra.mxu0 %v6069_v21  ;;  %1774 = vmatpush1.bf16.msra.mxu1 %v6075_v13 }
 0x593   :  { %1732 = vmatprep.subr.bf16.mxu0 %v6081_v22  ;;  %1775 = vmatprep.subr.bf16.mxu1 %v6087_v27 }
 0x596   :  { %1733 = vmatpush1.bf16.msra.mxu0 %v6093_v18  ;;  %1776 = vmatpush1.bf16.msra.mxu1 %v6168_v44 }
 0x597   :  { %1734 = vmatprep.subr.bf16.mxu0 %v6100_v52  ;;  %1777 = vmatprep.subr.bf16.mxu1 %v6175_v45 }
 0x59a   :  { %1735 = vmatpush1.bf16.msra.mxu0 %v6181_v46  ;;  %1778 = vmatpush1.bf16.msra.mxu1 %v6187_v29 }
 0x59b   :  { %1736 = vmatprep.subr.bf16.mxu0 %v6193_v47  ;;  %1779 = vmatprep.subr.bf16.mxu1 %v6199_v48 }
 0x59e   :  { %1737 = vmatpush1.bf16.msra.mxu0 %v6205_v49  ;;  %1780 = vmatpush1.bf16.msra.mxu1 %v6211_v58 }
 0x59f   :  { %1738 = vmatprep.subr.bf16.mxu0 %v6217_v59  ;;  %1781 = vmatprep.subr.bf16.mxu1 %v6223_v60 }
 0x5a2   :  { %1739 = vmatpush1.bf16.msra.mxu0 %v6229_v62  ;;  %1782 = vmatpush1.bf16.msra.mxu1 %v6235_v63 }
 0x5a3   :  { %1878 = vmatprep.subr.bf16.mxu0 %v6117_v56  ;;  %1921 = vmatprep.subr.bf16.mxu1 %v6123_v57 }
 0x658   :  { %v1604_v0 = vpop.f32.mrb[20].mxu0  ;;  %v1647_v2 = vpop.f32.mrb[20].mxu1 }
 0x659   :  { %v4343_v3 = vadd.f32 %v1604_v0, %v5796_v15  ;;  %v1606_v4 = vpop.f32.mrb[21].mxu0  ;;  %v1649_v5 = vpop.f32.mrb[21].mxu1  ;;  %v4375_v41 = vadd.f32 %v1647_v2, %v5814_v61 }
 0x65a   :  { %v4344_v43 = vadd.f32 %v1606_v4, %v5800_v16  ;;  %v1608_v35 = vpop.f32.mrb[22].mxu0  ;;  %v1651_v31 = vpop.f32.mrb[22].mxu1  ;;  %v4376_v40 = vadd.f32 %v1649_v5, %v5809_v32 }
 0x65b   :  { %v4155_v6 = vmul.f32 -1.442695, %v4343_v3  ;;  %v4345_v7 = vadd.f32 %v1608_v35, %v5796_v15  ;;  %v1610_v36 = vpop.f32.mrb[23].mxu0  ;;  %v1653_v37 = vpop.f32.mrb[23].mxu1  ;;  %v4377_v4 = vadd.f32 %v1651_v31, %v5814_v61 }
 0x65c   :  { %v4157_v38 = vmul.f32 -1.442695, %v4344_v43  ;;  %v4346_v56 = vadd.f32 %v1610_v36, %v5800_v16  ;;  %v4159_v0 = vmul.f32 -1.442695, %v4376_v40  ;;  %v4378_v3 = vadd.f32 %v1653_v37, %v5809_v32 }
 0x65d   :  { %4950 = vpow2.f32 %v4155_v6  ;;  %v4156_v57 = vmul.f32 -1.442695, %v4345_v7 }
 0x65e   :  { %4952 = vpow2.f32 %v4157_v38  ;;  %v4158_v39 = vmul.f32 -1.442695, %v4346_v56  ;;  %v4160_v6 = vmul.f32 -1.442695, %v4378_v3 }
 0x65f   :  { %4954 = vpow2.f32 %v4156_v57 }
 0x660   :  { %4956 = vpow2.f32 %v4158_v39 }
 0x661   :  { %4958 = vtanh.f32 %v4375_v41 }
 0x662   :  { %4960 = vpow2.f32 %v4159_v0 }
 0x663   :  { %4962 = vtanh.f32 %v4377_v4 }
 0x667   :  { %v4951_v35 = vpop.eup %4950 }
 0x668   :  { %v4953_v43 = vpop.eup %4952  ;;  %v1670_v19 = vadd.f32 1.0, %v4951_v35 }
 0x669   :  { %v1682_v7 = vadd.f32 1.0, %v4953_v43  ;;  %v4955_v36 = vpop.eup %4954 }
 0x66a   :  { %4964 = vrcp.f32 %v1670_v19  ;;  %v1671_v5 = vadd.f32 1.0, %v4955_v36  ;;  %v4957_v38 = vpop.eup %4956 }
 0x66b   :  { %4966 = vrcp.f32 %v1682_v7  ;;  %v1683_v2 = vadd.f32 1.0, %v4957_v38  ;;  %v4959_v37 = vpop.eup %4958 }
 0x66c   :  { %4968 = vpow2.f32 %v4160_v6  ;;  %v4961_v56 = vpop.eup %4960 }
 0x66d   :  { %4970 = vrcp.f32 %v1671_v5  ;;  %v4963_v31 = vpop.eup %4962  ;;  %v1696_v4 = vadd.f32 1.0, %v4961_v56 }
 0x66e   :  { %4972 = vrcp.f32 %v1683_v2 }
 0x66f   :  { %4974 = vrcp.f32 %v1696_v4 }
 0x674   :  { %v4965_v57 = vpop.eup %4964 }
 0x675   :  { %v4967_v39 = vpop.eup %4966  ;;  %v1704_v40 = vmul.f32 %v4965_v57, %v4959_v37 }
 0x676   :  { %v4969_v41 = vpop.eup %4968  ;;  %v1702_v0 = vmul.f32 %v4967_v39, %v6135_v26 }
 0x677   :  { %v4971_v3 = vpop.eup %4970  ;;  %v1697_v7 = vadd.f32 1.0, %v4969_v41 }
 0x678   :  { %v6249_v35 = vadd.f32 %v1704_v40, %v1702_v0  ;;  %v1705_v19 = vmul.f32 %v4971_v3, %v4963_v31  ;;  %v4973_v43 = vpop.eup %4972 }
 0x679   :  { %v1703_v6 = vmul.f32 %v4973_v43, %v6139_v20  ;;  %v4975_v5 = vpop.eup %4974 }
 0x67a   :  { %4976 = vtanh.f32 %v6249_v35 }
 0x67b   :  { %v6253_v36 = vadd.f32 %v1705_v19, %v1703_v6  ;;  %4978 = vrcp.f32 %v1697_v7 }
 0x67d   :  { %4980 = vtanh.f32 %v6253_v36 }
 0x684   :  { %v4977_v38 = vpop.eup %4976 }
 0x685   :  { %v4979_v26 = vpop.eup %4978  ;;  %v1710_v37 = vmul.f32 %v4977_v38, %v4975_v5 }
 0x687   :  { %v4981_v2 = vpop.eup %4980 }
 0x688   :  { %v1711_v56 = vmul.f32 %v4981_v2, %v4979_v26 }
 0x68a   :  { %v6256_v57 = vpack.c.bf16 %v1711_v56, %v1710_v37 }
 0x68c   :  { %1757 = vmatmul.mubr.bf16.vlgmr.msra.gmra.mrb[24].mxu0 %v6256_v57  ;;  %1800 = vmatmul.mubr.bf16.vlgmr.msra.gmra.mrb[24].mxu1 %v6256_v57 }
 0x68d   :  { %1879 = vmatpush1.bf16.msra.mxu0 %v5995_v9  ;;  %1922 = vmatpush1.bf16.msra.mxu1 %v6001_v34  ;;  %v4688_v9 = vld [vmem:[%s7218_s4 + $0x4] ss:$16 sps:$4 sm:$0xff]   ;;  %v4691_v34 = vld [vmem:[%s7218_s4 + $0xc] ss:$16 sps:$4 sm:$0xff]  }
 0x68e   :  { %1880 = vmatprep.subr.bf16.mxu0 %v6007_v50  ;;  %1923 = vmatprep.subr.bf16.mxu1 %v6013_v51 }
 0x68f   :  { %1910 = vmatprep.mubr.bf16.mxu0 %v5366_v1  ;;  %1953 = vmatprep.mubr.bf16.mxu1 %v5366_v1 }
 0x691   :  { %1881 = vmatpush1.bf16.msra.mxu0 %v6021_v53  ;;  %1924 = vmatpush1.bf16.msra.mxu1 %v6027_v54 }
 0x692   :  { %1882 = vmatprep.subr.bf16.mxu0 %v6033_v55  ;;  %1925 = vmatprep.subr.bf16.mxu1 %v6039_v10 }
 0x695   :  { %1883 = vmatpush1.bf16.msra.mxu0 %v6045_v30  ;;  %1926 = vmatpush1.bf16.msra.mxu1 %v6051_v25 }
 0x696   :  { %1884 = vmatprep.subr.bf16.mxu0 %v6057_v17  ;;  %1927 = vmatprep.subr.bf16.mxu1 %v6063_v23 }
 0x699   :  { %1885 = vmatpush1.bf16.msra.mxu0 %v6069_v21  ;;  %1928 = vmatpush1.bf16.msra.mxu1 %v6075_v13 }
 0x69a   :  { %1886 = vmatprep.subr.bf16.mxu0 %v6081_v22  ;;  %1929 = vmatprep.subr.bf16.mxu1 %v6087_v27 }
 0x69d   :  { %1887 = vmatpush1.bf16.msra.mxu0 %v6093_v18  ;;  %1930 = vmatpush1.bf16.msra.mxu1 %v6168_v44 }
 0x69e   :  { %1888 = vmatprep.subr.bf16.mxu0 %v6100_v52  ;;  %1931 = vmatprep.subr.bf16.mxu1 %v6175_v45 }
 0x6a1   :  { %1889 = vmatpush1.bf16.msra.mxu0 %v6181_v46  ;;  %1932 = vmatpush1.bf16.msra.mxu1 %v6187_v29 }
 0x6a2   :  { %1890 = vmatprep.subr.bf16.mxu0 %v6193_v47  ;;  %1933 = vmatprep.subr.bf16.mxu1 %v6199_v48 }
 0x6a5   :  { %1891 = vmatpush1.bf16.msra.mxu0 %v6205_v49  ;;  %1934 = vmatpush1.bf16.msra.mxu1 %v6211_v58 }
 0x6a6   :  { %1892 = vmatprep.subr.bf16.mxu0 %v6217_v59  ;;  %1935 = vmatprep.subr.bf16.mxu1 %v6223_v60 }
 0x6a9   :  { %1893 = vmatpush1.bf16.msra.mxu0 %v6229_v62  ;;  %1936 = vmatpush1.bf16.msra.mxu1 %v6235_v63 }
 0x6aa   :  { %2277 = vmatprep.subr.bf16.mxu0 %v4688_v9  ;;  %2390 = vmatprep.subr.bf16.mxu1 %v4691_v34 }
 0x75f   :  { %v1758_v50 = vpop.f32.mrb[24].mxu0  ;;  %v1801_v51 = vpop.f32.mrb[24].mxu1 }
 0x760   :  { %v4347_v53 = vadd.f32 %v1758_v50, %v5796_v15  ;;  %v1760_v54 = vpop.f32.mrb[25].mxu0  ;;  %v1803_v55 = vpop.f32.mrb[25].mxu1  ;;  %v4379_v44 = vadd.f32 %v1801_v51, %v5814_v61 }
 0x761   :  { %v4348_v10 = vadd.f32 %v1760_v54, %v5800_v16  ;;  %v1762_v30 = vpop.f32.mrb[26].mxu0  ;;  %v1805_v25 = vpop.f32.mrb[26].mxu1  ;;  %v4380_v20 = vadd.f32 %v1803_v55, %v5809_v32  ;;  %v4686_v54 = vld [vmem:[%s7218_s4] ss:$16 sps:$4 sm:$0xff]  }
 0x762   :  { %v4161_v17 = vmul.f32 -1.442695, %v4347_v53  ;;  %v4349_v23 = vadd.f32 %v1762_v30, %v5796_v15  ;;  %v1764_v21 = vpop.f32.mrb[27].mxu0  ;;  %v1807_v13 = vpop.f32.mrb[27].mxu1  ;;  %v4381_v29 = vadd.f32 %v1805_v25, %v5814_v61  ;;  %v4697_v30 = vld [vmem:[%s7218_s4 + $0x2c] ss:$16 sps:$4 sm:$0xff]  }
 0x763   :  { %v4163_v22 = vmul.f32 -1.442695, %v4348_v10  ;;  %v4350_v27 = vadd.f32 %v1764_v21, %v5800_v16  ;;  %v4165_v45 = vmul.f32 -1.442695, %v4380_v20  ;;  %v4382_v46 = vadd.f32 %v1807_v13, %v5809_v32  ;;  %v4694_v10 = vld [vmem:[%s7218_s4 + $0x24] ss:$16 sps:$4 sm:$0xff]  }
 0x764   :  { %4982 = vpow2.f32 %v4161_v17  ;;  %v4162_v18 = vmul.f32 -1.442695, %v4349_v23  ;;  %v4692_v25 = vld [vmem:[%s7218_s4 + $0x20] ss:$16 sps:$4 sm:$0xff]   ;;  %v4695_v17 = vld [vmem:[%s7218_s4 + $0x28] ss:$16 sps:$4 sm:$0xff]  }
 0x765   :  { %4984 = vpow2.f32 %v4163_v22  ;;  %v4164_v52 = vmul.f32 -1.442695, %v4350_v27  ;;  %v4166_v58 = vmul.f32 -1.442695, %v4382_v46  ;;  %v4700_v23 = vld [vmem:[%s7218_s4 + $0x44] ss:$16 sps:$4 sm:$0xff]  }
 0x766   :  { %4986 = vpow2.f32 %v4162_v18  ;;  %v4703_v21 = vld [vmem:[%s7218_s4 + $0x4c] ss:$16 sps:$4 sm:$0xff]   ;;  %v4698_v13 = vld [vmem:[%s7218_s4 + $0x40] ss:$16 sps:$4 sm:$0xff]   ;;  %v4701_v22 = vld [vmem:[%s7218_s4 + $0x48] ss:$16 sps:$4 sm:$0xff]  }
 0x767   :  { %4988 = vpow2.f32 %v4164_v52  ;;  %v4706_v27 = vld [vmem:[%s7218_s4 + $0x64] ss:$16 sps:$4 sm:$0xff]   ;;  %v4709_v18 = vld [vmem:[%s7218_s4 + $0x6c] ss:$16 sps:$4 sm:$0xff]   ;;  %v4704_v52 = vld [vmem:[%s7218_s4 + $0x60] ss:$16 sps:$4 sm:$0xff]  }
 0x768   :  { %4990 = vtanh.f32 %v4379_v44  ;;  %v4707_v20 = vld [vmem:[%s7218_s4 + $0x68] ss:$16 sps:$4 sm:$0xff]   ;;  %v4712_v44 = vld [vmem:[%s7218_s4 + $0x84] ss:$16 sps:$4 sm:$0xff]   ;;  %v4710_v46 = vld [vmem:[%s7218_s4 + $0x80] ss:$16 sps:$4 sm:$0xff]  }
 0x769   :  { %4992 = vpow2.f32 %v4165_v45  ;;  %v4715_v45 = vld [vmem:[%s7218_s4 + $0x8c] ss:$16 sps:$4 sm:$0xff]  }
 0x76a   :  { %4994 = vtanh.f32 %v4381_v29  ;;  %v4713_v29 = vld [vmem:[%s7218_s4 + $0x88] ss:$16 sps:$4 sm:$0xff]  }
 0x76e   :  { %v4983_v47 = vpop.eup %4982 }
 0x76f   :  { %v4985_v48 = vpop.eup %4984  ;;  %v1824_v49 = vadd.f32 1.0, %v4983_v47  ;;  %v4718_v47 = vld [vmem:[%s7218_s4 + $0xa4] ss:$16 sps:$4 sm:$0xff]  }
 0x770   :  { %v1836_v59 = vadd.f32 1.0, %v4985_v48  ;;  %v4987_v60 = vpop.eup %4986  ;;  %v4721_v48 = vld [vmem:[%s7218_s4 + $0xac] ss:$16 sps:$4 sm:$0xff]  }
 0x771   :  { %4996 = vrcp.f32 %v1824_v49  ;;  %v1825_v62 = vadd.f32 1.0, %v4987_v60  ;;  %v4989_v63 = vpop.eup %4988  ;;  %v4716_v49 = vld [vmem:[%s7218_s4 + $0xa0] ss:$16 sps:$4 sm:$0xff]   ;;  %v4727_v60 = vld [vmem:[%s7218_s4 + $0xcc] ss:$16 sps:$4 sm:$0xff]  }
 0x772   :  { %4998 = vrcp.f32 %v1836_v59  ;;  %v1837_v31 = vadd.f32 1.0, %v4989_v63  ;;  %v4991_v39 = vpop.eup %4990  ;;  %v4724_v59 = vld [vmem:[%s7218_s4 + $0xc4] ss:$16 sps:$4 sm:$0xff]   ;;  %v4725_v63 = vld [vmem:[%s7218_s4 + $0xc8] ss:$16 sps:$4 sm:$0xff]  }
 0x773   :  { %5000 = vpow2.f32 %v4166_v58  ;;  %v4993_v40 = vpop.eup %4992  ;;  %v4719_v58 = vld [vmem:[%s7218_s4 + $0xa8] ss:$16 sps:$4 sm:$0xff]  }
 0x774   :  { %5002 = vrcp.f32 %v1825_v62  ;;  %v4995_v41 = vpop.eup %4994  ;;  %v1850_v6 = vadd.f32 1.0, %v4993_v40  ;;  %v4722_v62 = vld [vmem:[%s7218_s4 + $0xc0] ss:$16 sps:$4 sm:$0xff]  }
 0x775   :  { %5004 = vrcp.f32 %v1837_v31  ;;  %v4730_v31 = vld [vmem:[%s7218_s4 + $0xe4] ss:$16 sps:$4 sm:$0xff]   ;;  %v4728_v40 = vld [vmem:[%s7218_s4 + $0xe0] ss:$16 sps:$4 sm:$0xff]  }
 0x776   :  { %5006 = vrcp.f32 %v1850_v6  ;;  %v6510_v6 = vld [vmem:[%s7219_s5 + $0x48] ss:$16 sps:$4 sm:$0xff]  }
 0x77b   :  { %v4997_v0 = vpop.eup %4996 }
 0x77c   :  { %v4999_v3 = vpop.eup %4998  ;;  %v1858_v4 = vmul.f32 %v4997_v0, %v4991_v39  ;;  %v4733_v39 = vld [vmem:[%s7218_s4 + $0xec] ss:$16 sps:$4 sm:$0xff]   ;;  %v6413_v0 = vld [vmem:[%s7219_s5 + $0x4] ss:$16 sps:$4 sm:$0xff]  }
 0x77d   :  { %v5001_v19 = vpop.eup %5000  ;;  %v1856_v43 = vmul.f32 %v4999_v3, %v6249_v35  ;;  %v6419_v3 = vld [vmem:[%s7219_s5] ss:$16 sps:$4 sm:$0xff]  }
 0x77e   :  { %v5003_v7 = vpop.eup %5002  ;;  %v1851_v2 = vadd.f32 1.0, %v5001_v19  ;;  %v6493_v19 = vld [vmem:[%s7219_s5 + $0x40] ss:$16 sps:$4 sm:$0xff]  }
 0x77f   :  { %v6307_v5 = vadd.f32 %v1858_v4, %v1856_v43  ;;  %v1859_v38 = vmul.f32 %v5003_v7, %v4995_v41  ;;  %v5005_v26 = vpop.eup %5004  ;;  %v4731_v41 = vld [vmem:[%s7218_s4 + $0xe8] ss:$16 sps:$4 sm:$0xff]   ;;  %v6498_v43 = vld [vmem:[%s7219_s5 + $0x4c] ss:$16 sps:$4 sm:$0xff]   ;;  %v6504_v7 = vld [vmem:[%s7219_s5 + $0x64] ss:$16 sps:$4 sm:$0xff]  }
 0x780   :  { %v1857_v37 = vmul.f32 %v5005_v26, %v6253_v36  ;;  %v5007_v9 = vpop.eup %5006  ;;  %v4689_v36 = vld [vmem:[%s7218_s4 + $0x8] ss:$16 sps:$4 sm:$0xff]   ;;  %v6522_v26 = vld [vmem:[%s7219_s5 + $0x60] ss:$16 sps:$4 sm:$0xff]  }
 0x781   :  { %5008 = vtanh.f32 %v6307_v5  ;;  %v6487_v4 = vld [vmem:[%s7219_s5 + $0x28] ss:$16 sps:$4 sm:$0xff]  }
 0x782   :  { %v6311_v56 = vadd.f32 %v1859_v38, %v1857_v37  ;;  %5010 = vrcp.f32 %v1851_v2  ;;  %v6516_v38 = vld [vmem:[%s7219_s5 + $0x6c] ss:$16 sps:$4 sm:$0xff]   ;;  %v6528_v2 = vld [vmem:[%s7219_s5 + $0x84] ss:$16 sps:$4 sm:$0xff]   ;;  %v6534_v37 = vld [vmem:[%s7219_s5 + $0x68] ss:$16 sps:$4 sm:$0xff]  }
 0x784   :  { %5012 = vtanh.f32 %v6311_v56 }
 0x78b   :  { %v5009_v34 = vpop.eup %5008 }
 0x78c   :  { %v5011_v35 = vpop.eup %5010  ;;  %v1864_v51 = vmul.f32 %v5009_v34, %v5007_v9  ;;  %v6540_v9 = vld [vmem:[%s7219_s5 + $0x8c] ss:$16 sps:$4 sm:$0xff]   ;;  %v6546_v34 = vld [vmem:[%s7219_s5 + $0x80] ss:$16 sps:$4 sm:$0xff]  }
 0x78e   :  { %v5013_v50 = vpop.eup %5012 }
 0x78f   :  { %v1865_v53 = vmul.f32 %v5013_v50, %v5011_v35  ;;  %v6552_v35 = vld [vmem:[%s7219_s5 + $0xa4] ss:$16 sps:$4 sm:$0xff]   ;;  %v6558_v50 = vld [vmem:[%s7219_s5 + $0x88] ss:$16 sps:$4 sm:$0xff]  }
 0x791   :  { %v6320_v55 = vpack.c.bf16 %v1865_v53, %v1864_v51  ;;  %v6564_v51 = vld [vmem:[%s7219_s5 + $0xac] ss:$16 sps:$4 sm:$0xff]   ;;  %v6570_v53 = vld [vmem:[%s7219_s5 + $0xa0] ss:$16 sps:$4 sm:$0xff]  }
 0x793   :  { %1911 = vmatmul.mubr.bf16.vlgmr.msra.gmra.mrb[28].mxu0 %v6320_v55  ;;  %1954 = vmatmul.mubr.bf16.vlgmr.msra.gmra.mrb[28].mxu1 %v6320_v55 }
 0x794   :  { %2278 = vmatpush1.bf16.msra.mxu0 %v4686_v54  ;;  %2391 = vmatpush1.bf16.msra.mxu1 %v4689_v36  ;;  %v6576_v54 = vld [vmem:[%s7219_s5 + $0xc4] ss:$16 sps:$4 sm:$0xff]   ;;  %v6582_v36 = vld [vmem:[%s7219_s5 + $0xa8] ss:$16 sps:$4 sm:$0xff]  }
 0x795   :  { %2279 = vmatprep.subr.bf16.mxu0 %v4694_v10  ;;  %2392 = vmatprep.subr.bf16.mxu1 %v4697_v30  ;;  %v6596_v10 = vld [vmem:[%s7219_s5 + $0xe4] ss:$16 sps:$4 sm:$0xff]   ;;  %v6601_v30 = vld [vmem:[%s7219_s5 + $0xcc] ss:$16 sps:$4 sm:$0xff]  }
 0x796   :  { %2309 = vmatprep.mubr.bf16.mxu0 %v5366_v1  ;;  %2422 = vmatprep.mubr.bf16.mxu1 %v5366_v1 }
 0x798   :  { %2280 = vmatpush1.bf16.msra.mxu0 %v4692_v25  ;;  %2393 = vmatpush1.bf16.msra.mxu1 %v4695_v17  ;;  %v6606_v25 = vld [vmem:[%s7219_s5 + $0xc8] ss:$16 sps:$4 sm:$0xff]   ;;  %v6611_v17 = vld [vmem:[%s7219_s5 + $0xec] ss:$16 sps:$4 sm:$0xff]  }
 0x799   :  { %2281 = vmatprep.subr.bf16.mxu0 %v4700_v23  ;;  %2394 = vmatprep.subr.bf16.mxu1 %v4703_v21  ;;  %v6618_v23 = vld [vmem:[%s7219_s5 + $0xe0] ss:$16 sps:$4 sm:$0xff]   ;;  %v6625_v21 = vld [vmem:[%s7219_s5 + $0xe8] ss:$16 sps:$4 sm:$0xff]  }
 0x79c   :  { %2282 = vmatpush1.bf16.msra.mxu0 %v4698_v13  ;;  %2395 = vmatpush1.bf16.msra.mxu1 %v4701_v22 }
 0x79d   :  { %2283 = vmatprep.subr.bf16.mxu0 %v4706_v27  ;;  %2396 = vmatprep.subr.bf16.mxu1 %v4709_v18 }
 0x7a0   :  { %2284 = vmatpush1.bf16.msra.mxu0 %v4704_v52  ;;  %2397 = vmatpush1.bf16.msra.mxu1 %v4707_v20 }
 0x7a1   :  { %2285 = vmatprep.subr.bf16.mxu0 %v4712_v44  ;;  %2398 = vmatprep.subr.bf16.mxu1 %v4715_v45 }
 0x7a4   :  { %2286 = vmatpush1.bf16.msra.mxu0 %v4710_v46  ;;  %2399 = vmatpush1.bf16.msra.mxu1 %v4713_v29 }
 0x7a5   :  { %2287 = vmatprep.subr.bf16.mxu0 %v4718_v47  ;;  %2400 = vmatprep.subr.bf16.mxu1 %v4721_v48 }
 0x7a8   :  { %2288 = vmatpush1.bf16.msra.mxu0 %v4716_v49  ;;  %2401 = vmatpush1.bf16.msra.mxu1 %v4719_v58 }
 0x7a9   :  { %2289 = vmatprep.subr.bf16.mxu0 %v4724_v59  ;;  %2402 = vmatprep.subr.bf16.mxu1 %v4727_v60 }
 0x7ac   :  { %2290 = vmatpush1.bf16.msra.mxu0 %v4722_v62  ;;  %2403 = vmatpush1.bf16.msra.mxu1 %v4725_v63 }
 0x7ad   :  { %2291 = vmatprep.subr.bf16.mxu0 %v4730_v31  ;;  %2404 = vmatprep.subr.bf16.mxu1 %v4733_v39 }
 0x7b0   :  { %2292 = vmatpush1.bf16.msra.mxu0 %v4728_v40  ;;  %2405 = vmatpush1.bf16.msra.mxu1 %v4731_v41 }
 0x7b1   :  { %2735 = vmatprep.subr.bf16.mxu0 %v6413_v0 }
 0x7b3   :  { %2310 = vmatmul.mubr.bf16.vlgmr.msra.gmra.mrb[32].mxu0 %v5826_v28  ;;  %2423 = vmatmul.mubr.bf16.vlgmr.msra.gmra.mrb[32].mxu1 %v5826_v28  ;;  %v6453_v28 = vld [vmem:[%s7219_s5 + $0xc] ss:$16 sps:$4 sm:$0xff]  }
 0x7b4   :  { %2319 = vmatprep.mubr.bf16.mxu0 %v5366_v1  ;;  %2432 = vmatprep.mubr.bf16.mxu1 %v5366_v1 }
 0x7b5   :  { %2736 = vmatpush1.bf16.msra.mxu0 %v6419_v3  ;;  %2778 = vmatprep.subr.bf16.mxu1 %v6453_v28 }
 0x7bb   :  { %2320 = vmatmul.mubr.bf16.gmra.mrb[36].mxu0 %v5880_v24  ;;  %2433 = vmatmul.mubr.bf16.gmra.mrb[36].mxu1 %v5880_v24  ;;  %v6458_v24 = vld [vmem:[%s7219_s5 + $0x8] ss:$16 sps:$4 sm:$0xff]  }
 0x7bc   :  { %2329 = vmatprep.mubr.bf16.mxu0 %v5366_v1  ;;  %2442 = vmatprep.mubr.bf16.mxu1 %v5366_v1 }
 0x7bd   :  { %2779 = vmatpush1.bf16.msra.mxu1 %v6458_v24 }
 0x7c3   :  { %2330 = vmatmul.mubr.bf16.gmra.mrb[40].mxu0 %v5934_v8  ;;  %2443 = vmatmul.mubr.bf16.gmra.mrb[40].mxu1 %v5934_v8  ;;  %v6465_v8 = vld [vmem:[%s7219_s5 + $0x24] ss:$16 sps:$4 sm:$0xff]  }
 0x7c4   :  { %2339 = vmatprep.mubr.bf16.mxu0 %v5366_v1  ;;  %2452 = vmatprep.mubr.bf16.mxu1 %v5366_v1 }
 0x7c5   :  { %2737 = vmatprep.subr.bf16.mxu0 %v6465_v8 }
 0x7cb   :  { %2340 = vmatmul.mubr.bf16.gmra.mrb[44].mxu0 %v5988_v33  ;;  %2453 = vmatmul.mubr.bf16.gmra.mrb[44].mxu1 %v5988_v33  ;;  %v6470_v33 = vld [vmem:[%s7219_s5 + $0x2c] ss:$16 sps:$4 sm:$0xff]  }
 0x7cc   :  { %2349 = vmatprep.mubr.bf16.mxu0 %v5366_v1  ;;  %2462 = vmatprep.mubr.bf16.mxu1 %v5366_v1 }
 0x7cd   :  { %2780 = vmatprep.subr.bf16.mxu1 %v6470_v33 }
 0x7ce   :  { %2781 = vmatpush1.bf16.msra.mxu1 %v6487_v4 }
 0x7cf   :  { %2782 = vmatprep.subr.bf16.mxu1 %v6498_v43 }
 0x7d2   :  { %2783 = vmatpush1.bf16.msra.mxu1 %v6510_v6 }
 0x7d3   :  { %2350 = vmatmul.mubr.bf16.gmra.mrb[48].mxu0 %v6142_v42  ;;  %2463 = vmatmul.mubr.bf16.gmra.mrb[48].mxu1 %v6142_v42  ;;  %v6475_v42 = vld [vmem:[%s7219_s5 + $0x20] ss:$16 sps:$4 sm:$0xff]  }
 0x7d4   :  { %2359 = vmatprep.mubr.bf16.mxu0 %v5366_v1  ;;  %2472 = vmatprep.mubr.bf16.mxu1 %v5366_v1 }
 0x7d5   :  { %2738 = vmatpush1.bf16.msra.mxu0 %v6475_v42  ;;  %2784 = vmatprep.subr.bf16.mxu1 %v6516_v38 }
 0x7d6   :  { %2785 = vmatpush1.bf16.msra.mxu1 %v6534_v37 }
 0x7d7   :  { %2786 = vmatprep.subr.bf16.mxu1 %v6540_v9 }
 0x7da   :  { %2787 = vmatpush1.bf16.msra.mxu1 %v6558_v50 }
 0x7db   :  { %2360 = vmatmul.mubr.bf16.gmra.mrb[52].mxu0 %v6256_v57  ;;  %2473 = vmatmul.mubr.bf16.gmra.mrb[52].mxu1 %v6256_v57  ;;  %v6480_v57 = vld [vmem:[%s7219_s5 + $0x44] ss:$16 sps:$4 sm:$0xff]  }
 0x7dc   :  { %2369 = vmatprep.mubr.bf16.mxu0 %v5366_v1  ;;  %2482 = vmatprep.mubr.bf16.mxu1 %v5366_v1 }
 0x7dd   :  { %2739 = vmatprep.subr.bf16.mxu0 %v6480_v57  ;;  %2788 = vmatprep.subr.bf16.mxu1 %v6564_v51 }
 0x7de   :  { %2740 = vmatpush1.bf16.msra.mxu0 %v6493_v19  ;;  %2789 = vmatpush1.bf16.msra.mxu1 %v6582_v36 }
 0x7df   :  { %2741 = vmatprep.subr.bf16.mxu0 %v6504_v7  ;;  %2790 = vmatprep.subr.bf16.mxu1 %v6601_v30 }
 0x7e2   :  { %2742 = vmatpush1.bf16.msra.mxu0 %v6522_v26  ;;  %2791 = vmatpush1.bf16.msra.mxu1 %v6606_v25 }
 0x7e3   :  { %2370 = vmatmul.mubr.bf16.gmra.mrb[56].mxu0 %v6320_v55  ;;  %2483 = vmatmul.mubr.bf16.gmra.mrb[56].mxu1 %v6320_v55  ;;  %v6589_v55 = vld [vmem:[%s7219_s5 + $0xc0] ss:$16 sps:$4 sm:$0xff]  }
 0x7e4   :  { %2379 = vmatprep.mubr.bf16.mxu0 %v5366_v1  ;;  %2492 = vmatprep.mubr.bf16.mxu1 %v5366_v1 }
 0x7e5   :  { %2743 = vmatprep.subr.bf16.mxu0 %v6528_v2  ;;  %2792 = vmatprep.subr.bf16.mxu1 %v6611_v17 }
 0x7e6   :  { %2744 = vmatpush1.bf16.msra.mxu0 %v6546_v34  ;;  %2793 = vmatpush1.bf16.msra.mxu1 %v6625_v21 }
 0x7e7   :  { %2745 = vmatprep.subr.bf16.mxu0 %v6552_v35  ;;  %2929 = vmatprep.subr.bf16.mxu1 %v6453_v28 }
 0x7ea   :  { %2746 = vmatpush1.bf16.msra.mxu0 %v6570_v53 }
 0x7eb   :  { %2747 = vmatprep.subr.bf16.mxu0 %v6576_v54 }
 0x7ee   :  { %2748 = vmatpush1.bf16.msra.mxu0 %v6589_v55 }
 0x7ef   :  { %2749 = vmatprep.subr.bf16.mxu0 %v6596_v10 }
 0x7f2   :  { %2750 = vmatpush1.bf16.msra.mxu0 %v6618_v23 }
 0x7f3   :  { %2886 = vmatprep.subr.bf16.mxu0 %v6413_v0 }
 0x866   :  { %v1912_v13 = vpop.f32.mrb[28].mxu0  ;;  %v1955_v22 = vpop.f32.mrb[28].mxu1 }
 0x867   :  { %v4351_v27 = vadd.f32 %v1912_v13, %v5796_v15  ;;  %v1914_v18 = vpop.f32.mrb[29].mxu0  ;;  %v1957_v52 = vpop.f32.mrb[29].mxu1  ;;  %v4383_v63 = vadd.f32 %v1955_v22, %v5814_v61 }
 0x868   :  { %v4352_v20 = vadd.f32 %v1914_v18, %v5800_v16  ;;  %v1916_v44 = vpop.f32.mrb[30].mxu0  ;;  %v1959_v45 = vpop.f32.mrb[30].mxu1  ;;  %v4384_v62 = vadd.f32 %v1957_v52, %v5809_v32 }
 0x869   :  { %v4167_v46 = vmul.f32 -1.442695, %v4351_v27  ;;  %v4353_v29 = vadd.f32 %v1916_v44, %v5796_v15  ;;  %v1918_v47 = vpop.f32.mrb[31].mxu0  ;;  %v1961_v48 = vpop.f32.mrb[31].mxu1  ;;  %v4385_v15 = vadd.f32 %v1959_v45, %v5814_v61 }
 0x86a   :  { %v4169_v49 = vmul.f32 -1.442695, %v4352_v20  ;;  %v4354_v58 = vadd.f32 %v1918_v47, %v5800_v16  ;;  %v4171_v31 = vmul.f32 -1.442695, %v4384_v62  ;;  %v4386_v39 = vadd.f32 %v1961_v48, %v5809_v32 }
 0x86b   :  { %5014 = vpow2.f32 %v4167_v46  ;;  %v4168_v59 = vmul.f32 -1.442695, %v4353_v29 }
 0x86c   :  { %5016 = vpow2.f32 %v4169_v49  ;;  %v4170_v60 = vmul.f32 -1.442695, %v4354_v58  ;;  %v4172_v16 = vmul.f32 -1.442695, %v4386_v39 }
 0x86d   :  { %5018 = vpow2.f32 %v4168_v59 }
 0x86e   :  { %5020 = vpow2.f32 %v4170_v60 }
 0x86f   :  { %5022 = vtanh.f32 %v4383_v63 }
 0x870   :  { %5024 = vpow2.f32 %v4171_v31 }
 0x871   :  { %5026 = vtanh.f32 %v4385_v15 }
 0x875   :  { %v5015_v40 = vpop.eup %5014 }
 0x876   :  { %v5017_v41 = vpop.eup %5016  ;;  %v1978_v13 = vadd.f32 1.0, %v5015_v40 }
 0x877   :  { %v1990_v27 = vadd.f32 1.0, %v5017_v41  ;;  %v5019_v18 = vpop.eup %5018 }
 0x878   :  { %5028 = vrcp.f32 %v1978_v13  ;;  %v1979_v52 = vadd.f32 1.0, %v5019_v18  ;;  %v5021_v20 = vpop.eup %5020 }
 0x879   :  { %5030 = vrcp.f32 %v1990_v27  ;;  %v1991_v22 = vadd.f32 1.0, %v5021_v20  ;;  %v5023_v32 = vpop.eup %5022 }
 0x87a   :  { %5032 = vpow2.f32 %v4172_v16  ;;  %v5025_v44 = vpop.eup %5024 }
 0x87b   :  { %5034 = vrcp.f32 %v1979_v52  ;;  %v5027_v61 = vpop.eup %5026  ;;  %v2004_v47 = vadd.f32 1.0, %v5025_v44 }
 0x87c   :  { %5036 = vrcp.f32 %v1991_v22 }
 0x87d   :  { %5038 = vrcp.f32 %v2004_v47 }
 0x882   :  { %v5029_v45 = vpop.eup %5028 }
 0x883   :  { %v5031_v46 = vpop.eup %5030  ;;  %v2012_v29 = vmul.f32 %v5029_v45, %v5023_v32 }
 0x884   :  { %v5033_v48 = vpop.eup %5032  ;;  %v2010_v49 = vmul.f32 %v5031_v46, %v6307_v5  ;;  %v2087_v5 = vld [vmem:[%s7220_s6] sm:$0xf] }
 0x885   :  { %v5035_v58 = vpop.eup %5034  ;;  %v2005_v63 = vadd.f32 1.0, %v5033_v48  ;;  %v6689_v52 = vrot.slane %v2087_v5, %v121_v14 }
 0x886   :  { %v2013_v59 = vmul.f32 %v5035_v58, %v5027_v61  ;;  %v2014_v60 = vadd.f32 %v2012_v29, %v2010_v49  ;;  %v5037_v62 = vpop.eup %5036 }
 0x887   :  { %v2011_v31 = vmul.f32 %v5037_v62, %v6311_v56  ;;  %v5039_v15 = vpop.eup %5038  ;;  %v6685_v56 = vrot.slane %v2087_v5, %v117_v12 }
 0x888   :  { %5040 = vtanh.f32 %v2014_v60 }
 0x889   :  { %v2015_v39 = vadd.f32 %v2013_v59, %v2011_v31  ;;  %5042 = vrcp.f32 %v2005_v63  ;;  %v7226_v59 = vsub.s32 3, %v5787_v11  ;;  %v7227_v31 = vsub.s32 2, %v5787_v11 }
 0x88b   :  { %5044 = vtanh.f32 %v2015_v39  ;;  %v6696_v14 = vrot.slane %v2087_v5, %v7226_v59  ;;  %v6701_v39 = vrot.slane %v2087_v5, %v7227_v31 }
 0x892   :  { %v5041_v40 = vpop.eup %5040 }
 0x893   :  { %v2018_v41 = vmul.f32 %v5041_v40, %v5039_v15  ;;  %v5043_v13 = vpop.eup %5042 }
 0x895   :  { %v5045_v16 = vpop.eup %5044 }
 0x896   :  { %v2019_v27 = vmul.f32 %v5045_v16, %v5043_v13 }
 0x898   :  { %v2020_v18 = vpack.c.bf16 %v2019_v27, %v2018_v41 }
 0x89a   :  { %2380 = vmatmul.mubr.bf16.gmra.mrb[60].mxu0 %v2020_v18  ;;  %2493 = vmatmul.mubr.bf16.gmra.mrb[60].mxu1 %v2020_v18 }
 0x89b   :  { %2767 = vmatprep.mubr.bf16.mxu0 %v5366_v1  ;;  %2810 = vmatprep.mubr.bf16.mxu1 %v5366_v1 }
 0x8a2   :  { %2768 = vmatmul.mubr.bf16.vlgmr.msra.gmra.mrb[32].mxu0 %v5366_v1  ;;  %2811 = vmatmul.mubr.bf16.vlgmr.msra.gmra.mrb[32].mxu1 %v5366_v1 }
 0x8a3   :  { %2887 = vmatpush1.bf16.msra.mxu0 %v6419_v3  ;;  %2930 = vmatpush1.bf16.msra.mxu1 %v6458_v24 }
 0x8a4   :  { %2888 = vmatprep.subr.bf16.mxu0 %v6465_v8  ;;  %2931 = vmatprep.subr.bf16.mxu1 %v6470_v33 }
 0x8a5   :  { %2918 = vmatprep.mubr.bf16.mxu0 %v5366_v1  ;;  %2961 = vmatprep.mubr.bf16.mxu1 %v5366_v1 }
 0x8a7   :  { %2889 = vmatpush1.bf16.msra.mxu0 %v6475_v42  ;;  %2932 = vmatpush1.bf16.msra.mxu1 %v6487_v4 }
 0x8a8   :  { %2890 = vmatprep.subr.bf16.mxu0 %v6480_v57  ;;  %2933 = vmatprep.subr.bf16.mxu1 %v6498_v43 }
 0x8ab   :  { %2891 = vmatpush1.bf16.msra.mxu0 %v6493_v19  ;;  %2934 = vmatpush1.bf16.msra.mxu1 %v6510_v6 }
 0x8ac   :  { %2892 = vmatprep.subr.bf16.mxu0 %v6504_v7  ;;  %2935 = vmatprep.subr.bf16.mxu1 %v6516_v38 }
 0x8af   :  { %2893 = vmatpush1.bf16.msra.mxu0 %v6522_v26  ;;  %2936 = vmatpush1.bf16.msra.mxu1 %v6534_v37 }
 0x8b0   :  { %2894 = vmatprep.subr.bf16.mxu0 %v6528_v2  ;;  %2937 = vmatprep.subr.bf16.mxu1 %v6540_v9 }
 0x8b3   :  { %2895 = vmatpush1.bf16.msra.mxu0 %v6546_v34  ;;  %2938 = vmatpush1.bf16.msra.mxu1 %v6558_v50 }
 0x8b4   :  { %2896 = vmatprep.subr.bf16.mxu0 %v6552_v35  ;;  %2939 = vmatprep.subr.bf16.mxu1 %v6564_v51 }
 0x8b7   :  { %2897 = vmatpush1.bf16.msra.mxu0 %v6570_v53  ;;  %2940 = vmatpush1.bf16.msra.mxu1 %v6582_v36 }
 0x8b8   :  { %2898 = vmatprep.subr.bf16.mxu0 %v6576_v54  ;;  %2941 = vmatprep.subr.bf16.mxu1 %v6601_v30 }
 0x8bb   :  { %2899 = vmatpush1.bf16.msra.mxu0 %v6589_v55  ;;  %2942 = vmatpush1.bf16.msra.mxu1 %v6606_v25 }
 0x8bc   :  { %2900 = vmatprep.subr.bf16.mxu0 %v6596_v10  ;;  %2943 = vmatprep.subr.bf16.mxu1 %v6611_v17 }
 0x8bf   :  { %2901 = vmatpush1.bf16.msra.mxu0 %v6618_v23  ;;  %2944 = vmatpush1.bf16.msra.mxu1 %v6625_v21 }
 0x8c0   :  { %3037 = vmatprep.subr.bf16.mxu0 %v6413_v0  ;;  %3080 = vmatprep.subr.bf16.mxu1 %v6453_v28 }
 0x975   :  { %v2769_v20 = vpop.f32.mrb[32].mxu0  ;;  %v2812_v22 = vpop.f32.mrb[32].mxu1 }
 0x976   :  { %v4387_v32 = vadd.f32 %v2769_v20, %v6685_v56  ;;  %v2771_v44 = vpop.f32.mrb[33].mxu0  ;;  %v2814_v61 = vpop.f32.mrb[33].mxu1  ;;  %v4419_v40 = vadd.f32 %v2812_v22, %v6701_v39 }
 0x977   :  { %v4388_v45 = vadd.f32 %v2771_v44, %v6689_v52  ;;  %v2773_v46 = vpop.f32.mrb[34].mxu0  ;;  %v2816_v29 = vpop.f32.mrb[34].mxu1  ;;  %v4420_v15 = vadd.f32 %v2814_v61, %v6696_v14 }
 0x978   :  { %v4237_v47 = vmul.f32 -1.442695, %v4387_v32  ;;  %v4389_v48 = vadd.f32 %v2773_v46, %v6685_v56  ;;  %v2775_v49 = vpop.f32.mrb[35].mxu0  ;;  %v2818_v12 = vpop.f32.mrb[35].mxu1  ;;  %v4421_v16 = vadd.f32 %v2816_v29, %v6701_v39 }
 0x979   :  { %v4239_v58 = vmul.f32 -1.442695, %v4388_v45  ;;  %v4390_v60 = vadd.f32 %v2775_v49, %v6689_v52  ;;  %v4241_v41 = vmul.f32 -1.442695, %v4420_v15  ;;  %v4422_v13 = vadd.f32 %v2818_v12, %v6696_v14 }
 0x97a   :  { %5046 = vpow2.f32 %v4237_v47  ;;  %v4238_v62 = vmul.f32 -1.442695, %v4389_v48 }
 0x97b   :  { %5048 = vpow2.f32 %v4239_v58  ;;  %v4240_v63 = vmul.f32 -1.442695, %v4390_v60  ;;  %v4242_v32 = vmul.f32 -1.442695, %v4422_v13 }
 0x97c   :  { %5050 = vpow2.f32 %v4238_v62 }
 0x97d   :  { %5052 = vpow2.f32 %v4240_v63 }
 0x97e   :  { %5054 = vtanh.f32 %v4419_v40 }
 0x97f   :  { %5056 = vpow2.f32 %v4241_v41 }
 0x980   :  { %5058 = vtanh.f32 %v4421_v16 }
 0x984   :  { %v5047_v27 = vpop.eup %5046 }
 0x985   :  { %v5049_v18 = vpop.eup %5048  ;;  %v2835_v20 = vadd.f32 1.0, %v5047_v27 }
 0x986   :  { %v2847_v11 = vadd.f32 1.0, %v5049_v18  ;;  %v5051_v5 = vpop.eup %5050 }
 0x987   :  { %5060 = vrcp.f32 %v2835_v20  ;;  %v2836_v44 = vadd.f32 1.0, %v5051_v5  ;;  %v5053_v61 = vpop.eup %5052 }
 0x988   :  { %5062 = vrcp.f32 %v2847_v11  ;;  %v2848_v22 = vadd.f32 1.0, %v5053_v61  ;;  %v5055_v45 = vpop.eup %5054 }
 0x989   :  { %5064 = vpow2.f32 %v4242_v32  ;;  %v5057_v46 = vpop.eup %5056 }
 0x98a   :  { %5066 = vrcp.f32 %v2836_v44  ;;  %v5059_v29 = vpop.eup %5058  ;;  %v2861_v60 = vadd.f32 1.0, %v5057_v46 }
 0x98b   :  { %5068 = vrcp.f32 %v2848_v22 }
 0x98c   :  { %5070 = vrcp.f32 %v2861_v60 }
 0x991   :  { %v5061_v47 = vpop.eup %5060 }
 0x992   :  { %v5063_v48 = vpop.eup %5062  ;;  %v2869_v49 = vmul.f32 %v5061_v47, %v5055_v45 }
 0x993   :  { %v5065_v12 = vpop.eup %5064  ;;  %v2867_v58 = vmul.f32 0.0, %v5063_v48 }
 0x994   :  { %v5067_v59 = vpop.eup %5066  ;;  %v2862_v15 = vadd.f32 1.0, %v5065_v12 }
 0x995   :  { %v6707_v62 = vadd.f32 %v2869_v49, %v2867_v58  ;;  %v2870_v63 = vmul.f32 %v5067_v59, %v5059_v29  ;;  %v5069_v31 = vpop.eup %5068 }
 0x996   :  { %v2868_v40 = vmul.f32 0.0, %v5069_v31  ;;  %v5071_v13 = vpop.eup %5070 }
 0x997   :  { %5072 = vtanh.f32 %v6707_v62 }
 0x998   :  { %v6710_v41 = vadd.f32 %v2870_v63, %v2868_v40  ;;  %5074 = vrcp.f32 %v2862_v15 }
 0x99a   :  { %5076 = vtanh.f32 %v6710_v41 }
 0x9a1   :  { %v5073_v16 = vpop.eup %5072 }
 0x9a2   :  { %v5075_v27 = vpop.eup %5074  ;;  %v2875_v20 = vmul.f32 %v5073_v16, %v5071_v13 }
 0x9a4   :  { %v5077_v18 = vpop.eup %5076 }
 0x9a5   :  { %v2876_v32 = vmul.f32 %v5077_v18, %v5075_v27 }
 0x9a7   :  { %v2885_v11 = vpack.c.bf16 %v2876_v32, %v2875_v20 }
 0x9a9   :  { %2919 = vmatmul.mubr.bf16.vlgmr.msra.gmra.mrb[36].mxu0 %v2885_v11  ;;  %2962 = vmatmul.mubr.bf16.vlgmr.msra.gmra.mrb[36].mxu1 %v2885_v11 }
 0x9aa   :  { %3038 = vmatpush1.bf16.msra.mxu0 %v6419_v3  ;;  %3081 = vmatpush1.bf16.msra.mxu1 %v6458_v24 }
 0x9ab   :  { %3039 = vmatprep.subr.bf16.mxu0 %v6465_v8  ;;  %3082 = vmatprep.subr.bf16.mxu1 %v6470_v33 }
 0x9ac   :  { %3069 = vmatprep.mubr.bf16.mxu0 %v5366_v1  ;;  %3112 = vmatprep.mubr.bf16.mxu1 %v5366_v1 }
 0x9ae   :  { %3040 = vmatpush1.bf16.msra.mxu0 %v6475_v42  ;;  %3083 = vmatpush1.bf16.msra.mxu1 %v6487_v4 }
 0x9af   :  { %3041 = vmatprep.subr.bf16.mxu0 %v6480_v57  ;;  %3084 = vmatprep.subr.bf16.mxu1 %v6498_v43 }
 0x9b2   :  { %3042 = vmatpush1.bf16.msra.mxu0 %v6493_v19  ;;  %3085 = vmatpush1.bf16.msra.mxu1 %v6510_v6 }
 0x9b3   :  { %3043 = vmatprep.subr.bf16.mxu0 %v6504_v7  ;;  %3086 = vmatprep.subr.bf16.mxu1 %v6516_v38 }
 0x9b6   :  { %3044 = vmatpush1.bf16.msra.mxu0 %v6522_v26  ;;  %3087 = vmatpush1.bf16.msra.mxu1 %v6534_v37 }
 0x9b7   :  { %3045 = vmatprep.subr.bf16.mxu0 %v6528_v2  ;;  %3088 = vmatprep.subr.bf16.mxu1 %v6540_v9 }
 0x9ba   :  { %3046 = vmatpush1.bf16.msra.mxu0 %v6546_v34  ;;  %3089 = vmatpush1.bf16.msra.mxu1 %v6558_v50 }
 0x9bb   :  { %3047 = vmatprep.subr.bf16.mxu0 %v6552_v35  ;;  %3090 = vmatprep.subr.bf16.mxu1 %v6564_v51 }
 0x9be   :  { %3048 = vmatpush1.bf16.msra.mxu0 %v6570_v53  ;;  %3091 = vmatpush1.bf16.msra.mxu1 %v6582_v36 }
 0x9bf   :  { %3049 = vmatprep.subr.bf16.mxu0 %v6576_v54  ;;  %3092 = vmatprep.subr.bf16.mxu1 %v6601_v30 }
 0x9c2   :  { %3050 = vmatpush1.bf16.msra.mxu0 %v6589_v55  ;;  %3093 = vmatpush1.bf16.msra.mxu1 %v6606_v25 }
 0x9c3   :  { %3051 = vmatprep.subr.bf16.mxu0 %v6596_v10  ;;  %3094 = vmatprep.subr.bf16.mxu1 %v6611_v17 }
 0x9c6   :  { %3052 = vmatpush1.bf16.msra.mxu0 %v6618_v23  ;;  %3095 = vmatpush1.bf16.msra.mxu1 %v6625_v21 }
 0x9c7   :  { %3188 = vmatprep.subr.bf16.mxu0 %v6413_v0  ;;  %3231 = vmatprep.subr.bf16.mxu1 %v6453_v28 }
 0xa7c   :  { %v2920_v5 = vpop.f32.mrb[36].mxu0  ;;  %v2963_v44 = vpop.f32.mrb[36].mxu1 }
 0xa7d   :  { %v4391_v61 = vadd.f32 %v2920_v5, %v6685_v56  ;;  %v2922_v22 = vpop.f32.mrb[37].mxu0  ;;  %v2965_v45 = vpop.f32.mrb[37].mxu1  ;;  %v4423_v40 = vadd.f32 %v2963_v44, %v6701_v39 }
 0xa7e   :  { %v4392_v46 = vadd.f32 %v2922_v22, %v6689_v52  ;;  %v2924_v29 = vpop.f32.mrb[38].mxu0  ;;  %v2967_v47 = vpop.f32.mrb[38].mxu1  ;;  %v4424_v15 = vadd.f32 %v2965_v45, %v6696_v14 }
 0xa7f   :  { %v4243_v48 = vmul.f32 -1.442695, %v4391_v61  ;;  %v4393_v49 = vadd.f32 %v2924_v29, %v6685_v56  ;;  %v2926_v12 = vpop.f32.mrb[39].mxu0  ;;  %v2969_v58 = vpop.f32.mrb[39].mxu1  ;;  %v4425_v27 = vadd.f32 %v2967_v47, %v6701_v39 }
 0xa80   :  { %v4245_v59 = vmul.f32 -1.442695, %v4392_v46  ;;  %v4394_v60 = vadd.f32 %v2926_v12, %v6689_v52  ;;  %v4247_v13 = vmul.f32 -1.442695, %v4424_v15  ;;  %v4426_v16 = vadd.f32 %v2969_v58, %v6696_v14 }
 0xa81   :  { %5078 = vpow2.f32 %v4243_v48  ;;  %v4244_v63 = vmul.f32 -1.442695, %v4393_v49 }
 0xa82   :  { %5080 = vpow2.f32 %v4245_v59  ;;  %v4246_v31 = vmul.f32 -1.442695, %v4394_v60  ;;  %v4248_v11 = vmul.f32 -1.442695, %v4426_v16 }
 0xa83   :  { %5082 = vpow2.f32 %v4244_v63 }
 0xa84   :  { %5084 = vpow2.f32 %v4246_v31 }
 0xa85   :  { %5086 = vtanh.f32 %v4423_v40 }
 0xa86   :  { %5088 = vpow2.f32 %v4247_v13 }
 0xa87   :  { %5090 = vtanh.f32 %v4425_v27 }
 0xa8b   :  { %v5079_v18 = vpop.eup %5078 }
 0xa8c   :  { %v5081_v20 = vpop.eup %5080  ;;  %v2986_v32 = vadd.f32 1.0, %v5079_v18 }
 0xa8d   :  { %v2998_v5 = vadd.f32 1.0, %v5081_v20  ;;  %v5083_v61 = vpop.eup %5082 }
 0xa8e   :  { %5092 = vrcp.f32 %v2986_v32  ;;  %v2987_v22 = vadd.f32 1.0, %v5083_v61  ;;  %v5085_v45 = vpop.eup %5084 }
 0xa8f   :  { %5094 = vrcp.f32 %v2998_v5  ;;  %v2999_v44 = vadd.f32 1.0, %v5085_v45  ;;  %v5087_v46 = vpop.eup %5086 }
 0xa90   :  { %5096 = vpow2.f32 %v4248_v11  ;;  %v5089_v29 = vpop.eup %5088 }
 0xa91   :  { %5098 = vrcp.f32 %v2987_v22  ;;  %v5091_v47 = vpop.eup %5090  ;;  %v3012_v63 = vadd.f32 1.0, %v5089_v29 }
 0xa92   :  { %5100 = vrcp.f32 %v2999_v44 }
 0xa93   :  { %5102 = vrcp.f32 %v3012_v63 }
 0xa98   :  { %v5093_v48 = vpop.eup %5092 }
 0xa99   :  { %v5095_v49 = vpop.eup %5094  ;;  %v3020_v12 = vmul.f32 %v5093_v48, %v5087_v46 }
 0xa9a   :  { %v5097_v58 = vpop.eup %5096  ;;  %v3018_v59 = vmul.f32 %v5095_v49, %v6707_v62 }
 0xa9b   :  { %v5099_v60 = vpop.eup %5098  ;;  %v3013_v13 = vadd.f32 1.0, %v5097_v58 }
 0xa9c   :  { %v6756_v31 = vadd.f32 %v3020_v12, %v3018_v59  ;;  %v3021_v15 = vmul.f32 %v5099_v60, %v5091_v47  ;;  %v5101_v40 = vpop.eup %5100 }
 0xa9d   :  { %v3019_v16 = vmul.f32 %v5101_v40, %v6710_v41  ;;  %v5103_v18 = vpop.eup %5102 }
 0xa9e   :  { %5104 = vtanh.f32 %v6756_v31 }
 0xa9f   :  { %v6760_v27 = vadd.f32 %v3021_v15, %v3019_v16  ;;  %5106 = vrcp.f32 %v3013_v13 }
 0xaa1   :  { %5108 = vtanh.f32 %v6760_v27 }
 0xaa8   :  { %v5105_v20 = vpop.eup %5104 }
 0xaa9   :  { %v5107_v62 = vpop.eup %5106  ;;  %v3026_v11 = vmul.f32 %v5105_v20, %v5103_v18 }
 0xaab   :  { %v5109_v32 = vpop.eup %5108 }
 0xaac   :  { %v3027_v5 = vmul.f32 %v5109_v32, %v5107_v62 }
 0xaae   :  { %v3036_v61 = vpack.c.bf16 %v3027_v5, %v3026_v11 }
 0xab0   :  { %3070 = vmatmul.mubr.bf16.vlgmr.msra.gmra.mrb[40].mxu0 %v3036_v61  ;;  %3113 = vmatmul.mubr.bf16.vlgmr.msra.gmra.mrb[40].mxu1 %v3036_v61 }
 0xab1   :  { %3189 = vmatpush1.bf16.msra.mxu0 %v6419_v3  ;;  %3232 = vmatpush1.bf16.msra.mxu1 %v6458_v24 }
 0xab2   :  { %3190 = vmatprep.subr.bf16.mxu0 %v6465_v8  ;;  %3233 = vmatprep.subr.bf16.mxu1 %v6470_v33 }
 0xab3   :  { %3220 = vmatprep.mubr.bf16.mxu0 %v5366_v1  ;;  %3263 = vmatprep.mubr.bf16.mxu1 %v5366_v1 }
 0xab5   :  { %3191 = vmatpush1.bf16.msra.mxu0 %v6475_v42  ;;  %3234 = vmatpush1.bf16.msra.mxu1 %v6487_v4 }
 0xab6   :  { %3192 = vmatprep.subr.bf16.mxu0 %v6480_v57  ;;  %3235 = vmatprep.subr.bf16.mxu1 %v6498_v43 }
 0xab9   :  { %3193 = vmatpush1.bf16.msra.mxu0 %v6493_v19  ;;  %3236 = vmatpush1.bf16.msra.mxu1 %v6510_v6 }
 0xaba   :  { %3194 = vmatprep.subr.bf16.mxu0 %v6504_v7  ;;  %3237 = vmatprep.subr.bf16.mxu1 %v6516_v38 }
 0xabd   :  { %3195 = vmatpush1.bf16.msra.mxu0 %v6522_v26  ;;  %3238 = vmatpush1.bf16.msra.mxu1 %v6534_v37 }
 0xabe   :  { %3196 = vmatprep.subr.bf16.mxu0 %v6528_v2  ;;  %3239 = vmatprep.subr.bf16.mxu1 %v6540_v9 }
 0xac1   :  { %3197 = vmatpush1.bf16.msra.mxu0 %v6546_v34  ;;  %3240 = vmatpush1.bf16.msra.mxu1 %v6558_v50 }
 0xac2   :  { %3198 = vmatprep.subr.bf16.mxu0 %v6552_v35  ;;  %3241 = vmatprep.subr.bf16.mxu1 %v6564_v51 }
 0xac5   :  { %3199 = vmatpush1.bf16.msra.mxu0 %v6570_v53  ;;  %3242 = vmatpush1.bf16.msra.mxu1 %v6582_v36 }
 0xac6   :  { %3200 = vmatprep.subr.bf16.mxu0 %v6576_v54  ;;  %3243 = vmatprep.subr.bf16.mxu1 %v6601_v30 }
 0xac9   :  { %3201 = vmatpush1.bf16.msra.mxu0 %v6589_v55  ;;  %3244 = vmatpush1.bf16.msra.mxu1 %v6606_v25 }
 0xaca   :  { %3202 = vmatprep.subr.bf16.mxu0 %v6596_v10  ;;  %3245 = vmatprep.subr.bf16.mxu1 %v6611_v17 }
 0xacd   :  { %3203 = vmatpush1.bf16.msra.mxu0 %v6618_v23  ;;  %3246 = vmatpush1.bf16.msra.mxu1 %v6625_v21 }
 0xace   :  { %3339 = vmatprep.subr.bf16.mxu0 %v6413_v0  ;;  %3382 = vmatprep.subr.bf16.mxu1 %v6453_v28 }
 0xb83   :  { %v3071_v41 = vpop.f32.mrb[40].mxu0  ;;  %v3114_v22 = vpop.f32.mrb[40].mxu1 }
 0xb84   :  { %v4395_v45 = vadd.f32 %v3071_v41, %v6685_v56  ;;  %v3073_v44 = vpop.f32.mrb[41].mxu0  ;;  %v3116_v46 = vpop.f32.mrb[41].mxu1  ;;  %v4427_v13 = vadd.f32 %v3114_v22, %v6701_v39 }
 0xb85   :  { %v4396_v29 = vadd.f32 %v3073_v44, %v6689_v52  ;;  %v3075_v47 = vpop.f32.mrb[42].mxu0  ;;  %v3118_v48 = vpop.f32.mrb[42].mxu1  ;;  %v4428_v40 = vadd.f32 %v3116_v46, %v6696_v14 }
 0xb86   :  { %v4249_v49 = vmul.f32 -1.442695, %v4395_v45  ;;  %v4397_v12 = vadd.f32 %v3075_v47, %v6685_v56  ;;  %v3077_v58 = vpop.f32.mrb[43].mxu0  ;;  %v3120_v59 = vpop.f32.mrb[43].mxu1  ;;  %v4429_v20 = vadd.f32 %v3118_v48, %v6701_v39 }
 0xb87   :  { %v4251_v60 = vmul.f32 -1.442695, %v4396_v29  ;;  %v4398_v0 = vadd.f32 %v3077_v58, %v6689_v52  ;;  %v4253_v16 = vmul.f32 -1.442695, %v4428_v40  ;;  %v4430_v18 = vadd.f32 %v3120_v59, %v6696_v14 }
 0xb88   :  { %5110 = vpow2.f32 %v4249_v49  ;;  %v4250_v63 = vmul.f32 -1.442695, %v4397_v12 }
 0xb89   :  { %5112 = vpow2.f32 %v4251_v60  ;;  %v4252_v15 = vmul.f32 -1.442695, %v4398_v0  ;;  %v4254_v5 = vmul.f32 -1.442695, %v4430_v18 }
 0xb8a   :  { %5114 = vpow2.f32 %v4250_v63 }
 0xb8b   :  { %5116 = vpow2.f32 %v4252_v15 }
 0xb8c   :  { %5118 = vtanh.f32 %v4427_v13 }
 0xb8d   :  { %5120 = vpow2.f32 %v4253_v16 }
 0xb8e   :  { %5122 = vtanh.f32 %v4429_v20 }
 0xb92   :  { %v5111_v62 = vpop.eup %5110 }
 0xb93   :  { %v5113_v32 = vpop.eup %5112  ;;  %v3137_v11 = vadd.f32 1.0, %v5111_v62 }
 0xb94   :  { %v3149_v61 = vadd.f32 1.0, %v5113_v32  ;;  %v5115_v41 = vpop.eup %5114 }
 0xb95   :  { %5124 = vrcp.f32 %v3137_v11  ;;  %v3138_v45 = vadd.f32 1.0, %v5115_v41  ;;  %v5117_v44 = vpop.eup %5116 }
 0xb96   :  { %5126 = vrcp.f32 %v3149_v61  ;;  %v3150_v22 = vadd.f32 1.0, %v5117_v44  ;;  %v5119_v46 = vpop.eup %5118 }
 0xb97   :  { %5128 = vpow2.f32 %v4254_v5  ;;  %v5121_v29 = vpop.eup %5120 }
 0xb98   :  { %5130 = vrcp.f32 %v3138_v45  ;;  %v5123_v47 = vpop.eup %5122  ;;  %v3163_v0 = vadd.f32 1.0, %v5121_v29 }
 0xb99   :  { %5132 = vrcp.f32 %v3150_v22 }
 0xb9a   :  { %5134 = vrcp.f32 %v3163_v0 }
 0xb9f   :  { %v5125_v48 = vpop.eup %5124 }
 0xba0   :  { %v5127_v49 = vpop.eup %5126  ;;  %v3171_v12 = vmul.f32 %v5125_v48, %v5119_v46 }
 0xba1   :  { %v5129_v58 = vpop.eup %5128  ;;  %v3169_v59 = vmul.f32 %v5127_v49, %v6756_v31 }
 0xba2   :  { %v5131_v60 = vpop.eup %5130  ;;  %v3164_v13 = vadd.f32 1.0, %v5129_v58 }
 0xba3   :  { %v6806_v63 = vadd.f32 %v3171_v12, %v3169_v59  ;;  %v3172_v15 = vmul.f32 %v5131_v60, %v5123_v47  ;;  %v5133_v40 = vpop.eup %5132 }
 0xba4   :  { %v3170_v16 = vmul.f32 %v5133_v40, %v6760_v27  ;;  %v5135_v20 = vpop.eup %5134 }
 0xba5   :  { %5136 = vtanh.f32 %v6806_v63 }
 0xba6   :  { %v6810_v18 = vadd.f32 %v3172_v15, %v3170_v16  ;;  %5138 = vrcp.f32 %v3164_v13 }
 0xba8   :  { %5140 = vtanh.f32 %v6810_v18 }
 0xbaf   :  { %v5137_v62 = vpop.eup %5136 }
 0xbb0   :  { %v5139_v31 = vpop.eup %5138  ;;  %v3177_v11 = vmul.f32 %v5137_v62, %v5135_v20 }
 0xbb2   :  { %v5141_v32 = vpop.eup %5140 }
 0xbb3   :  { %v3178_v5 = vmul.f32 %v5141_v32, %v5139_v31  ;;  %v6877_v32 = vld [vmem:[%s7219_s5 + $0x8] ss:$16 sps:$4 sm:$0xff]  }
 0xbb5   :  { %v3187_v61 = vpack.c.bf16 %v3178_v5, %v3177_v11  ;;  %v6883_v11 = vld [vmem:[%s7219_s5 + $0x24] ss:$16 sps:$4 sm:$0xff]   ;;  %v6889_v5 = vld [vmem:[%s7219_s5 + $0x2c] ss:$16 sps:$4 sm:$0xff]  }
 0xbb7   :  { %3221 = vmatmul.mubr.bf16.vlgmr.msra.gmra.mrb[44].mxu0 %v3187_v61  ;;  %3264 = vmatmul.mubr.bf16.vlgmr.msra.gmra.mrb[44].mxu1 %v3187_v61  ;;  %v6897_v61 = vld [vmem:[%s7219_s5 + $0x20] ss:$16 sps:$4 sm:$0xff]  }
 0xbb8   :  { %3340 = vmatpush1.bf16.msra.mxu0 %v6419_v3  ;;  %3383 = vmatpush1.bf16.msra.mxu1 %v6458_v24  ;;  %v6848_v3 = vld [vmem:[%s7219_s5 + $0x4] ss:$16 sps:$4 sm:$0xff]  }
 0xbb9   :  { %3341 = vmatprep.subr.bf16.mxu0 %v6465_v8  ;;  %3384 = vmatprep.subr.bf16.mxu1 %v6470_v33 }
 0xbba   :  { %3371 = vmatprep.mubr.bf16.mxu0 %v5366_v1  ;;  %3414 = vmatprep.mubr.bf16.mxu1 %v5366_v1 }
 0xbbc   :  { %3342 = vmatpush1.bf16.msra.mxu0 %v6475_v42  ;;  %3385 = vmatpush1.bf16.msra.mxu1 %v6487_v4 }
 0xbbd   :  { %3343 = vmatprep.subr.bf16.mxu0 %v6480_v57  ;;  %3386 = vmatprep.subr.bf16.mxu1 %v6498_v43 }
 0xbc0   :  { %3344 = vmatpush1.bf16.msra.mxu0 %v6493_v19  ;;  %3387 = vmatpush1.bf16.msra.mxu1 %v6510_v6 }
 0xbc1   :  { %3345 = vmatprep.subr.bf16.mxu0 %v6504_v7  ;;  %3388 = vmatprep.subr.bf16.mxu1 %v6516_v38 }
 0xbc4   :  { %3346 = vmatpush1.bf16.msra.mxu0 %v6522_v26  ;;  %3389 = vmatpush1.bf16.msra.mxu1 %v6534_v37 }
 0xbc5   :  { %3347 = vmatprep.subr.bf16.mxu0 %v6528_v2  ;;  %3390 = vmatprep.subr.bf16.mxu1 %v6540_v9 }
 0xbc8   :  { %3348 = vmatpush1.bf16.msra.mxu0 %v6546_v34  ;;  %3391 = vmatpush1.bf16.msra.mxu1 %v6558_v50 }
 0xbc9   :  { %3349 = vmatprep.subr.bf16.mxu0 %v6552_v35  ;;  %3392 = vmatprep.subr.bf16.mxu1 %v6564_v51 }
 0xbcc   :  { %3350 = vmatpush1.bf16.msra.mxu0 %v6570_v53  ;;  %3393 = vmatpush1.bf16.msra.mxu1 %v6582_v36 }
 0xbcd   :  { %3351 = vmatprep.subr.bf16.mxu0 %v6576_v54  ;;  %3394 = vmatprep.subr.bf16.mxu1 %v6601_v30 }
 0xbd0   :  { %3352 = vmatpush1.bf16.msra.mxu0 %v6589_v55  ;;  %3395 = vmatpush1.bf16.msra.mxu1 %v6606_v25 }
 0xbd1   :  { %3353 = vmatprep.subr.bf16.mxu0 %v6596_v10  ;;  %3396 = vmatprep.subr.bf16.mxu1 %v6611_v17 }
 0xbd4   :  { %3354 = vmatpush1.bf16.msra.mxu0 %v6618_v23  ;;  %3397 = vmatpush1.bf16.msra.mxu1 %v6625_v21 }
 0xbd5   :  { %3490 = vmatprep.subr.bf16.mxu0 %v6848_v3  ;;  %3533 = vmatprep.subr.bf16.mxu1 %v6453_v28 }
 0xc8a   :  { %v3222_v24 = vpop.f32.mrb[44].mxu0  ;;  %v3265_v8 = vpop.f32.mrb[44].mxu1 }
 0xc8b   :  { %v4399_v33 = vadd.f32 %v3222_v24, %v6685_v56  ;;  %v3224_v42 = vpop.f32.mrb[45].mxu0  ;;  %v3267_v57 = vpop.f32.mrb[45].mxu1  ;;  %v4431_v35 = vadd.f32 %v3265_v8, %v6701_v39  ;;  %v6903_v24 = vld [vmem:[%s7219_s5 + $0x28] ss:$16 sps:$4 sm:$0xff]   ;;  %v6909_v8 = vld [vmem:[%s7219_s5 + $0x44] ss:$16 sps:$4 sm:$0xff]  }
 0xc8c   :  { %v4400_v4 = vadd.f32 %v3224_v42, %v6689_v52  ;;  %v3226_v19 = vpop.f32.mrb[46].mxu0  ;;  %v3269_v43 = vpop.f32.mrb[46].mxu1  ;;  %v4432_v34 = vadd.f32 %v3267_v57, %v6696_v14  ;;  %v6921_v42 = vld [vmem:[%s7219_s5 + $0x40] ss:$16 sps:$4 sm:$0xff]   ;;  %v6927_v57 = vld [vmem:[%s7219_s5 + $0x48] ss:$16 sps:$4 sm:$0xff]  }
 0xc8d   :  { %v4255_v7 = vmul.f32 -1.442695, %v4399_v33  ;;  %v4401_v6 = vadd.f32 %v3226_v19, %v6685_v56  ;;  %v3228_v38 = vpop.f32.mrb[47].mxu0  ;;  %v3271_v26 = vpop.f32.mrb[47].mxu1  ;;  %v4433_v53 = vadd.f32 %v3269_v43, %v6701_v39  ;;  %v6915_v33 = vld [vmem:[%s7219_s5 + $0x4c] ss:$16 sps:$4 sm:$0xff]  }
 0xc8e   :  { %v4257_v2 = vmul.f32 -1.442695, %v4400_v4  ;;  %v4402_v37 = vadd.f32 %v3228_v38, %v6689_v52  ;;  %v4259_v50 = vmul.f32 -1.442695, %v4432_v34  ;;  %v4434_v51 = vadd.f32 %v3271_v26, %v6696_v14  ;;  %v6933_v4 = vld [vmem:[%s7219_s5 + $0x64] ss:$16 sps:$4 sm:$0xff]  }
 0xc8f   :  { %5142 = vpow2.f32 %v4255_v7  ;;  %v4256_v28 = vmul.f32 -1.442695, %v4401_v6  ;;  %v6939_v19 = vld [vmem:[%s7219_s5 + $0x6c] ss:$16 sps:$4 sm:$0xff]   ;;  %v6945_v43 = vld [vmem:[%s7219_s5 + $0x60] ss:$16 sps:$4 sm:$0xff]  }
 0xc90   :  { %5144 = vpow2.f32 %v4257_v2  ;;  %v4258_v9 = vmul.f32 -1.442695, %v4402_v37  ;;  %v4260_v10 = vmul.f32 -1.442695, %v4434_v51  ;;  %v6951_v7 = vld [vmem:[%s7219_s5 + $0x68] ss:$16 sps:$4 sm:$0xff]  }
 0xc91   :  { %5146 = vpow2.f32 %v4256_v28  ;;  %v6957_v6 = vld [vmem:[%s7219_s5 + $0x84] ss:$16 sps:$4 sm:$0xff]   ;;  %v6963_v38 = vld [vmem:[%s7219_s5 + $0x8c] ss:$16 sps:$4 sm:$0xff]   ;;  %v6969_v26 = vld [vmem:[%s7219_s5 + $0x80] ss:$16 sps:$4 sm:$0xff]  }
 0xc92   :  { %5148 = vpow2.f32 %v4258_v9  ;;  %v6975_v2 = vld [vmem:[%s7219_s5 + $0x88] ss:$16 sps:$4 sm:$0xff]   ;;  %v6981_v37 = vld [vmem:[%s7219_s5 + $0xa4] ss:$16 sps:$4 sm:$0xff]   ;;  %v6987_v28 = vld [vmem:[%s7219_s5 + $0xac] ss:$16 sps:$4 sm:$0xff]  }
 0xc93   :  { %5150 = vtanh.f32 %v4431_v35  ;;  %v6993_v9 = vld [vmem:[%s7219_s5 + $0xa0] ss:$16 sps:$4 sm:$0xff]   ;;  %v6999_v34 = vld [vmem:[%s7219_s5 + $0xa8] ss:$16 sps:$4 sm:$0xff]   ;;  %v7005_v35 = vld [vmem:[%s7219_s5 + $0xc4] ss:$16 sps:$4 sm:$0xff]  }
 0xc94   :  { %5152 = vpow2.f32 %v4259_v50  ;;  %v7011_v50 = vld [vmem:[%s7219_s5 + $0xcc] ss:$16 sps:$4 sm:$0xff]   ;;  %v7017_v51 = vld [vmem:[%s7219_s5 + $0xc0] ss:$16 sps:$4 sm:$0xff]  }
 0xc95   :  { %5154 = vtanh.f32 %v4433_v53  ;;  %v7023_v53 = vld [vmem:[%s7219_s5 + $0xc8] ss:$16 sps:$4 sm:$0xff]  }
 0xc99   :  { %v5143_v54 = vpop.eup %5142 }
 0xc9a   :  { %v5145_v36 = vpop.eup %5144  ;;  %v3288_v55 = vadd.f32 1.0, %v5143_v54  ;;  %v7029_v54 = vld [vmem:[%s7219_s5 + $0xe4] ss:$16 sps:$4 sm:$0xff]  }
 0xc9b   :  { %v3300_v30 = vadd.f32 1.0, %v5145_v36  ;;  %v5147_v25 = vpop.eup %5146  ;;  %v7035_v36 = vld [vmem:[%s7219_s5 + $0xec] ss:$16 sps:$4 sm:$0xff]  }
 0xc9c   :  { %5156 = vrcp.f32 %v3288_v55  ;;  %v3289_v17 = vadd.f32 1.0, %v5147_v25  ;;  %v5149_v23 = vpop.eup %5148  ;;  %v7041_v55 = vld [vmem:[%s7219_s5 + $0xe0] ss:$16 sps:$4 sm:$0xff]  }
 0xc9d   :  { %5158 = vrcp.f32 %v3300_v30  ;;  %v3301_v21 = vadd.f32 1.0, %v5149_v23  ;;  %v5151_v27 = vpop.eup %5150  ;;  %v7054_v30 = vld [vmem:[%s7219_s5 + $0xc] ss:$16 sps:$4 sm:$0xff]  }
 0xc9e   :  { %5160 = vpow2.f32 %v4260_v10  ;;  %v5153_v41 = vpop.eup %5152  ;;  %v7047_v10 = vld [vmem:[%s7219_s5 + $0xe8] ss:$16 sps:$4 sm:$0xff]  }
 0xc9f   :  { %5162 = vrcp.f32 %v3289_v17  ;;  %v5155_v45 = vpop.eup %5154  ;;  %v3314_v49 = vadd.f32 1.0, %v5153_v41 }
 0xca0   :  { %5164 = vrcp.f32 %v3301_v21 }
 0xca1   :  { %5166 = vrcp.f32 %v3314_v49 }
 0xca6   :  { %v5157_v44 = vpop.eup %5156 }
 0xca7   :  { %v5159_v22 = vpop.eup %5158  ;;  %v3322_v46 = vmul.f32 %v5157_v44, %v5151_v27 }
 0xca8   :  { %v5161_v29 = vpop.eup %5160  ;;  %v3320_v47 = vmul.f32 %v5159_v22, %v6806_v63 }
 0xca9   :  { %v5163_v48 = vpop.eup %5162  ;;  %v3315_v60 = vadd.f32 1.0, %v5161_v29 }
 0xcaa   :  { %v6861_v12 = vadd.f32 %v3322_v46, %v3320_v47  ;;  %v3323_v58 = vmul.f32 %v5163_v48, %v5155_v45  ;;  %v5165_v59 = vpop.eup %5164 }
 0xcab   :  { %v3321_v0 = vmul.f32 %v5165_v59, %v6810_v18  ;;  %v5167_v40 = vpop.eup %5166  ;;  %v6871_v18 = vld [vmem:[%s7219_s5] ss:$16 sps:$4 sm:$0xff]  }
 0xcac   :  { %5168 = vtanh.f32 %v6861_v12 }
 0xcad   :  { %v6865_v15 = vadd.f32 %v3323_v58, %v3321_v0  ;;  %5170 = vrcp.f32 %v3315_v60 }
 0xcaf   :  { %5172 = vtanh.f32 %v6865_v15 }
 0xcb6   :  { %v5169_v13 = vpop.eup %5168 }
 0xcb7   :  { %v5171_v63 = vpop.eup %5170  ;;  %v3328_v20 = vmul.f32 %v5169_v13, %v5167_v40 }
 0xcb9   :  { %v5173_v16 = vpop.eup %5172 }
 0xcba   :  { %v3329_v62 = vmul.f32 %v5173_v16, %v5171_v63 }
 0xcbc   :  { %v3338_v31 = vpack.c.bf16 %v3329_v62, %v3328_v20 }
 0xcbe   :  { %3372 = vmatmul.mubr.bf16.vlgmr.msra.gmra.mrb[48].mxu0 %v3338_v31  ;;  %3415 = vmatmul.mubr.bf16.vlgmr.msra.gmra.mrb[48].mxu1 %v3338_v31 }
 0xcbf   :  { %3491 = vmatpush1.bf16.msra.mxu0 %v6871_v18  ;;  %3534 = vmatpush1.bf16.msra.mxu1 %v6877_v32 }
 0xcc0   :  { %3492 = vmatprep.subr.bf16.mxu0 %v6883_v11  ;;  %3535 = vmatprep.subr.bf16.mxu1 %v6889_v5 }
 0xcc1   :  { %3522 = vmatprep.mubr.bf16.mxu0 %v5366_v1  ;;  %3565 = vmatprep.mubr.bf16.mxu1 %v5366_v1 }
 0xcc3   :  { %3493 = vmatpush1.bf16.msra.mxu0 %v6897_v61  ;;  %3536 = vmatpush1.bf16.msra.mxu1 %v6903_v24 }
 0xcc4   :  { %3494 = vmatprep.subr.bf16.mxu0 %v6909_v8  ;;  %3537 = vmatprep.subr.bf16.mxu1 %v6915_v33 }
 0xcc7   :  { %3495 = vmatpush1.bf16.msra.mxu0 %v6921_v42  ;;  %3538 = vmatpush1.bf16.msra.mxu1 %v6927_v57 }
 0xcc8   :  { %3496 = vmatprep.subr.bf16.mxu0 %v6933_v4  ;;  %3539 = vmatprep.subr.bf16.mxu1 %v6939_v19 }
 0xccb   :  { %3497 = vmatpush1.bf16.msra.mxu0 %v6945_v43  ;;  %3540 = vmatpush1.bf16.msra.mxu1 %v6951_v7 }
 0xccc   :  { %3498 = vmatprep.subr.bf16.mxu0 %v6957_v6  ;;  %3541 = vmatprep.subr.bf16.mxu1 %v6963_v38 }
 0xccf   :  { %3499 = vmatpush1.bf16.msra.mxu0 %v6969_v26  ;;  %3542 = vmatpush1.bf16.msra.mxu1 %v6975_v2 }
 0xcd0   :  { %3500 = vmatprep.subr.bf16.mxu0 %v6981_v37  ;;  %3543 = vmatprep.subr.bf16.mxu1 %v6987_v28 }
 0xcd3   :  { %3501 = vmatpush1.bf16.msra.mxu0 %v6993_v9  ;;  %3544 = vmatpush1.bf16.msra.mxu1 %v6999_v34 }
 0xcd4   :  { %3502 = vmatprep.subr.bf16.mxu0 %v7005_v35  ;;  %3545 = vmatprep.subr.bf16.mxu1 %v7011_v50 }
 0xcd7   :  { %3503 = vmatpush1.bf16.msra.mxu0 %v7017_v51  ;;  %3546 = vmatpush1.bf16.msra.mxu1 %v7023_v53 }
 0xcd8   :  { %3504 = vmatprep.subr.bf16.mxu0 %v7029_v54  ;;  %3547 = vmatprep.subr.bf16.mxu1 %v7035_v36 }
 0xcdb   :  { %3505 = vmatpush1.bf16.msra.mxu0 %v7041_v55  ;;  %3548 = vmatpush1.bf16.msra.mxu1 %v7047_v10 }
 0xcdc   :  { %3641 = vmatprep.subr.bf16.mxu0 %v6848_v3  ;;  %3684 = vmatprep.subr.bf16.mxu1 %v7054_v30 }
 0xd91   :  { %v3373_v25 = vpop.f32.mrb[48].mxu0  ;;  %v3416_v17 = vpop.f32.mrb[48].mxu1 }
 0xd92   :  { %v4403_v23 = vadd.f32 %v3373_v25, %v6685_v56  ;;  %v3375_v21 = vpop.f32.mrb[49].mxu0  ;;  %v3418_v27 = vpop.f32.mrb[49].mxu1  ;;  %v4435_v0 = vadd.f32 %v3416_v17, %v6701_v39 }
 0xd93   :  { %v4404_v41 = vadd.f32 %v3375_v21, %v6689_v52  ;;  %v3377_v45 = vpop.f32.mrb[50].mxu0  ;;  %v3420_v44 = vpop.f32.mrb[50].mxu1  ;;  %v4436_v60 = vadd.f32 %v3418_v27, %v6696_v14 }
 0xd94   :  { %v4261_v22 = vmul.f32 -1.442695, %v4403_v23  ;;  %v4405_v46 = vadd.f32 %v3377_v45, %v6685_v56  ;;  %v3379_v29 = vpop.f32.mrb[51].mxu0  ;;  %v3422_v47 = vpop.f32.mrb[51].mxu1  ;;  %v4437_v63 = vadd.f32 %v3420_v44, %v6701_v39 }
 0xd95   :  { %v4263_v48 = vmul.f32 -1.442695, %v4404_v41  ;;  %v4406_v49 = vadd.f32 %v3379_v29, %v6689_v52  ;;  %v4265_v40 = vmul.f32 -1.442695, %v4436_v60  ;;  %v4438_v13 = vadd.f32 %v3422_v47, %v6696_v14 }
 0xd96   :  { %5174 = vpow2.f32 %v4261_v22  ;;  %v4262_v58 = vmul.f32 -1.442695, %v4405_v46 }
 0xd97   :  { %5176 = vpow2.f32 %v4263_v48  ;;  %v4264_v59 = vmul.f32 -1.442695, %v4406_v49  ;;  %v4266_v31 = vmul.f32 -1.442695, %v4438_v13 }
 0xd98   :  { %5178 = vpow2.f32 %v4262_v58 }
 0xd99   :  { %5180 = vpow2.f32 %v4264_v59 }
 0xd9a   :  { %5182 = vtanh.f32 %v4435_v0 }
 0xd9b   :  { %5184 = vpow2.f32 %v4265_v40 }
 0xd9c   :  { %5186 = vtanh.f32 %v4437_v63 }
 0xda0   :  { %v5175_v16 = vpop.eup %5174 }
 0xda1   :  { %v5177_v20 = vpop.eup %5176  ;;  %v3439_v62 = vadd.f32 1.0, %v5175_v16 }
 0xda2   :  { %v3451_v25 = vadd.f32 1.0, %v5177_v20  ;;  %v5179_v23 = vpop.eup %5178 }
 0xda3   :  { %5188 = vrcp.f32 %v3439_v62  ;;  %v3440_v21 = vadd.f32 1.0, %v5179_v23  ;;  %v5181_v27 = vpop.eup %5180 }
 0xda4   :  { %5190 = vrcp.f32 %v3451_v25  ;;  %v3452_v17 = vadd.f32 1.0, %v5181_v27  ;;  %v5183_v41 = vpop.eup %5182 }
 0xda5   :  { %5192 = vpow2.f32 %v4266_v31  ;;  %v5185_v45 = vpop.eup %5184 }
 0xda6   :  { %5194 = vrcp.f32 %v3440_v21  ;;  %v5187_v44 = vpop.eup %5186  ;;  %v3465_v58 = vadd.f32 1.0, %v5185_v45 }
 0xda7   :  { %5196 = vrcp.f32 %v3452_v17 }
 0xda8   :  { %5198 = vrcp.f32 %v3465_v58 }
 0xdad   :  { %v5189_v22 = vpop.eup %5188 }
 0xdae   :  { %v5191_v46 = vpop.eup %5190  ;;  %v3473_v29 = vmul.f32 %v5189_v22, %v5183_v41 }
 0xdaf   :  { %v5193_v47 = vpop.eup %5192  ;;  %v3471_v48 = vmul.f32 %v5191_v46, %v6861_v12 }
 0xdb0   :  { %v5195_v49 = vpop.eup %5194  ;;  %v3466_v40 = vadd.f32 1.0, %v5193_v47 }
 0xdb1   :  { %v7066_v59 = vadd.f32 %v3473_v29, %v3471_v48  ;;  %v3474_v60 = vmul.f32 %v5195_v49, %v5187_v44  ;;  %v5197_v0 = vpop.eup %5196 }
 0xdb2   :  { %v3472_v13 = vmul.f32 %v5197_v0, %v6865_v15  ;;  %v5199_v16 = vpop.eup %5198 }
 0xdb3   :  { %5200 = vtanh.f32 %v7066_v59 }
 0xdb4   :  { %v7070_v63 = vadd.f32 %v3474_v60, %v3472_v13  ;;  %5202 = vrcp.f32 %v3466_v40 }
 0xdb6   :  { %5204 = vtanh.f32 %v7070_v63 }
 0xdbd   :  { %v5201_v20 = vpop.eup %5200 }
 0xdbe   :  { %v5203_v12 = vpop.eup %5202  ;;  %v3479_v31 = vmul.f32 %v5201_v20, %v5199_v16 }
 0xdc0   :  { %v5205_v62 = vpop.eup %5204 }
 0xdc1   :  { %v3480_v25 = vmul.f32 %v5205_v62, %v5203_v12 }
 0xdc3   :  { %v3489_v23 = vpack.c.bf16 %v3480_v25, %v3479_v31 }
 0xdc5   :  { %3523 = vmatmul.mubr.bf16.vlgmr.msra.gmra.mrb[52].mxu0 %v3489_v23  ;;  %3566 = vmatmul.mubr.bf16.vlgmr.msra.gmra.mrb[52].mxu1 %v3489_v23 }
 0xdc6   :  { %3642 = vmatpush1.bf16.msra.mxu0 %v6871_v18  ;;  %3685 = vmatpush1.bf16.msra.mxu1 %v6877_v32 }
 0xdc7   :  { %3643 = vmatprep.subr.bf16.mxu0 %v6883_v11  ;;  %3686 = vmatprep.subr.bf16.mxu1 %v6889_v5 }
 0xdc8   :  { %3673 = vmatprep.mubr.bf16.mxu0 %v5366_v1  ;;  %3716 = vmatprep.mubr.bf16.mxu1 %v5366_v1 }
 0xdca   :  { %3644 = vmatpush1.bf16.msra.mxu0 %v6897_v61  ;;  %3687 = vmatpush1.bf16.msra.mxu1 %v6903_v24 }
 0xdcb   :  { %3645 = vmatprep.subr.bf16.mxu0 %v6909_v8  ;;  %3688 = vmatprep.subr.bf16.mxu1 %v6915_v33 }
 0xdce   :  { %3646 = vmatpush1.bf16.msra.mxu0 %v6921_v42  ;;  %3689 = vmatpush1.bf16.msra.mxu1 %v6927_v57 }
 0xdcf   :  { %3647 = vmatprep.subr.bf16.mxu0 %v6933_v4  ;;  %3690 = vmatprep.subr.bf16.mxu1 %v6939_v19 }
 0xdd2   :  { %3648 = vmatpush1.bf16.msra.mxu0 %v6945_v43  ;;  %3691 = vmatpush1.bf16.msra.mxu1 %v6951_v7 }
 0xdd3   :  { %3649 = vmatprep.subr.bf16.mxu0 %v6957_v6  ;;  %3692 = vmatprep.subr.bf16.mxu1 %v6963_v38 }
 0xdd6   :  { %3650 = vmatpush1.bf16.msra.mxu0 %v6969_v26  ;;  %3693 = vmatpush1.bf16.msra.mxu1 %v6975_v2 }
 0xdd7   :  { %3651 = vmatprep.subr.bf16.mxu0 %v6981_v37  ;;  %3694 = vmatprep.subr.bf16.mxu1 %v6987_v28 }
 0xdda   :  { %3652 = vmatpush1.bf16.msra.mxu0 %v6993_v9  ;;  %3695 = vmatpush1.bf16.msra.mxu1 %v6999_v34 }
 0xddb   :  { %3653 = vmatprep.subr.bf16.mxu0 %v7005_v35  ;;  %3696 = vmatprep.subr.bf16.mxu1 %v7011_v50 }
 0xdde   :  { %3654 = vmatpush1.bf16.msra.mxu0 %v7017_v51  ;;  %3697 = vmatpush1.bf16.msra.mxu1 %v7023_v53 }
 0xddf   :  { %3655 = vmatprep.subr.bf16.mxu0 %v7029_v54  ;;  %3698 = vmatprep.subr.bf16.mxu1 %v7035_v36 }
 0xde2   :  { %3656 = vmatpush1.bf16.msra.mxu0 %v7041_v55  ;;  %3699 = vmatpush1.bf16.msra.mxu1 %v7047_v10 }
 0xde3   :  { %3792 = vmatprep.subr.bf16.mxu0 %v6848_v3  ;;  %3835 = vmatprep.subr.bf16.mxu1 %v7054_v30 }
 0xe98   :  { %v3524_v15 = vpop.f32.mrb[52].mxu0  ;;  %v3567_v21 = vpop.f32.mrb[52].mxu1 }
 0xe99   :  { %v4407_v27 = vadd.f32 %v3524_v15, %v6685_v56  ;;  %v3526_v17 = vpop.f32.mrb[53].mxu0  ;;  %v3569_v41 = vpop.f32.mrb[53].mxu1  ;;  %v4439_v0 = vadd.f32 %v3567_v21, %v6701_v39 }
 0xe9a   :  { %v4408_v45 = vadd.f32 %v3526_v17, %v6689_v52  ;;  %v3528_v44 = vpop.f32.mrb[54].mxu0  ;;  %v3571_v22 = vpop.f32.mrb[54].mxu1  ;;  %v4440_v60 = vadd.f32 %v3569_v41, %v6696_v14 }
 0xe9b   :  { %v4267_v46 = vmul.f32 -1.442695, %v4407_v27  ;;  %v4409_v29 = vadd.f32 %v3528_v44, %v6685_v56  ;;  %v3530_v47 = vpop.f32.mrb[55].mxu0  ;;  %v3573_v48 = vpop.f32.mrb[55].mxu1  ;;  %v4441_v16 = vadd.f32 %v3571_v22, %v6701_v39 }
 0xe9c   :  { %v4269_v49 = vmul.f32 -1.442695, %v4408_v45  ;;  %v4410_v3 = vadd.f32 %v3530_v47, %v6689_v52  ;;  %v4271_v40 = vmul.f32 -1.442695, %v4440_v60  ;;  %v4442_v13 = vadd.f32 %v3573_v48, %v6696_v14 }
 0xe9d   :  { %5206 = vpow2.f32 %v4267_v46  ;;  %v4268_v30 = vmul.f32 -1.442695, %v4409_v29 }
 0xe9e   :  { %5208 = vpow2.f32 %v4269_v49  ;;  %v4270_v58 = vmul.f32 -1.442695, %v4410_v3  ;;  %v4272_v31 = vmul.f32 -1.442695, %v4442_v13 }
 0xe9f   :  { %5210 = vpow2.f32 %v4268_v30 }
 0xea0   :  { %5212 = vpow2.f32 %v4270_v58 }
 0xea1   :  { %5214 = vtanh.f32 %v4439_v0 }
 0xea2   :  { %5216 = vpow2.f32 %v4271_v40 }
 0xea3   :  { %5218 = vtanh.f32 %v4441_v16 }
 0xea7   :  { %v5207_v20 = vpop.eup %5206 }
 0xea8   :  { %v5209_v12 = vpop.eup %5208  ;;  %v3590_v62 = vadd.f32 1.0, %v5207_v20 }
 0xea9   :  { %v3602_v25 = vadd.f32 1.0, %v5209_v12  ;;  %v5211_v23 = vpop.eup %5210 }
 0xeaa   :  { %5220 = vrcp.f32 %v3590_v62  ;;  %v3591_v15 = vadd.f32 1.0, %v5211_v23  ;;  %v5213_v27 = vpop.eup %5212 }
 0xeab   :  { %5222 = vrcp.f32 %v3602_v25  ;;  %v3603_v21 = vadd.f32 1.0, %v5213_v27  ;;  %v5215_v17 = vpop.eup %5214 }
 0xeac   :  { %5224 = vpow2.f32 %v4272_v31  ;;  %v5217_v41 = vpop.eup %5216 }
 0xead   :  { %5226 = vrcp.f32 %v3591_v15  ;;  %v5219_v45 = vpop.eup %5218  ;;  %v3616_v49 = vadd.f32 1.0, %v5217_v41 }
 0xeae   :  { %5228 = vrcp.f32 %v3603_v21 }
 0xeaf   :  { %5230 = vrcp.f32 %v3616_v49 }
 0xeb4   :  { %v5221_v44 = vpop.eup %5220 }
 0xeb5   :  { %v5223_v22 = vpop.eup %5222  ;;  %v3624_v46 = vmul.f32 %v5221_v44, %v5215_v17 }
 0xeb6   :  { %v5225_v29 = vpop.eup %5224  ;;  %v3622_v47 = vmul.f32 %v5223_v22, %v7066_v59 }
 0xeb7   :  { %v5227_v48 = vpop.eup %5226  ;;  %v3617_v60 = vadd.f32 1.0, %v5225_v29 }
 0xeb8   :  { %v7116_v3 = vadd.f32 %v3624_v46, %v3622_v47  ;;  %v3625_v30 = vmul.f32 %v5227_v48, %v5219_v45  ;;  %v5229_v58 = vpop.eup %5228 }
 0xeb9   :  { %v3623_v0 = vmul.f32 %v5229_v58, %v7070_v63  ;;  %v5231_v13 = vpop.eup %5230 }
 0xeba   :  { %5232 = vtanh.f32 %v7116_v3 }
 0xebb   :  { %v7120_v40 = vadd.f32 %v3625_v30, %v3623_v0  ;;  %5234 = vrcp.f32 %v3617_v60 }
 0xebd   :  { %5236 = vtanh.f32 %v7120_v40 }
 0xec4   :  { %v5233_v16 = vpop.eup %5232 }
 0xec5   :  { %v5235_v59 = vpop.eup %5234  ;;  %v3630_v12 = vmul.f32 %v5233_v16, %v5231_v13  ;;  %v5367_v16 = vmov 0.0  }
 0xec7   :  { %v5237_v20 = vpop.eup %5236 }
 0xec8   :  { %v3631_v62 = vmul.f32 %v5237_v20, %v5235_v59  ;;  %v4783_v59 = vld [vmem:[%s7221_s7 + $0x8] sm:$0xff]   ;;  %v4784_v20 = vld [vmem:[%s7221_s7 + $0x10] sm:$0xff]  }
 0xeca   :  { %v3640_v31 = vpack.c.bf16 %v3631_v62, %v3630_v12  ;;  %v4785_v12 = vld [vmem:[%s7221_s7 + $0x18] sm:$0xff]   ;;  %v4786_v62 = vld [vmem:[%s7221_s7 + $0x20] sm:$0xff]  }
 0xecc   :  { %3674 = vmatmul.mubr.bf16.vlgmr.msra.gmra.mrb[56].mxu0 %v3640_v31  ;;  %3717 = vmatmul.mubr.bf16.vlgmr.msra.gmra.mrb[56].mxu1 %v3640_v31  ;;  %v4787_v31 = vld [vmem:[%s7221_s7 + $0x28] sm:$0xff]  }
 0xecd   :  { %3793 = vmatpush1.bf16.msra.mxu0 %v6871_v18  ;;  %3836 = vmatpush1.bf16.msra.mxu1 %v6877_v32 }
 0xece   :  { %3794 = vmatprep.subr.bf16.mxu0 %v6883_v11  ;;  %3837 = vmatprep.subr.bf16.mxu1 %v6889_v5 }
 0xecf   :  { %3824 = vmatprep.mubr.bf16.mxu0 %v5366_v1  ;;  %3867 = vmatprep.mubr.bf16.mxu1 %v5366_v1 }
 0xed1   :  { %3795 = vmatpush1.bf16.msra.mxu0 %v6897_v61  ;;  %3838 = vmatpush1.bf16.msra.mxu1 %v6903_v24 }
 0xed2   :  { %3796 = vmatprep.subr.bf16.mxu0 %v6909_v8  ;;  %3839 = vmatprep.subr.bf16.mxu1 %v6915_v33 }
 0xed5   :  { %3797 = vmatpush1.bf16.msra.mxu0 %v6921_v42  ;;  %3840 = vmatpush1.bf16.msra.mxu1 %v6927_v57 }
 0xed6   :  { %3798 = vmatprep.subr.bf16.mxu0 %v6933_v4  ;;  %3841 = vmatprep.subr.bf16.mxu1 %v6939_v19 }
 0xed9   :  { %3799 = vmatpush1.bf16.msra.mxu0 %v6945_v43  ;;  %3842 = vmatpush1.bf16.msra.mxu1 %v6951_v7 }
 0xeda   :  { %3800 = vmatprep.subr.bf16.mxu0 %v6957_v6  ;;  %3843 = vmatprep.subr.bf16.mxu1 %v6963_v38 }
 0xedd   :  { %3801 = vmatpush1.bf16.msra.mxu0 %v6969_v26  ;;  %3844 = vmatpush1.bf16.msra.mxu1 %v6975_v2 }
 0xede   :  { %3802 = vmatprep.subr.bf16.mxu0 %v6981_v37  ;;  %3845 = vmatprep.subr.bf16.mxu1 %v6987_v28 }
 0xee1   :  { %3803 = vmatpush1.bf16.msra.mxu0 %v6993_v9  ;;  %3846 = vmatpush1.bf16.msra.mxu1 %v6999_v34 }
 0xee2   :  { %3804 = vmatprep.subr.bf16.mxu0 %v7005_v35  ;;  %3847 = vmatprep.subr.bf16.mxu1 %v7011_v50 }
 0xee5   :  { %3805 = vmatpush1.bf16.msra.mxu0 %v7017_v51  ;;  %3848 = vmatpush1.bf16.msra.mxu1 %v7023_v53 }
 0xee6   :  { %3806 = vmatprep.subr.bf16.mxu0 %v7029_v54  ;;  %3849 = vmatprep.subr.bf16.mxu1 %v7035_v36 }
 0xee9   :  { %3807 = vmatpush1.bf16.msra.mxu0 %v7041_v55  ;;  %3850 = vmatpush1.bf16.msra.mxu1 %v7047_v10 }
 0xeea   :  { %4303 = vmatprep.subr.bf16.mxu0 %v5367_v16 }
 0xf9f   :  { %v3675_v1 = vpop.f32.mrb[56].mxu0  ;;  %v3718_v18 = vpop.f32.mrb[56].mxu1 }
 0xfa0   :  { %v4411_v32 = vadd.f32 %v3675_v1, %v6685_v56  ;;  %v3677_v11 = vpop.f32.mrb[57].mxu0  ;;  %v3720_v5 = vpop.f32.mrb[57].mxu1  ;;  %v4443_v26 = vadd.f32 %v3718_v18, %v6701_v39  ;;  %v4788_v1 = vld [vmem:[%s7221_s7 + $0x30] sm:$0xff]   ;;  %v4789_v18 = vld [vmem:[%s7221_s7 + $0x38] sm:$0xff]  }
 0xfa1   :  { %v4412_v61 = vadd.f32 %v3677_v11, %v6689_v52  ;;  %v3679_v24 = vpop.f32.mrb[58].mxu0  ;;  %v3722_v8 = vpop.f32.mrb[58].mxu1  ;;  %v4444_v38 = vadd.f32 %v3720_v5, %v6696_v14 }
 0xfa2   :  { %v4273_v33 = vmul.f32 -1.442695, %v4411_v32  ;;  %v4413_v42 = vadd.f32 %v3679_v24, %v6685_v56  ;;  %v3681_v57 = vpop.f32.mrb[59].mxu0  ;;  %v3724_v4 = vpop.f32.mrb[59].mxu1  ;;  %v4445_v28 = vadd.f32 %v3722_v8, %v6701_v39 }
 0xfa3   :  { %v4275_v19 = vmul.f32 -1.442695, %v4412_v61  ;;  %v4414_v43 = vadd.f32 %v3681_v57, %v6689_v52  ;;  %v4277_v2 = vmul.f32 -1.442695, %v4444_v38  ;;  %v4446_v37 = vadd.f32 %v3724_v4, %v6696_v14 }
 0xfa4   :  { %5238 = vpow2.f32 %v4273_v33  ;;  %v4274_v7 = vmul.f32 -1.442695, %v4413_v42 }
 0xfa5   :  { %5240 = vpow2.f32 %v4275_v19  ;;  %v4276_v6 = vmul.f32 -1.442695, %v4414_v43  ;;  %v4278_v50 = vmul.f32 -1.442695, %v4446_v37 }
 0xfa6   :  { %5242 = vpow2.f32 %v4274_v7 }
 0xfa7   :  { %5244 = vpow2.f32 %v4276_v6 }
 0xfa8   :  { %5246 = vtanh.f32 %v4443_v26 }
 0xfa9   :  { %5248 = vpow2.f32 %v4277_v2 }
 0xfaa   :  { %5250 = vtanh.f32 %v4445_v28 }
 0xfae   :  { %v5239_v9 = vpop.eup %5238 }
 0xfaf   :  { %v5241_v34 = vpop.eup %5240  ;;  %v3741_v35 = vadd.f32 1.0, %v5239_v9 }
 0xfb0   :  { %v3753_v51 = vadd.f32 1.0, %v5241_v34  ;;  %v5243_v53 = vpop.eup %5242 }
 0xfb1   :  { %5252 = vrcp.f32 %v3741_v35  ;;  %v3742_v54 = vadd.f32 1.0, %v5243_v53  ;;  %v5245_v36 = vpop.eup %5244 }
 0xfb2   :  { %5254 = vrcp.f32 %v3753_v51  ;;  %v3754_v55 = vadd.f32 1.0, %v5245_v36  ;;  %v5247_v10 = vpop.eup %5246 }
 0xfb3   :  { %5256 = vpow2.f32 %v4278_v50  ;;  %v5249_v63 = vpop.eup %5248 }
 0xfb4   :  { %5258 = vrcp.f32 %v3742_v54  ;;  %v5251_v25 = vpop.eup %5250  ;;  %v3767_v45 = vadd.f32 1.0, %v5249_v63 }
 0xfb5   :  { %5260 = vrcp.f32 %v3754_v55 }
 0xfb6   :  { %5262 = vrcp.f32 %v3767_v45 }
 0xfbb   :  { %v5253_v23 = vpop.eup %5252 }
 0xfbc   :  { %v5255_v15 = vpop.eup %5254  ;;  %v3775_v27 = vmul.f32 %v5253_v23, %v5247_v10 }
 0xfbd   :  { %v5257_v21 = vpop.eup %5256  ;;  %v3773_v17 = vmul.f32 %v5255_v15, %v7116_v3 }
 0xfbe   :  { %v5259_v41 = vpop.eup %5258  ;;  %v3768_v29 = vadd.f32 1.0, %v5257_v21 }
 0xfbf   :  { %v7164_v44 = vadd.f32 %v3775_v27, %v3773_v17  ;;  %v3776_v22 = vmul.f32 %v5259_v41, %v5251_v25  ;;  %v5261_v46 = vpop.eup %5260 }
 0xfc0   :  { %v3774_v47 = vmul.f32 %v5261_v46, %v7120_v40  ;;  %v5263_v49 = vpop.eup %5262  ;;  %v4782_v40 = vld [vmem:[%s7221_s7] sm:$0xff]  }
 0xfc1   :  { %5264 = vtanh.f32 %v7164_v44 }
 0xfc2   :  { %v7168_v48 = vadd.f32 %v3776_v22, %v3774_v47  ;;  %5266 = vrcp.f32 %v3768_v29 }
 0xfc4   :  { %5268 = vtanh.f32 %v7168_v48 }
 0xfcb   :  { %v5265_v30 = vpop.eup %5264 }
 0xfcc   :  { %v5267_v3 = vpop.eup %5266  ;;  %v3781_v60 = vmul.f32 %v5265_v30, %v5263_v49 }
 0xfce   :  { %v5269_v58 = vpop.eup %5268 }
 0xfcf   :  { %v3782_v0 = vmul.f32 %v5269_v58, %v5267_v3 }
 0xfd1   :  { %v3791_v13 = vpack.c.bf16 %v3782_v0, %v3781_v60 }
 0xfd3   :  { %3825 = vmatmul.mubr.bf16.vlgmr.msra.gmra.mrb[60].mxu0 %v3791_v13  ;;  %3868 = vmatmul.mubr.bf16.vlgmr.msra.gmra.mrb[60].mxu1 %v3791_v13 }
 0xfd4   :  { %4304 = vmatpush3.bf16.msra.mxu0 %v4782_v40  ;;  %4319 = vmatprep.mubr.msk.bf16.mxu0 %vm5368_vm0, %v5367_v16 }
 0xfd5   :  { %4305 = vmatprep.subr.bf16.mxu0 %v5367_v16 }
 0xfd8   :  { %4306 = vmatpush3.bf16.msra.mxu0 %v4783_v59 }
 0xfd9   :  { %4307 = vmatprep.subr.bf16.mxu0 %v5367_v16 }
 0xfdc   :  { %4308 = vmatpush3.bf16.msra.mxu0 %v4784_v20 }
 0xfdd   :  { %4309 = vmatprep.subr.bf16.mxu0 %v5367_v16 }
 0xfe0   :  { %4310 = vmatpush3.bf16.msra.mxu0 %v4785_v12 }
 0xfe1   :  { %4311 = vmatprep.subr.bf16.mxu0 %v5367_v16 }
 0xfe4   :  { %4312 = vmatpush3.bf16.msra.mxu0 %v4786_v62 }
 0xfe5   :  { %4313 = vmatprep.subr.bf16.mxu0 %v5367_v16 }
 0xfe8   :  { %4314 = vmatpush3.bf16.msra.mxu0 %v4787_v31 }
 0xfe9   :  { %4315 = vmatprep.subr.bf16.mxu0 %v5367_v16 }
 0xfec   :  { %4316 = vmatpush3.bf16.msra.mxu0 %v4788_v1 }
 0xfed   :  { %4317 = vmatprep.subr.bf16.mxu0 %v5367_v16 }
 0xff0   :  { %4318 = vmatpush3.bf16.msra.mxu0 %v4789_v18 }
0x10a6   :  { %v3826_v32 = vpop.f32.mrb[60].mxu0  ;;  %v3869_v11 = vpop.f32.mrb[60].mxu1 }
0x10a7   :  { %v4415_v5 = vadd.f32 %v3826_v32, %v6685_v56  ;;  %v3828_v61 = vpop.f32.mrb[61].mxu0  ;;  %v3871_v24 = vpop.f32.mrb[61].mxu1  ;;  %v4447_v37 = vadd.f32 %v3869_v11, %v6701_v39 }
0x10a8   :  { %v4416_v8 = vadd.f32 %v3828_v61, %v6689_v52  ;;  %v3830_v33 = vpop.f32.mrb[62].mxu0  ;;  %v3873_v42 = vpop.f32.mrb[62].mxu1  ;;  %v4448_v2 = vadd.f32 %v3871_v24, %v6696_v14 }
0x10a9   :  { %v4279_v57 = vmul.f32 -1.442695, %v4415_v5  ;;  %v4417_v4 = vadd.f32 %v3830_v33, %v6685_v56  ;;  %v3832_v19 = vpop.f32.mrb[63].mxu0  ;;  %v3875_v43 = vpop.f32.mrb[63].mxu1  ;;  %v4449_v56 = vadd.f32 %v3873_v42, %v6701_v39 }
0x10aa   :  { %v4281_v7 = vmul.f32 -1.442695, %v4416_v8  ;;  %v4418_v6 = vadd.f32 %v3832_v19, %v6689_v52  ;;  %v4283_v28 = vmul.f32 -1.442695, %v4448_v2  ;;  %v4450_v9 = vadd.f32 %v3875_v43, %v6696_v14 }
0x10ab   :  { %5270 = vpow2.f32 %v4279_v57  ;;  %v4280_v38 = vmul.f32 -1.442695, %v4417_v4 }
0x10ac   :  { %5272 = vpow2.f32 %v4281_v7  ;;  %v4282_v26 = vmul.f32 -1.442695, %v4418_v6  ;;  %v4284_v52 = vmul.f32 -1.442695, %v4450_v9 }
0x10ad   :  { %5274 = vpow2.f32 %v4280_v38 }
0x10ae   :  { %5276 = vpow2.f32 %v4282_v26 }
0x10af   :  { %5278 = vtanh.f32 %v4447_v37 }
0x10b0   :  { %5280 = vpow2.f32 %v4283_v28 }
0x10b1   :  { %5282 = vtanh.f32 %v4449_v56 }
0x10b5   :  { %v5271_v34 = vpop.eup %5270 }
0x10b6   :  { %v5273_v35 = vpop.eup %5272  ;;  %v3892_v50 = vadd.f32 1.0, %v5271_v34 }
0x10b7   :  { %v3904_v51 = vadd.f32 1.0, %v5273_v35  ;;  %v5275_v53 = vpop.eup %5274 }
0x10b8   :  { %5284 = vrcp.f32 %v3892_v50  ;;  %v3893_v54 = vadd.f32 1.0, %v5275_v53  ;;  %v5277_v36 = vpop.eup %5276 }
0x10b9   :  { %5286 = vrcp.f32 %v3904_v51  ;;  %v3905_v55 = vadd.f32 1.0, %v5277_v36  ;;  %v5279_v14 = vpop.eup %5278 }
0x10ba   :  { %5288 = vpow2.f32 %v4284_v52  ;;  %v5281_v10 = vpop.eup %5280 }
0x10bb   :  { %5290 = vrcp.f32 %v3893_v54  ;;  %v5283_v39 = vpop.eup %5282  ;;  %v3918_v15 = vadd.f32 1.0, %v5281_v10 }
0x10bc   :  { %5292 = vrcp.f32 %v3905_v55 }
0x10bd   :  { %5294 = vrcp.f32 %v3918_v15 }
0x10c2   :  { %v5285_v63 = vpop.eup %5284 }
0x10c3   :  { %v5287_v25 = vpop.eup %5286  ;;  %v3926_v23 = vmul.f32 %v5285_v63, %v5279_v14 }
0x10c4   :  { %v5289_v27 = vpop.eup %5288  ;;  %v3924_v21 = vmul.f32 %v5287_v25, %v7164_v44  ;;  %v4285_v44 = vld [vmem:[%s7222_s8] ss:$0 sm:$0xff] }
0x10c5   :  { %v5291_v17 = vpop.eup %5290  ;;  %v3919_v46 = vadd.f32 1.0, %v5289_v27 }
0x10c6   :  { %v3928_v41 = vadd.f32 %v3926_v23, %v3924_v21  ;;  %v3927_v45 = vmul.f32 %v5291_v17, %v5283_v39  ;;  %v5293_v22 = vpop.eup %5292 }
0x10c7   :  { %v3925_v29 = vmul.f32 %v5293_v22, %v7168_v48  ;;  %v5295_v49 = vpop.eup %5294 }
0x10c8   :  { %5296 = vtanh.f32 %v3928_v41 }
0x10c9   :  { %v3929_v47 = vadd.f32 %v3927_v45, %v3925_v29  ;;  %5298 = vrcp.f32 %v3919_v46 }
0x10cb   :  { %5300 = vtanh.f32 %v3929_v47 }
0x10d2   :  { %v5297_v30 = vpop.eup %5296 }
0x10d3   :  { %v3932_v3 = vmul.f32 %v5297_v30, %v5295_v49  ;;  %v5299_v58 = vpop.eup %5298 }
0x10d5   :  { %v5301_v60 = vpop.eup %5300 }
0x10d6   :  { %v3933_v0 = vmul.f32 %v5301_v60, %v5299_v58 }
0x10d8   :  { %v3934_v13 = vpack.c.bf16 %v3933_v0, %v3932_v3 }
0x10da   :  { %4320 = vmatmul.mubr.bf16.vlgmr.msra.gmra.mrb[64].mxu0 %v3934_v13 }
0x11ad   :  { %v4040_v40 = vpop.f32.mrb[64].mxu0 }
0x11ae   :  { %v4041_v16 = vadd.f32 %v4285_v44, %v4040_v40  ;;  %v4321_v59 = vpop.f32.mrb[65].mxu0 }
0x11af   :  { %v4043_v20 = vpop.f32.mrb[66].mxu0 }
0x11b0   :  { %4047 = vst [vmem:[%s7223_s9] sm:$0xff] %v4041_v16  ;;  %v4044_v48 = vadd.f32 %v4285_v44, %v4043_v20  ;;  %v4322_v12 = vpop.f32.mrb[67].mxu0 }
0x11b2   :  { %4048 = vst [vmem:[%s7223_s9 + $0x8] sm:$0xff] %v4044_v48 }

</bundles_post_ra>
